<compile_context>
chip_gen: v7x
topology: tpu7x:2x2x1
jax: 0.10.0
libtpu: 0.0.40
codegen_flags: <defaults>
</compile_context>

<pallas_src>
import jax
import jax.numpy as jnp
from jax.experimental import pallas as pl
from jax.experimental.pallas import tpu as pltpu

VMEM = pl.BlockSpec(memory_space=pltpu.MemorySpace.VMEM)


# ------------------------------ Fused decoder kernel -------------------------

def _make_decoder_kernel(B, L, Ls, H, hd, NL):
    """Whole-decoder kernel: NL layers + fc_out, one invocation.

    Inputs : trg [B*L,d] f32, enc [B*Ls,d] bf16, stacked per-layer weights
             (leading dim NL), fc_out weight/bias (lane-padded).
    Outputs: logits [B*L, out_pad] f32, attention [H, B, L, Ls] f32
             (encoder-attention of the last layer only).
    """
    d = H * hd
    inv_scale = 1.0 / (float(hd) ** 0.5)   # reference: scale = sqrt(head_dim)
    f32 = jnp.float32
    bf16 = jnp.bfloat16

    def kernel(trg_ref, enc_ref,
               wqkv_s_ref, bqkv_s_ref, wo_s_ref, bo_s_ref,
               wq_e_ref, bq_e_ref, wkv_e_ref, bkv_e_ref, wo_e_ref, bo_e_ref,
               ln_g_ref, ln_b_ref,
               w1_ref, b1_ref, w2_ref, b2_ref,
               wout_ref, bout_ref,
               logits_ref, attn_ref):

        def mm(a, w, b):
            # bf16 operands on the MXU, f32 accumulation, f32 bias add.
            return jnp.dot(a.astype(bf16), w, preferred_element_type=f32) + b

        def mha(q2d, k2d, v2d, Lq, Lk, want_attn):
            # q2d already carries the 1/sqrt(head_dim) scale (folded into Q).
            q = q2d.reshape(B, Lq, d).astype(bf16)
            k = k2d.reshape(B, Lk, d).astype(bf16)
            v = v2d.reshape(B, Lk, d).astype(bf16)
            head_outs, head_attns = [], []
            for h in range(H):                       # static unroll over heads
                lo, hi = h * hd, (h + 1) * hd
                e = jnp.einsum("bqd,bkd->bqk", q[:, :, lo:hi], k[:, :, lo:hi],
                               preferred_element_type=f32)
                m = jnp.max(e, axis=-1, keepdims=True)
                p = jnp.exp(e - m)
                attn = p * pl.reciprocal(jnp.sum(p, axis=-1, keepdims=True),
                                         approx=True)
                o = jnp.einsum("bqk,bkd->bqd", attn.astype(bf16),
                               v[:, :, lo:hi], preferred_element_type=f32)
                head_outs.append(o)
                if want_attn:
                    head_attns.append(attn)
            out = jnp.concatenate(head_outs, axis=-1).reshape(B * Lq, d)
            return out, head_attns

        x = trg_ref[...]          # [B*L, d] f32 residual stream
        enc = enc_ref[...]        # [B*Ls, d] bf16

        last_attns = None
        for i in range(NL):       # static unroll over decoder layers
            g = ln_g_ref[i]       # [1, d]
            beta = ln_b_ref[i]    # [1, d]

            def add_ln(res, upd, g=g, beta=beta):
                # LayerNorm(res + upd), eps=1e-5 (PyTorch default), f32 math.
                z = res + upd
                mu = jnp.mean(z, axis=-1, keepdims=True)
                var = jnp.mean(jnp.square(z - mu), axis=-1, keepdims=True)
                return (z - mu) * jax.lax.rsqrt(var + 1e-5) * g + beta

            # -- self attention (map discarded -> never stored)
            qkv = mm(x, wqkv_s_ref[i], bqkv_s_ref[i])          # [B*L, 3d]
            sa, _ = mha(qkv[:, :d] * inv_scale, qkv[:, d:2 * d],
                        qkv[:, 2 * d:], L, L, want_attn=False)
            x = add_ln(x, mm(sa, wo_s_ref[i], bo_s_ref[i]))

            # -- encoder attention (map kept only for the last layer)
            qe = mm(x, wq_e_ref[i], bq_e_ref[i]) * inv_scale
            kv = mm(enc, wkv_e_ref[i], bkv_e_ref[i])            # [B*Ls, 2d]
            want = (i == NL - 1)
            ea, attns = mha(qe, kv[:, :d], kv[:, d:], L, Ls, want_attn=want)
            if want:
                last_attns = attns
            x = add_ln(x, mm(ea, wo_e_ref[i], bo_e_ref[i]))

            # -- position-wise feed forward
            hmid = jnp.maximum(mm(x, w1_ref[i], b1_ref[i]), 0.0)
            x = add_ln(x, mm(hmid, w2_ref[i], b2_ref[i]))

        # -- final projection (lane-dense padded output)
        logits_ref[...] = mm(x, wout_ref[...], bout_ref[...])
        for h in range(H):
            attn_ref[h] = last_attns[h]                         # [B, L, Ls]

    return kernel


# --------------------------------- Forward -----------------------------------

def decoder_forward(trg_tokens, enc_src, params, n_heads):
    b, l = trg_tokens.shape
    d = params["pos_emb"].shape[1]
    ls = enc_src.shape[1]
    out_dim = params["fc_out_w"].shape[1]
    layers = params["layers"]
    nl = len(layers)

    # Embedding gathers + scale/add are glue (plain JAX); dropout = identity.
    x = (params["tok_emb"][trg_tokens] * (float(d) ** 0.5)
         + params["pos_emb"][jnp.arange(l)][None])
    x2d = x.reshape(b * l, d).astype(jnp.float32)
    enc2d = enc_src.reshape(b * ls, d).astype(jnp.bfloat16)

    # Pad fc_out to a multiple of 128 lanes (unmasked stores); slice afterwards.
    pad = (-out_dim) % 128
    fc_w = jnp.pad(params["fc_out_w"], ((0, 0), (0, pad)))
    fc_b = jnp.pad(params["fc_out_b"], ((0, pad),)).reshape(1, -1)
    out_pad = fc_w.shape[1]

    def stack(name, is_bias=False):
        arrs = [lp[name] for lp in layers]
        if is_bias:
            arrs = [a.reshape(1, -1) for a in arrs]
        return jnp.stack(arrs, axis=0)

    args = [
        x2d, enc2d,
        stack("self_wqkv"), stack("self_bqkv", True),
        stack("self_wo"), stack("self_bo", True),
        stack("enc_wq"), stack("enc_bq", True),
        stack("enc_wkv"), stack("enc_bkv", True),
        stack("enc_wo"), stack("enc_bo", True),
        stack("ln_g", True), stack("ln_b", True),
        stack("w1"), stack("b1", True),
        stack("w2"), stack("b2", True),
        fc_w, fc_b,
    ]

    kernel = _make_decoder_kernel(b, l, ls, n_heads, d // n_heads, nl)
    logits_pad, attn_hb = pl.pallas_call(
        kernel,
        out_shape=(jax.ShapeDtypeStruct((b * l, out_pad), jnp.float32),
                   jax.ShapeDtypeStruct((n_heads, b, l, ls), jnp.float32)),
        in_specs=[VMEM] * len(args),
        out_specs=(VMEM, VMEM),
    )(*args)

    output = logits_pad[:, :out_dim].reshape(b, l, out_dim)
    attention = jnp.transpose(attn_hb, (1, 0, 2, 3))   # [B, H, L, Ls]
    return output, attention


# ----------------------------- Parameter setup --------------------------------

def init_params(key, cfg):
    d = cfg["hidden_size"]
    pf = cfg["pf_size"]
    out = cfg["output_size"]
    length = cfg["length"]
    keys = iter(jax.random.split(key, 512))

    def w(shape, s=0.02, dtype=jnp.bfloat16):
        return (s * jax.random.normal(next(keys), shape)).astype(dtype)

    def bias(n):
        return w((n,), dtype=jnp.float32)

    layers = []
    for _ in range(cfg["num_layers"]):
        layers.append(dict(
            # one LayerNorm instance per DecoderLayer, shared by all 3 norms
            ln_g=jnp.ones((d,), jnp.float32),
            ln_b=jnp.zeros((d,), jnp.float32),
            # fused Q/K/V projection for self attention
            self_wqkv=w((d, 3 * d)), self_bqkv=bias(3 * d),
            self_wo=w((d, d)), self_bo=bias(d),
            # encoder attention: Q from trg, fused K/V from enc_src
            enc_wq=w((d, d)), enc_bq=bias(d),
            enc_wkv=w((d, 2 * d)), enc_bkv=bias(2 * d),
            enc_wo=w((d, d)), enc_bo=bias(d),
            # position-wise feed forward
            w1=w((d, pf)), b1=bias(pf),
            w2=w((pf, d)), b2=bias(d),
        ))

    return dict(
        # TODO(synk): Decoder.forward uses self.tok_embedding, which is never
        # created in __init__; assume nn.Embedding(output_size, hidden_size).
        tok_emb=w((out, d), 1.0, jnp.float32),
        pos_emb=w((length, d), 1.0, jnp.float32),
        layers=layers,
        fc_out_w=w((d, out)),
        fc_out_b=bias(out),
    )


# ---------------------------------- Main --------------------------------------

if __name__ == "__main__":
    config = dict(output_size=16, hidden_size=32, num_layers=2, n_heads=4,
                  pf_size=64, dropout=0.1, length=16)

    key = jax.random.PRNGKey(0)
    k_params, k_trg, k_enc = jax.random.split(key, 3)

    params = init_params(k_params, config)

    batch, trg_len, src_len = 2, 8, 8
    trg = jax.random.randint(k_trg, (batch, trg_len), 0, config["output_size"])
    enc_src = jax.random.normal(k_enc, (batch, src_len, config["hidden_size"]),
                                jnp.float32)

    output, attention = decoder_forward(trg, enc_src, params, config["n_heads"])
    jax.block_until_ready((output, attention))

    assert output.shape == (batch, trg_len, config["output_size"])
    assert attention.shape == (batch, config["n_heads"], trg_len, src_len)
    print("KERNEL_OK")
</pallas_src>

<mosaic_0001>
module attributes {stable_mosaic.version = 11 : i64} {
  func.func @kernel(%arg0: memref<16x32xf32, #tpu.memory_space<vmem>>, %arg1: memref<16x32xbf16, #tpu.memory_space<vmem>>, %arg2: memref<2x32x96xbf16, #tpu.memory_space<vmem>>, %arg3: memref<2x1x96xf32, #tpu.memory_space<vmem>>, %arg4: memref<2x32x32xbf16, #tpu.memory_space<vmem>>, %arg5: memref<2x1x32xf32, #tpu.memory_space<vmem>>, %arg6: memref<2x32x32xbf16, #tpu.memory_space<vmem>>, %arg7: memref<2x1x32xf32, #tpu.memory_space<vmem>>, %arg8: memref<2x32x64xbf16, #tpu.memory_space<vmem>>, %arg9: memref<2x1x64xf32, #tpu.memory_space<vmem>>, %arg10: memref<2x32x32xbf16, #tpu.memory_space<vmem>>, %arg11: memref<2x1x32xf32, #tpu.memory_space<vmem>>, %arg12: memref<2x1x32xf32, #tpu.memory_space<vmem>>, %arg13: memref<2x1x32xf32, #tpu.memory_space<vmem>>, %arg14: memref<2x32x64xbf16, #tpu.memory_space<vmem>>, %arg15: memref<2x1x64xf32, #tpu.memory_space<vmem>>, %arg16: memref<2x64x32xbf16, #tpu.memory_space<vmem>>, %arg17: memref<2x1x32xf32, #tpu.memory_space<vmem>>, %arg18: memref<32x128xbf16, #tpu.memory_space<vmem>>, %arg19: memref<1x128xf32, #tpu.memory_space<vmem>>, %arg20: memref<16x128xf32, #tpu.memory_space<vmem>>, %arg21: memref<4x2x8x8xf32, #tpu.memory_space<vmem>>) attributes {dimension_semantics = [], scalar_prefetch = 0 : i64, scratch_operands = 0 : i64, tpu.core_type = #tpu.core_type<tc>} {
    %c0 = arith.constant 0 : index
    %c0_0 = arith.constant 0 : index
    %0 = vector.load %arg0[%c0, %c0_0] : memref<16x32xf32, #tpu.memory_space<vmem>>, vector<16x32xf32>
    %c0_1 = arith.constant 0 : index
    %c0_2 = arith.constant 0 : index
    %1 = vector.load %arg1[%c0_1, %c0_2] : memref<16x32xbf16, #tpu.memory_space<vmem>>, vector<16x32xbf16>
    %c0_3 = arith.constant 0 : index
    %c0_4 = arith.constant 0 : index
    %c0_5 = arith.constant 0 : index
    %2 = vector.load %arg12[%c0_3, %c0_4, %c0_5] : memref<2x1x32xf32, #tpu.memory_space<vmem>>, vector<1x1x32xf32>
    %3 = vector.shape_cast %2 : vector<1x1x32xf32> to vector<1x32xf32>
    %c0_6 = arith.constant 0 : index
    %c0_7 = arith.constant 0 : index
    %c0_8 = arith.constant 0 : index
    %4 = vector.load %arg13[%c0_6, %c0_7, %c0_8] : memref<2x1x32xf32, #tpu.memory_space<vmem>>, vector<1x1x32xf32>
    %5 = vector.shape_cast %4 : vector<1x1x32xf32> to vector<1x32xf32>
    %c0_9 = arith.constant 0 : index
    %c0_10 = arith.constant 0 : index
    %c0_11 = arith.constant 0 : index
    %6 = vector.load %arg2[%c0_9, %c0_10, %c0_11] : memref<2x32x96xbf16, #tpu.memory_space<vmem>>, vector<1x32x96xbf16>
    %7 = vector.shape_cast %6 : vector<1x32x96xbf16> to vector<32x96xbf16>
    %c0_12 = arith.constant 0 : index
    %c0_13 = arith.constant 0 : index
    %c0_14 = arith.constant 0 : index
    %8 = vector.load %arg3[%c0_12, %c0_13, %c0_14] : memref<2x1x96xf32, #tpu.memory_space<vmem>>, vector<1x1x96xf32>
    %9 = vector.shape_cast %8 : vector<1x1x96xf32> to vector<1x96xf32>
    %10 = arith.truncf %0 : vector<16x32xf32> to vector<16x32xbf16>
    %cst = arith.constant dense<0.000000e+00> : vector<16x96xf32>
    %11 = tpu.matmul %10, %7, %cst {dimension_numbers = #tpu.dot_dimension_numbers<[1], [0], [0], [1], [0, 0, 1, 1], [], []>} : vector<16x32xbf16>, vector<32x96xbf16>, vector<16x96xf32> -> vector<16x96xf32>
    %12 = vector.broadcast %9 : vector<1x96xf32> to vector<16x96xf32>
    %13 = arith.addf %11, %12 : vector<16x96xf32>
    %14 = vector.extract_strided_slice %13 {offsets = [0, 0], sizes = [16, 32], strides = [1, 1]} : vector<16x96xf32> to vector<16x32xf32>
    %cst_15 = arith.constant 0.353553385 : f32
    %15 = vector.broadcast %cst_15 : f32 to vector<16x32xf32>
    %16 = arith.mulf %14, %15 : vector<16x32xf32>
    %17 = vector.extract_strided_slice %13 {offsets = [0, 32], sizes = [16, 32], strides = [1, 1]} : vector<16x96xf32> to vector<16x32xf32>
    %18 = vector.extract_strided_slice %13 {offsets = [0, 64], sizes = [16, 32], strides = [1, 1]} : vector<16x96xf32> to vector<16x32xf32>
    %19 = vector.shape_cast %16 : vector<16x32xf32> to vector<2x8x32xf32>
    %20 = arith.truncf %19 : vector<2x8x32xf32> to vector<2x8x32xbf16>
    %21 = vector.shape_cast %17 : vector<16x32xf32> to vector<2x8x32xf32>
    %22 = arith.truncf %21 : vector<2x8x32xf32> to vector<2x8x32xbf16>
    %23 = vector.shape_cast %18 : vector<16x32xf32> to vector<2x8x32xf32>
    %24 = arith.truncf %23 : vector<2x8x32xf32> to vector<2x8x32xbf16>
    %25 = vector.extract_strided_slice %20 {offsets = [0, 0, 0], sizes = [2, 8, 8], strides = [1, 1, 1]} : vector<2x8x32xbf16> to vector<2x8x8xbf16>
    %26 = vector.extract_strided_slice %22 {offsets = [0, 0, 0], sizes = [2, 8, 8], strides = [1, 1, 1]} : vector<2x8x32xbf16> to vector<2x8x8xbf16>
    "tpu.trace_start"() <{level = 10 : i32, message = "bqd,bkd->bqk"}> : () -> ()
    %cst_16 = arith.constant dense<0.000000e+00> : vector<2x8x8xf32>
    %27 = tpu.matmul %25, %26, %cst_16 {dimension_numbers = #tpu.dot_dimension_numbers<[2], [2], [1], [1], [0, 0, 0, 1, 1, 1], [0], [0]>} : vector<2x8x8xbf16>, vector<2x8x8xbf16>, vector<2x8x8xf32> -> vector<2x8x8xf32>
    "tpu.trace_stop"() : () -> ()
    %cst_17 = arith.constant dense<0xFF800000> : vector<2x8xf32>
    %28 = vector.multi_reduction <maximumf>, %27, %cst_17 [2] : vector<2x8x8xf32> to vector<2x8xf32>
    %29 = vector.shape_cast %28 : vector<2x8xf32> to vector<2x8x1xf32>
    %30 = vector.broadcast %29 : vector<2x8x1xf32> to vector<2x8x8xf32>
    %31 = arith.subf %27, %30 : vector<2x8x8xf32>
    %32 = math.exp %31 : vector<2x8x8xf32>
    %cst_18 = arith.constant dense<0.000000e+00> : vector<2x8xf32>
    %33 = vector.multi_reduction <add>, %32, %cst_18 [2] : vector<2x8x8xf32> to vector<2x8xf32>
    %34 = vector.shape_cast %33 : vector<2x8xf32> to vector<2x8x1xf32>
    %35 = tpu.reciprocal %34 {approx = true} : vector<2x8x1xf32> -> vector<2x8x1xf32>
    %36 = vector.broadcast %35 : vector<2x8x1xf32> to vector<2x8x8xf32>
    %37 = arith.mulf %32, %36 : vector<2x8x8xf32>
    %38 = arith.truncf %37 : vector<2x8x8xf32> to vector<2x8x8xbf16>
    %39 = vector.extract_strided_slice %24 {offsets = [0, 0, 0], sizes = [2, 8, 8], strides = [1, 1, 1]} : vector<2x8x32xbf16> to vector<2x8x8xbf16>
    "tpu.trace_start"() <{level = 10 : i32, message = "bqk,bkd->bqd"}> : () -> ()
    %cst_19 = arith.constant dense<0.000000e+00> : vector<2x8x8xf32>
    %40 = tpu.matmul %38, %39, %cst_19 {dimension_numbers = #tpu.dot_dimension_numbers<[2], [1], [1], [2], [0, 0, 0, 1, 1, 2], [0], [0]>} : vector<2x8x8xbf16>, vector<2x8x8xbf16>, vector<2x8x8xf32> -> vector<2x8x8xf32>
    "tpu.trace_stop"() : () -> ()
    %41 = vector.extract_strided_slice %20 {offsets = [0, 0, 8], sizes = [2, 8, 8], strides = [1, 1, 1]} : vector<2x8x32xbf16> to vector<2x8x8xbf16>
    %42 = vector.extract_strided_slice %22 {offsets = [0, 0, 8], sizes = [2, 8, 8], strides = [1, 1, 1]} : vector<2x8x32xbf16> to vector<2x8x8xbf16>
    "tpu.trace_start"() <{level = 10 : i32, message = "bqd,bkd->bqk"}> : () -> ()
    %cst_20 = arith.constant dense<0.000000e+00> : vector<2x8x8xf32>
    %43 = tpu.matmul %41, %42, %cst_20 {dimension_numbers = #tpu.dot_dimension_numbers<[2], [2], [1], [1], [0, 0, 0, 1, 1, 1], [0], [0]>} : vector<2x8x8xbf16>, vector<2x8x8xbf16>, vector<2x8x8xf32> -> vector<2x8x8xf32>
    "tpu.trace_stop"() : () -> ()
    %cst_21 = arith.constant dense<0xFF800000> : vector<2x8xf32>
    %44 = vector.multi_reduction <maximumf>, %43, %cst_21 [2] : vector<2x8x8xf32> to vector<2x8xf32>
    %45 = vector.shape_cast %44 : vector<2x8xf32> to vector<2x8x1xf32>
    %46 = vector.broadcast %45 : vector<2x8x1xf32> to vector<2x8x8xf32>
    %47 = arith.subf %43, %46 : vector<2x8x8xf32>
    %48 = math.exp %47 : vector<2x8x8xf32>
    %cst_22 = arith.constant dense<0.000000e+00> : vector<2x8xf32>
    %49 = vector.multi_reduction <add>, %48, %cst_22 [2] : vector<2x8x8xf32> to vector<2x8xf32>
    %50 = vector.shape_cast %49 : vector<2x8xf32> to vector<2x8x1xf32>
    %51 = tpu.reciprocal %50 {approx = true} : vector<2x8x1xf32> -> vector<2x8x1xf32>
    %52 = vector.broadcast %51 : vector<2x8x1xf32> to vector<2x8x8xf32>
    %53 = arith.mulf %48, %52 : vector<2x8x8xf32>
    %54 = arith.truncf %53 : vector<2x8x8xf32> to vector<2x8x8xbf16>
    %55 = vector.extract_strided_slice %24 {offsets = [0, 0, 8], sizes = [2, 8, 8], strides = [1, 1, 1]} : vector<2x8x32xbf16> to vector<2x8x8xbf16>
    "tpu.trace_start"() <{level = 10 : i32, message = "bqk,bkd->bqd"}> : () -> ()
    %cst_23 = arith.constant dense<0.000000e+00> : vector<2x8x8xf32>
    %56 = tpu.matmul %54, %55, %cst_23 {dimension_numbers = #tpu.dot_dimension_numbers<[2], [1], [1], [2], [0, 0, 0, 1, 1, 2], [0], [0]>} : vector<2x8x8xbf16>, vector<2x8x8xbf16>, vector<2x8x8xf32> -> vector<2x8x8xf32>
    "tpu.trace_stop"() : () -> ()
    %57 = vector.extract_strided_slice %20 {offsets = [0, 0, 16], sizes = [2, 8, 8], strides = [1, 1, 1]} : vector<2x8x32xbf16> to vector<2x8x8xbf16>
    %58 = vector.extract_strided_slice %22 {offsets = [0, 0, 16], sizes = [2, 8, 8], strides = [1, 1, 1]} : vector<2x8x32xbf16> to vector<2x8x8xbf16>
    "tpu.trace_start"() <{level = 10 : i32, message = "bqd,bkd->bqk"}> : () -> ()
    %cst_24 = arith.constant dense<0.000000e+00> : vector<2x8x8xf32>
    %59 = tpu.matmul %57, %58, %cst_24 {dimension_numbers = #tpu.dot_dimension_numbers<[2], [2], [1], [1], [0, 0, 0, 1, 1, 1], [0], [0]>} : vector<2x8x8xbf16>, vector<2x8x8xbf16>, vector<2x8x8xf32> -> vector<2x8x8xf32>
    "tpu.trace_stop"() : () -> ()
    %cst_25 = arith.constant dense<0xFF800000> : vector<2x8xf32>
    %60 = vector.multi_reduction <maximumf>, %59, %cst_25 [2] : vector<2x8x8xf32> to vector<2x8xf32>
    %61 = vector.shape_cast %60 : vector<2x8xf32> to vector<2x8x1xf32>
    %62 = vector.broadcast %61 : vector<2x8x1xf32> to vector<2x8x8xf32>
    %63 = arith.subf %59, %62 : vector<2x8x8xf32>
    %64 = math.exp %63 : vector<2x8x8xf32>
    %cst_26 = arith.constant dense<0.000000e+00> : vector<2x8xf32>
    %65 = vector.multi_reduction <add>, %64, %cst_26 [2] : vector<2x8x8xf32> to vector<2x8xf32>
    %66 = vector.shape_cast %65 : vector<2x8xf32> to vector<2x8x1xf32>
    %67 = tpu.reciprocal %66 {approx = true} : vector<2x8x1xf32> -> vector<2x8x1xf32>
    %68 = vector.broadcast %67 : vector<2x8x1xf32> to vector<2x8x8xf32>
    %69 = arith.mulf %64, %68 : vector<2x8x8xf32>
    %70 = arith.truncf %69 : vector<2x8x8xf32> to vector<2x8x8xbf16>
    %71 = vector.extract_strided_slice %24 {offsets = [0, 0, 16], sizes = [2, 8, 8], strides = [1, 1, 1]} : vector<2x8x32xbf16> to vector<2x8x8xbf16>
    "tpu.trace_start"() <{level = 10 : i32, message = "bqk,bkd->bqd"}> : () -> ()
    %cst_27 = arith.constant dense<0.000000e+00> : vector<2x8x8xf32>
    %72 = tpu.matmul %70, %71, %cst_27 {dimension_numbers = #tpu.dot_dimension_numbers<[2], [1], [1], [2], [0, 0, 0, 1, 1, 2], [0], [0]>} : vector<2x8x8xbf16>, vector<2x8x8xbf16>, vector<2x8x8xf32> -> vector<2x8x8xf32>
    "tpu.trace_stop"() : () -> ()
    %73 = vector.extract_strided_slice %20 {offsets = [0, 0, 24], sizes = [2, 8, 8], strides = [1, 1, 1]} : vector<2x8x32xbf16> to vector<2x8x8xbf16>
    %74 = vector.extract_strided_slice %22 {offsets = [0, 0, 24], sizes = [2, 8, 8], strides = [1, 1, 1]} : vector<2x8x32xbf16> to vector<2x8x8xbf16>
    "tpu.trace_start"() <{level = 10 : i32, message = "bqd,bkd->bqk"}> : () -> ()
    %cst_28 = arith.constant dense<0.000000e+00> : vector<2x8x8xf32>
    %75 = tpu.matmul %73, %74, %cst_28 {dimension_numbers = #tpu.dot_dimension_numbers<[2], [2], [1], [1], [0, 0, 0, 1, 1, 1], [0], [0]>} : vector<2x8x8xbf16>, vector<2x8x8xbf16>, vector<2x8x8xf32> -> vector<2x8x8xf32>
    "tpu.trace_stop"() : () -> ()
    %cst_29 = arith.constant dense<0xFF800000> : vector<2x8xf32>
    %76 = vector.multi_reduction <maximumf>, %75, %cst_29 [2] : vector<2x8x8xf32> to vector<2x8xf32>
    %77 = vector.shape_cast %76 : vector<2x8xf32> to vector<2x8x1xf32>
    %78 = vector.broadcast %77 : vector<2x8x1xf32> to vector<2x8x8xf32>
    %79 = arith.subf %75, %78 : vector<2x8x8xf32>
    %80 = math.exp %79 : vector<2x8x8xf32>
    %cst_30 = arith.constant dense<0.000000e+00> : vector<2x8xf32>
    %81 = vector.multi_reduction <add>, %80, %cst_30 [2] : vector<2x8x8xf32> to vector<2x8xf32>
    %82 = vector.shape_cast %81 : vector<2x8xf32> to vector<2x8x1xf32>
    %83 = tpu.reciprocal %82 {approx = true} : vector<2x8x1xf32> -> vector<2x8x1xf32>
    %84 = vector.broadcast %83 : vector<2x8x1xf32> to vector<2x8x8xf32>
    %85 = arith.mulf %80, %84 : vector<2x8x8xf32>
    %86 = arith.truncf %85 : vector<2x8x8xf32> to vector<2x8x8xbf16>
    %87 = vector.extract_strided_slice %24 {offsets = [0, 0, 24], sizes = [2, 8, 8], strides = [1, 1, 1]} : vector<2x8x32xbf16> to vector<2x8x8xbf16>
    "tpu.trace_start"() <{level = 10 : i32, message = "bqk,bkd->bqd"}> : () -> ()
    %cst_31 = arith.constant dense<0.000000e+00> : vector<2x8x8xf32>
    %88 = tpu.matmul %86, %87, %cst_31 {dimension_numbers = #tpu.dot_dimension_numbers<[2], [1], [1], [2], [0, 0, 0, 1, 1, 2], [0], [0]>} : vector<2x8x8xbf16>, vector<2x8x8xbf16>, vector<2x8x8xf32> -> vector<2x8x8xf32>
    "tpu.trace_stop"() : () -> ()
    %89 = tpu.concatenate %40, %56, %72, %88 in 2 : vector<2x8x8xf32>, vector<2x8x8xf32>, vector<2x8x8xf32>, vector<2x8x8xf32> -> vector<2x8x32xf32>
    %90 = vector.shape_cast %89 : vector<2x8x32xf32> to vector<16x32xf32>
    %c0_32 = arith.constant 0 : index
    %c0_33 = arith.constant 0 : index
    %c0_34 = arith.constant 0 : index
    %91 = vector.load %arg4[%c0_32, %c0_33, %c0_34] : memref<2x32x32xbf16, #tpu.memory_space<vmem>>, vector<1x32x32xbf16>
    %92 = vector.shape_cast %91 : vector<1x32x32xbf16> to vector<32x32xbf16>
    %c0_35 = arith.constant 0 : index
    %c0_36 = arith.constant 0 : index
    %c0_37 = arith.constant 0 : index
    %93 = vector.load %arg5[%c0_35, %c0_36, %c0_37] : memref<2x1x32xf32, #tpu.memory_space<vmem>>, vector<1x1x32xf32>
    %94 = vector.shape_cast %93 : vector<1x1x32xf32> to vector<1x32xf32>
    %95 = arith.truncf %90 : vector<16x32xf32> to vector<16x32xbf16>
    %cst_38 = arith.constant dense<0.000000e+00> : vector<16x32xf32>
    %96 = tpu.matmul %95, %92, %cst_38 {dimension_numbers = #tpu.dot_dimension_numbers<[1], [0], [0], [1], [0, 0, 1, 1], [], []>} : vector<16x32xbf16>, vector<32x32xbf16>, vector<16x32xf32> -> vector<16x32xf32>
    %97 = vector.broadcast %94 : vector<1x32xf32> to vector<16x32xf32>
    %98 = arith.addf %96, %97 : vector<16x32xf32>
    %99 = arith.addf %0, %98 : vector<16x32xf32>
    %cst_39 = arith.constant dense<0.000000e+00> : vector<16xf32>
    %100 = vector.multi_reduction <add>, %99, %cst_39 [1] : vector<16x32xf32> to vector<16xf32>
    %101 = vector.shape_cast %100 : vector<16xf32> to vector<16x1xf32>
    %cst_40 = arith.constant 3.200000e+01 : f32
    %102 = vector.broadcast %cst_40 : f32 to vector<16x1xf32>
    %103 = arith.divf %101, %102 : vector<16x1xf32>
    %104 = vector.broadcast %103 : vector<16x1xf32> to vector<16x32xf32>
    %105 = arith.subf %99, %104 : vector<16x32xf32>
    %106 = arith.mulf %105, %105 : vector<16x32xf32>
    %cst_41 = arith.constant dense<0.000000e+00> : vector<16xf32>
    %107 = vector.multi_reduction <add>, %106, %cst_41 [1] : vector<16x32xf32> to vector<16xf32>
    %108 = vector.shape_cast %107 : vector<16xf32> to vector<16x1xf32>
    %cst_42 = arith.constant 3.200000e+01 : f32
    %109 = vector.broadcast %cst_42 : f32 to vector<16x1xf32>
    %110 = arith.divf %108, %109 : vector<16x1xf32>
    %111 = vector.broadcast %103 : vector<16x1xf32> to vector<16x32xf32>
    %112 = arith.subf %99, %111 : vector<16x32xf32>
    %cst_43 = arith.constant 9.99999974E-6 : f32
    %113 = vector.broadcast %cst_43 : f32 to vector<16x1xf32>
    %114 = arith.addf %110, %113 : vector<16x1xf32>
    %115 = math.rsqrt %114 : vector<16x1xf32>
    %116 = vector.broadcast %115 : vector<16x1xf32> to vector<16x32xf32>
    %117 = arith.mulf %112, %116 : vector<16x32xf32>
    %118 = vector.broadcast %3 : vector<1x32xf32> to vector<16x32xf32>
    %119 = arith.mulf %117, %118 : vector<16x32xf32>
    %120 = vector.broadcast %5 : vector<1x32xf32> to vector<16x32xf32>
    %121 = arith.addf %119, %120 : vector<16x32xf32>
    %c0_44 = arith.constant 0 : index
    %c0_45 = arith.constant 0 : index
    %c0_46 = arith.constant 0 : index
    %122 = vector.load %arg6[%c0_44, %c0_45, %c0_46] : memref<2x32x32xbf16, #tpu.memory_space<vmem>>, vector<1x32x32xbf16>
    %123 = vector.shape_cast %122 : vector<1x32x32xbf16> to vector<32x32xbf16>
    %c0_47 = arith.constant 0 : index
    %c0_48 = arith.constant 0 : index
    %c0_49 = arith.constant 0 : index
    %124 = vector.load %arg7[%c0_47, %c0_48, %c0_49] : memref<2x1x32xf32, #tpu.memory_space<vmem>>, vector<1x1x32xf32>
    %125 = vector.shape_cast %124 : vector<1x1x32xf32> to vector<1x32xf32>
    %126 = arith.truncf %121 : vector<16x32xf32> to vector<16x32xbf16>
    %cst_50 = arith.constant dense<0.000000e+00> : vector<16x32xf32>
    %127 = tpu.matmul %126, %123, %cst_50 {dimension_numbers = #tpu.dot_dimension_numbers<[1], [0], [0], [1], [0, 0, 1, 1], [], []>} : vector<16x32xbf16>, vector<32x32xbf16>, vector<16x32xf32> -> vector<16x32xf32>
    %128 = vector.broadcast %125 : vector<1x32xf32> to vector<16x32xf32>
    %129 = arith.addf %127, %128 : vector<16x32xf32>
    %cst_51 = arith.constant 0.353553385 : f32
    %130 = vector.broadcast %cst_51 : f32 to vector<16x32xf32>
    %131 = arith.mulf %129, %130 : vector<16x32xf32>
    %c0_52 = arith.constant 0 : index
    %c0_53 = arith.constant 0 : index
    %c0_54 = arith.constant 0 : index
    %132 = vector.load %arg8[%c0_52, %c0_53, %c0_54] : memref<2x32x64xbf16, #tpu.memory_space<vmem>>, vector<1x32x64xbf16>
    %133 = vector.shape_cast %132 : vector<1x32x64xbf16> to vector<32x64xbf16>
    %c0_55 = arith.constant 0 : index
    %c0_56 = arith.constant 0 : index
    %c0_57 = arith.constant 0 : index
    %134 = vector.load %arg9[%c0_55, %c0_56, %c0_57] : memref<2x1x64xf32, #tpu.memory_space<vmem>>, vector<1x1x64xf32>
    %135 = vector.shape_cast %134 : vector<1x1x64xf32> to vector<1x64xf32>
    %cst_58 = arith.constant dense<0.000000e+00> : vector<16x64xf32>
    %136 = tpu.matmul %1, %133, %cst_58 {dimension_numbers = #tpu.dot_dimension_numbers<[1], [0], [0], [1], [0, 0, 1, 1], [], []>} : vector<16x32xbf16>, vector<32x64xbf16>, vector<16x64xf32> -> vector<16x64xf32>
    %137 = vector.broadcast %135 : vector<1x64xf32> to vector<16x64xf32>
    %138 = arith.addf %136, %137 : vector<16x64xf32>
    %139 = vector.extract_strided_slice %138 {offsets = [0, 0], sizes = [16, 32], strides = [1, 1]} : vector<16x64xf32> to vector<16x32xf32>
    %140 = vector.extract_strided_slice %138 {offsets = [0, 32], sizes = [16, 32], strides = [1, 1]} : vector<16x64xf32> to vector<16x32xf32>
    %141 = vector.shape_cast %131 : vector<16x32xf32> to vector<2x8x32xf32>
    %142 = arith.truncf %141 : vector<2x8x32xf32> to vector<2x8x32xbf16>
    %143 = vector.shape_cast %139 : vector<16x32xf32> to vector<2x8x32xf32>
    %144 = arith.truncf %143 : vector<2x8x32xf32> to vector<2x8x32xbf16>
    %145 = vector.shape_cast %140 : vector<16x32xf32> to vector<2x8x32xf32>
    %146 = arith.truncf %145 : vector<2x8x32xf32> to vector<2x8x32xbf16>
    %147 = vector.extract_strided_slice %142 {offsets = [0, 0, 0], sizes = [2, 8, 8], strides = [1, 1, 1]} : vector<2x8x32xbf16> to vector<2x8x8xbf16>
    %148 = vector.extract_strided_slice %144 {offsets = [0, 0, 0], sizes = [2, 8, 8], strides = [1, 1, 1]} : vector<2x8x32xbf16> to vector<2x8x8xbf16>
    "tpu.trace_start"() <{level = 10 : i32, message = "bqd,bkd->bqk"}> : () -> ()
    %cst_59 = arith.constant dense<0.000000e+00> : vector<2x8x8xf32>
    %149 = tpu.matmul %147, %148, %cst_59 {dimension_numbers = #tpu.dot_dimension_numbers<[2], [2], [1], [1], [0, 0, 0, 1, 1, 1], [0], [0]>} : vector<2x8x8xbf16>, vector<2x8x8xbf16>, vector<2x8x8xf32> -> vector<2x8x8xf32>
    "tpu.trace_stop"() : () -> ()
    %cst_60 = arith.constant dense<0xFF800000> : vector<2x8xf32>
    %150 = vector.multi_reduction <maximumf>, %149, %cst_60 [2] : vector<2x8x8xf32> to vector<2x8xf32>
    %151 = vector.shape_cast %150 : vector<2x8xf32> to vector<2x8x1xf32>
    %152 = vector.broadcast %151 : vector<2x8x1xf32> to vector<2x8x8xf32>
    %153 = arith.subf %149, %152 : vector<2x8x8xf32>
    %154 = math.exp %153 : vector<2x8x8xf32>
    %cst_61 = arith.constant dense<0.000000e+00> : vector<2x8xf32>
    %155 = vector.multi_reduction <add>, %154, %cst_61 [2] : vector<2x8x8xf32> to vector<2x8xf32>
    %156 = vector.shape_cast %155 : vector<2x8xf32> to vector<2x8x1xf32>
    %157 = tpu.reciprocal %156 {approx = true} : vector<2x8x1xf32> -> vector<2x8x1xf32>
    %158 = vector.broadcast %157 : vector<2x8x1xf32> to vector<2x8x8xf32>
    %159 = arith.mulf %154, %158 : vector<2x8x8xf32>
    %160 = arith.truncf %159 : vector<2x8x8xf32> to vector<2x8x8xbf16>
    %161 = vector.extract_strided_slice %146 {offsets = [0, 0, 0], sizes = [2, 8, 8], strides = [1, 1, 1]} : vector<2x8x32xbf16> to vector<2x8x8xbf16>
    "tpu.trace_start"() <{level = 10 : i32, message = "bqk,bkd->bqd"}> : () -> ()
    %cst_62 = arith.constant dense<0.000000e+00> : vector<2x8x8xf32>
    %162 = tpu.matmul %160, %161, %cst_62 {dimension_numbers = #tpu.dot_dimension_numbers<[2], [1], [1], [2], [0, 0, 0, 1, 1, 2], [0], [0]>} : vector<2x8x8xbf16>, vector<2x8x8xbf16>, vector<2x8x8xf32> -> vector<2x8x8xf32>
    "tpu.trace_stop"() : () -> ()
    %163 = vector.extract_strided_slice %142 {offsets = [0, 0, 8], sizes = [2, 8, 8], strides = [1, 1, 1]} : vector<2x8x32xbf16> to vector<2x8x8xbf16>
    %164 = vector.extract_strided_slice %144 {offsets = [0, 0, 8], sizes = [2, 8, 8], strides = [1, 1, 1]} : vector<2x8x32xbf16> to vector<2x8x8xbf16>
    "tpu.trace_start"() <{level = 10 : i32, message = "bqd,bkd->bqk"}> : () -> ()
    %cst_63 = arith.constant dense<0.000000e+00> : vector<2x8x8xf32>
    %165 = tpu.matmul %163, %164, %cst_63 {dimension_numbers = #tpu.dot_dimension_numbers<[2], [2], [1], [1], [0, 0, 0, 1, 1, 1], [0], [0]>} : vector<2x8x8xbf16>, vector<2x8x8xbf16>, vector<2x8x8xf32> -> vector<2x8x8xf32>
    "tpu.trace_stop"() : () -> ()
    %cst_64 = arith.constant dense<0xFF800000> : vector<2x8xf32>
    %166 = vector.multi_reduction <maximumf>, %165, %cst_64 [2] : vector<2x8x8xf32> to vector<2x8xf32>
    %167 = vector.shape_cast %166 : vector<2x8xf32> to vector<2x8x1xf32>
    %168 = vector.broadcast %167 : vector<2x8x1xf32> to vector<2x8x8xf32>
    %169 = arith.subf %165, %168 : vector<2x8x8xf32>
    %170 = math.exp %169 : vector<2x8x8xf32>
    %cst_65 = arith.constant dense<0.000000e+00> : vector<2x8xf32>
    %171 = vector.multi_reduction <add>, %170, %cst_65 [2] : vector<2x8x8xf32> to vector<2x8xf32>
    %172 = vector.shape_cast %171 : vector<2x8xf32> to vector<2x8x1xf32>
    %173 = tpu.reciprocal %172 {approx = true} : vector<2x8x1xf32> -> vector<2x8x1xf32>
    %174 = vector.broadcast %173 : vector<2x8x1xf32> to vector<2x8x8xf32>
    %175 = arith.mulf %170, %174 : vector<2x8x8xf32>
    %176 = arith.truncf %175 : vector<2x8x8xf32> to vector<2x8x8xbf16>
    %177 = vector.extract_strided_slice %146 {offsets = [0, 0, 8], sizes = [2, 8, 8], strides = [1, 1, 1]} : vector<2x8x32xbf16> to vector<2x8x8xbf16>
    "tpu.trace_start"() <{level = 10 : i32, message = "bqk,bkd->bqd"}> : () -> ()
    %cst_66 = arith.constant dense<0.000000e+00> : vector<2x8x8xf32>
    %178 = tpu.matmul %176, %177, %cst_66 {dimension_numbers = #tpu.dot_dimension_numbers<[2], [1], [1], [2], [0, 0, 0, 1, 1, 2], [0], [0]>} : vector<2x8x8xbf16>, vector<2x8x8xbf16>, vector<2x8x8xf32> -> vector<2x8x8xf32>
    "tpu.trace_stop"() : () -> ()
    %179 = vector.extract_strided_slice %142 {offsets = [0, 0, 16], sizes = [2, 8, 8], strides = [1, 1, 1]} : vector<2x8x32xbf16> to vector<2x8x8xbf16>
    %180 = vector.extract_strided_slice %144 {offsets = [0, 0, 16], sizes = [2, 8, 8], strides = [1, 1, 1]} : vector<2x8x32xbf16> to vector<2x8x8xbf16>
    "tpu.trace_start"() <{level = 10 : i32, message = "bqd,bkd->bqk"}> : () -> ()
    %cst_67 = arith.constant dense<0.000000e+00> : vector<2x8x8xf32>
    %181 = tpu.matmul %179, %180, %cst_67 {dimension_numbers = #tpu.dot_dimension_numbers<[2], [2], [1], [1], [0, 0, 0, 1, 1, 1], [0], [0]>} : vector<2x8x8xbf16>, vector<2x8x8xbf16>, vector<2x8x8xf32> -> vector<2x8x8xf32>
    "tpu.trace_stop"() : () -> ()
    %cst_68 = arith.constant dense<0xFF800000> : vector<2x8xf32>
    %182 = vector.multi_reduction <maximumf>, %181, %cst_68 [2] : vector<2x8x8xf32> to vector<2x8xf32>
    %183 = vector.shape_cast %182 : vector<2x8xf32> to vector<2x8x1xf32>
    %184 = vector.broadcast %183 : vector<2x8x1xf32> to vector<2x8x8xf32>
    %185 = arith.subf %181, %184 : vector<2x8x8xf32>
    %186 = math.exp %185 : vector<2x8x8xf32>
    %cst_69 = arith.constant dense<0.000000e+00> : vector<2x8xf32>
    %187 = vector.multi_reduction <add>, %186, %cst_69 [2] : vector<2x8x8xf32> to vector<2x8xf32>
    %188 = vector.shape_cast %187 : vector<2x8xf32> to vector<2x8x1xf32>
    %189 = tpu.reciprocal %188 {approx = true} : vector<2x8x1xf32> -> vector<2x8x1xf32>
    %190 = vector.broadcast %189 : vector<2x8x1xf32> to vector<2x8x8xf32>
    %191 = arith.mulf %186, %190 : vector<2x8x8xf32>
    %192 = arith.truncf %191 : vector<2x8x8xf32> to vector<2x8x8xbf16>
    %193 = vector.extract_strided_slice %146 {offsets = [0, 0, 16], sizes = [2, 8, 8], strides = [1, 1, 1]} : vector<2x8x32xbf16> to vector<2x8x8xbf16>
    "tpu.trace_start"() <{level = 10 : i32, message = "bqk,bkd->bqd"}> : () -> ()
    %cst_70 = arith.constant dense<0.000000e+00> : vector<2x8x8xf32>
    %194 = tpu.matmul %192, %193, %cst_70 {dimension_numbers = #tpu.dot_dimension_numbers<[2], [1], [1], [2], [0, 0, 0, 1, 1, 2], [0], [0]>} : vector<2x8x8xbf16>, vector<2x8x8xbf16>, vector<2x8x8xf32> -> vector<2x8x8xf32>
    "tpu.trace_stop"() : () -> ()
    %195 = vector.extract_strided_slice %142 {offsets = [0, 0, 24], sizes = [2, 8, 8], strides = [1, 1, 1]} : vector<2x8x32xbf16> to vector<2x8x8xbf16>
    %196 = vector.extract_strided_slice %144 {offsets = [0, 0, 24], sizes = [2, 8, 8], strides = [1, 1, 1]} : vector<2x8x32xbf16> to vector<2x8x8xbf16>
    "tpu.trace_start"() <{level = 10 : i32, message = "bqd,bkd->bqk"}> : () -> ()
    %cst_71 = arith.constant dense<0.000000e+00> : vector<2x8x8xf32>
    %197 = tpu.matmul %195, %196, %cst_71 {dimension_numbers = #tpu.dot_dimension_numbers<[2], [2], [1], [1], [0, 0, 0, 1, 1, 1], [0], [0]>} : vector<2x8x8xbf16>, vector<2x8x8xbf16>, vector<2x8x8xf32> -> vector<2x8x8xf32>
    "tpu.trace_stop"() : () -> ()
    %cst_72 = arith.constant dense<0xFF800000> : vector<2x8xf32>
    %198 = vector.multi_reduction <maximumf>, %197, %cst_72 [2] : vector<2x8x8xf32> to vector<2x8xf32>
    %199 = vector.shape_cast %198 : vector<2x8xf32> to vector<2x8x1xf32>
    %200 = vector.broadcast %199 : vector<2x8x1xf32> to vector<2x8x8xf32>
    %201 = arith.subf %197, %200 : vector<2x8x8xf32>
    %202 = math.exp %201 : vector<2x8x8xf32>
    %cst_73 = arith.constant dense<0.000000e+00> : vector<2x8xf32>
    %203 = vector.multi_reduction <add>, %202, %cst_73 [2] : vector<2x8x8xf32> to vector<2x8xf32>
    %204 = vector.shape_cast %203 : vector<2x8xf32> to vector<2x8x1xf32>
    %205 = tpu.reciprocal %204 {approx = true} : vector<2x8x1xf32> -> vector<2x8x1xf32>
    %206 = vector.broadcast %205 : vector<2x8x1xf32> to vector<2x8x8xf32>
    %207 = arith.mulf %202, %206 : vector<2x8x8xf32>
    %208 = arith.truncf %207 : vector<2x8x8xf32> to vector<2x8x8xbf16>
    %209 = vector.extract_strided_slice %146 {offsets = [0, 0, 24], sizes = [2, 8, 8], strides = [1, 1, 1]} : vector<2x8x32xbf16> to vector<2x8x8xbf16>
    "tpu.trace_start"() <{level = 10 : i32, message = "bqk,bkd->bqd"}> : () -> ()
    %cst_74 = arith.constant dense<0.000000e+00> : vector<2x8x8xf32>
    %210 = tpu.matmul %208, %209, %cst_74 {dimension_numbers = #tpu.dot_dimension_numbers<[2], [1], [1], [2], [0, 0, 0, 1, 1, 2], [0], [0]>} : vector<2x8x8xbf16>, vector<2x8x8xbf16>, vector<2x8x8xf32> -> vector<2x8x8xf32>
    "tpu.trace_stop"() : () -> ()
    %211 = tpu.concatenate %162, %178, %194, %210 in 2 : vector<2x8x8xf32>, vector<2x8x8xf32>, vector<2x8x8xf32>, vector<2x8x8xf32> -> vector<2x8x32xf32>
    %212 = vector.shape_cast %211 : vector<2x8x32xf32> to vector<16x32xf32>
    %c0_75 = arith.constant 0 : index
    %c0_76 = arith.constant 0 : index
    %c0_77 = arith.constant 0 : index
    %213 = vector.load %arg10[%c0_75, %c0_76, %c0_77] : memref<2x32x32xbf16, #tpu.memory_space<vmem>>, vector<1x32x32xbf16>
    %214 = vector.shape_cast %213 : vector<1x32x32xbf16> to vector<32x32xbf16>
    %c0_78 = arith.constant 0 : index
    %c0_79 = arith.constant 0 : index
    %c0_80 = arith.constant 0 : index
    %215 = vector.load %arg11[%c0_78, %c0_79, %c0_80] : memref<2x1x32xf32, #tpu.memory_space<vmem>>, vector<1x1x32xf32>
    %216 = vector.shape_cast %215 : vector<1x1x32xf32> to vector<1x32xf32>
    %217 = arith.truncf %212 : vector<16x32xf32> to vector<16x32xbf16>
    %cst_81 = arith.constant dense<0.000000e+00> : vector<16x32xf32>
    %218 = tpu.matmul %217, %214, %cst_81 {dimension_numbers = #tpu.dot_dimension_numbers<[1], [0], [0], [1], [0, 0, 1, 1], [], []>} : vector<16x32xbf16>, vector<32x32xbf16>, vector<16x32xf32> -> vector<16x32xf32>
    %219 = vector.broadcast %216 : vector<1x32xf32> to vector<16x32xf32>
    %220 = arith.addf %218, %219 : vector<16x32xf32>
    %221 = arith.addf %121, %220 : vector<16x32xf32>
    %cst_82 = arith.constant dense<0.000000e+00> : vector<16xf32>
    %222 = vector.multi_reduction <add>, %221, %cst_82 [1] : vector<16x32xf32> to vector<16xf32>
    %223 = vector.shape_cast %222 : vector<16xf32> to vector<16x1xf32>
    %cst_83 = arith.constant 3.200000e+01 : f32
    %224 = vector.broadcast %cst_83 : f32 to vector<16x1xf32>
    %225 = arith.divf %223, %224 : vector<16x1xf32>
    %226 = vector.broadcast %225 : vector<16x1xf32> to vector<16x32xf32>
    %227 = arith.subf %221, %226 : vector<16x32xf32>
    %228 = arith.mulf %227, %227 : vector<16x32xf32>
    %cst_84 = arith.constant dense<0.000000e+00> : vector<16xf32>
    %229 = vector.multi_reduction <add>, %228, %cst_84 [1] : vector<16x32xf32> to vector<16xf32>
    %230 = vector.shape_cast %229 : vector<16xf32> to vector<16x1xf32>
    %cst_85 = arith.constant 3.200000e+01 : f32
    %231 = vector.broadcast %cst_85 : f32 to vector<16x1xf32>
    %232 = arith.divf %230, %231 : vector<16x1xf32>
    %233 = vector.broadcast %225 : vector<16x1xf32> to vector<16x32xf32>
    %234 = arith.subf %221, %233 : vector<16x32xf32>
    %cst_86 = arith.constant 9.99999974E-6 : f32
    %235 = vector.broadcast %cst_86 : f32 to vector<16x1xf32>
    %236 = arith.addf %232, %235 : vector<16x1xf32>
    %237 = math.rsqrt %236 : vector<16x1xf32>
    %238 = vector.broadcast %237 : vector<16x1xf32> to vector<16x32xf32>
    %239 = arith.mulf %234, %238 : vector<16x32xf32>
    %240 = vector.broadcast %3 : vector<1x32xf32> to vector<16x32xf32>
    %241 = arith.mulf %239, %240 : vector<16x32xf32>
    %242 = vector.broadcast %5 : vector<1x32xf32> to vector<16x32xf32>
    %243 = arith.addf %241, %242 : vector<16x32xf32>
    %c0_87 = arith.constant 0 : index
    %c0_88 = arith.constant 0 : index
    %c0_89 = arith.constant 0 : index
    %244 = vector.load %arg14[%c0_87, %c0_88, %c0_89] : memref<2x32x64xbf16, #tpu.memory_space<vmem>>, vector<1x32x64xbf16>
    %245 = vector.shape_cast %244 : vector<1x32x64xbf16> to vector<32x64xbf16>
    %c0_90 = arith.constant 0 : index
    %c0_91 = arith.constant 0 : index
    %c0_92 = arith.constant 0 : index
    %246 = vector.load %arg15[%c0_90, %c0_91, %c0_92] : memref<2x1x64xf32, #tpu.memory_space<vmem>>, vector<1x1x64xf32>
    %247 = vector.shape_cast %246 : vector<1x1x64xf32> to vector<1x64xf32>
    %248 = arith.truncf %243 : vector<16x32xf32> to vector<16x32xbf16>
    %cst_93 = arith.constant dense<0.000000e+00> : vector<16x64xf32>
    %249 = tpu.matmul %248, %245, %cst_93 {dimension_numbers = #tpu.dot_dimension_numbers<[1], [0], [0], [1], [0, 0, 1, 1], [], []>} : vector<16x32xbf16>, vector<32x64xbf16>, vector<16x64xf32> -> vector<16x64xf32>
    %250 = vector.broadcast %247 : vector<1x64xf32> to vector<16x64xf32>
    %251 = arith.addf %249, %250 : vector<16x64xf32>
    %cst_94 = arith.constant 0.000000e+00 : f32
    %252 = vector.broadcast %cst_94 : f32 to vector<16x64xf32>
    %253 = arith.maximumf %251, %252 : vector<16x64xf32>
    %c0_95 = arith.constant 0 : index
    %c0_96 = arith.constant 0 : index
    %c0_97 = arith.constant 0 : index
    %254 = vector.load %arg16[%c0_95, %c0_96, %c0_97] : memref<2x64x32xbf16, #tpu.memory_space<vmem>>, vector<1x64x32xbf16>
    %255 = vector.shape_cast %254 : vector<1x64x32xbf16> to vector<64x32xbf16>
    %c0_98 = arith.constant 0 : index
    %c0_99 = arith.constant 0 : index
    %c0_100 = arith.constant 0 : index
    %256 = vector.load %arg17[%c0_98, %c0_99, %c0_100] : memref<2x1x32xf32, #tpu.memory_space<vmem>>, vector<1x1x32xf32>
    %257 = vector.shape_cast %256 : vector<1x1x32xf32> to vector<1x32xf32>
    %258 = arith.truncf %253 : vector<16x64xf32> to vector<16x64xbf16>
    %cst_101 = arith.constant dense<0.000000e+00> : vector<16x32xf32>
    %259 = tpu.matmul %258, %255, %cst_101 {dimension_numbers = #tpu.dot_dimension_numbers<[1], [0], [0], [1], [0, 0, 1, 1], [], []>} : vector<16x64xbf16>, vector<64x32xbf16>, vector<16x32xf32> -> vector<16x32xf32>
    %260 = vector.broadcast %257 : vector<1x32xf32> to vector<16x32xf32>
    %261 = arith.addf %259, %260 : vector<16x32xf32>
    %262 = arith.addf %243, %261 : vector<16x32xf32>
    %cst_102 = arith.constant dense<0.000000e+00> : vector<16xf32>
    %263 = vector.multi_reduction <add>, %262, %cst_102 [1] : vector<16x32xf32> to vector<16xf32>
    %264 = vector.shape_cast %263 : vector<16xf32> to vector<16x1xf32>
    %cst_103 = arith.constant 3.200000e+01 : f32
    %265 = vector.broadcast %cst_103 : f32 to vector<16x1xf32>
    %266 = arith.divf %264, %265 : vector<16x1xf32>
    %267 = vector.broadcast %266 : vector<16x1xf32> to vector<16x32xf32>
    %268 = arith.subf %262, %267 : vector<16x32xf32>
    %269 = arith.mulf %268, %268 : vector<16x32xf32>
    %cst_104 = arith.constant dense<0.000000e+00> : vector<16xf32>
    %270 = vector.multi_reduction <add>, %269, %cst_104 [1] : vector<16x32xf32> to vector<16xf32>
    %271 = vector.shape_cast %270 : vector<16xf32> to vector<16x1xf32>
    %cst_105 = arith.constant 3.200000e+01 : f32
    %272 = vector.broadcast %cst_105 : f32 to vector<16x1xf32>
    %273 = arith.divf %271, %272 : vector<16x1xf32>
    %274 = vector.broadcast %266 : vector<16x1xf32> to vector<16x32xf32>
    %275 = arith.subf %262, %274 : vector<16x32xf32>
    %cst_106 = arith.constant 9.99999974E-6 : f32
    %276 = vector.broadcast %cst_106 : f32 to vector<16x1xf32>
    %277 = arith.addf %273, %276 : vector<16x1xf32>
    %278 = math.rsqrt %277 : vector<16x1xf32>
    %279 = vector.broadcast %278 : vector<16x1xf32> to vector<16x32xf32>
    %280 = arith.mulf %275, %279 : vector<16x32xf32>
    %281 = vector.broadcast %3 : vector<1x32xf32> to vector<16x32xf32>
    %282 = arith.mulf %280, %281 : vector<16x32xf32>
    %283 = vector.broadcast %5 : vector<1x32xf32> to vector<16x32xf32>
    %284 = arith.addf %282, %283 : vector<16x32xf32>
    %c1 = arith.constant 1 : index
    %c0_107 = arith.constant 0 : index
    %c0_108 = arith.constant 0 : index
    %285 = vector.load %arg12[%c1, %c0_107, %c0_108] : memref<2x1x32xf32, #tpu.memory_space<vmem>>, vector<1x1x32xf32>
    %286 = vector.shape_cast %285 : vector<1x1x32xf32> to vector<1x32xf32>
    %c1_109 = arith.constant 1 : index
    %c0_110 = arith.constant 0 : index
    %c0_111 = arith.constant 0 : index
    %287 = vector.load %arg13[%c1_109, %c0_110, %c0_111] : memref<2x1x32xf32, #tpu.memory_space<vmem>>, vector<1x1x32xf32>
    %288 = vector.shape_cast %287 : vector<1x1x32xf32> to vector<1x32xf32>
    %c1_112 = arith.constant 1 : index
    %c0_113 = arith.constant 0 : index
    %c0_114 = arith.constant 0 : index
    %289 = vector.load %arg2[%c1_112, %c0_113, %c0_114] : memref<2x32x96xbf16, #tpu.memory_space<vmem>>, vector<1x32x96xbf16>
    %290 = vector.shape_cast %289 : vector<1x32x96xbf16> to vector<32x96xbf16>
    %c1_115 = arith.constant 1 : index
    %c0_116 = arith.constant 0 : index
    %c0_117 = arith.constant 0 : index
    %291 = vector.load %arg3[%c1_115, %c0_116, %c0_117] : memref<2x1x96xf32, #tpu.memory_space<vmem>>, vector<1x1x96xf32>
    %292 = vector.shape_cast %291 : vector<1x1x96xf32> to vector<1x96xf32>
    %293 = arith.truncf %284 : vector<16x32xf32> to vector<16x32xbf16>
    %cst_118 = arith.constant dense<0.000000e+00> : vector<16x96xf32>
    %294 = tpu.matmul %293, %290, %cst_118 {dimension_numbers = #tpu.dot_dimension_numbers<[1], [0], [0], [1], [0, 0, 1, 1], [], []>} : vector<16x32xbf16>, vector<32x96xbf16>, vector<16x96xf32> -> vector<16x96xf32>
    %295 = vector.broadcast %292 : vector<1x96xf32> to vector<16x96xf32>
    %296 = arith.addf %294, %295 : vector<16x96xf32>
    %297 = vector.extract_strided_slice %296 {offsets = [0, 0], sizes = [16, 32], strides = [1, 1]} : vector<16x96xf32> to vector<16x32xf32>
    %cst_119 = arith.constant 0.353553385 : f32
    %298 = vector.broadcast %cst_119 : f32 to vector<16x32xf32>
    %299 = arith.mulf %297, %298 : vector<16x32xf32>
    %300 = vector.extract_strided_slice %296 {offsets = [0, 32], sizes = [16, 32], strides = [1, 1]} : vector<16x96xf32> to vector<16x32xf32>
    %301 = vector.extract_strided_slice %296 {offsets = [0, 64], sizes = [16, 32], strides = [1, 1]} : vector<16x96xf32> to vector<16x32xf32>
    %302 = vector.shape_cast %299 : vector<16x32xf32> to vector<2x8x32xf32>
    %303 = arith.truncf %302 : vector<2x8x32xf32> to vector<2x8x32xbf16>
    %304 = vector.shape_cast %300 : vector<16x32xf32> to vector<2x8x32xf32>
    %305 = arith.truncf %304 : vector<2x8x32xf32> to vector<2x8x32xbf16>
    %306 = vector.shape_cast %301 : vector<16x32xf32> to vector<2x8x32xf32>
    %307 = arith.truncf %306 : vector<2x8x32xf32> to vector<2x8x32xbf16>
    %308 = vector.extract_strided_slice %303 {offsets = [0, 0, 0], sizes = [2, 8, 8], strides = [1, 1, 1]} : vector<2x8x32xbf16> to vector<2x8x8xbf16>
    %309 = vector.extract_strided_slice %305 {offsets = [0, 0, 0], sizes = [2, 8, 8], strides = [1, 1, 1]} : vector<2x8x32xbf16> to vector<2x8x8xbf16>
    "tpu.trace_start"() <{level = 10 : i32, message = "bqd,bkd->bqk"}> : () -> ()
    %cst_120 = arith.constant dense<0.000000e+00> : vector<2x8x8xf32>
    %310 = tpu.matmul %308, %309, %cst_120 {dimension_numbers = #tpu.dot_dimension_numbers<[2], [2], [1], [1], [0, 0, 0, 1, 1, 1], [0], [0]>} : vector<2x8x8xbf16>, vector<2x8x8xbf16>, vector<2x8x8xf32> -> vector<2x8x8xf32>
    "tpu.trace_stop"() : () -> ()
    %cst_121 = arith.constant dense<0xFF800000> : vector<2x8xf32>
    %311 = vector.multi_reduction <maximumf>, %310, %cst_121 [2] : vector<2x8x8xf32> to vector<2x8xf32>
    %312 = vector.shape_cast %311 : vector<2x8xf32> to vector<2x8x1xf32>
    %313 = vector.broadcast %312 : vector<2x8x1xf32> to vector<2x8x8xf32>
    %314 = arith.subf %310, %313 : vector<2x8x8xf32>
    %315 = math.exp %314 : vector<2x8x8xf32>
    %cst_122 = arith.constant dense<0.000000e+00> : vector<2x8xf32>
    %316 = vector.multi_reduction <add>, %315, %cst_122 [2] : vector<2x8x8xf32> to vector<2x8xf32>
    %317 = vector.shape_cast %316 : vector<2x8xf32> to vector<2x8x1xf32>
    %318 = tpu.reciprocal %317 {approx = true} : vector<2x8x1xf32> -> vector<2x8x1xf32>
    %319 = vector.broadcast %318 : vector<2x8x1xf32> to vector<2x8x8xf32>
    %320 = arith.mulf %315, %319 : vector<2x8x8xf32>
    %321 = arith.truncf %320 : vector<2x8x8xf32> to vector<2x8x8xbf16>
    %322 = vector.extract_strided_slice %307 {offsets = [0, 0, 0], sizes = [2, 8, 8], strides = [1, 1, 1]} : vector<2x8x32xbf16> to vector<2x8x8xbf16>
    "tpu.trace_start"() <{level = 10 : i32, message = "bqk,bkd->bqd"}> : () -> ()
    %cst_123 = arith.constant dense<0.000000e+00> : vector<2x8x8xf32>
    %323 = tpu.matmul %321, %322, %cst_123 {dimension_numbers = #tpu.dot_dimension_numbers<[2], [1], [1], [2], [0, 0, 0, 1, 1, 2], [0], [0]>} : vector<2x8x8xbf16>, vector<2x8x8xbf16>, vector<2x8x8xf32> -> vector<2x8x8xf32>
    "tpu.trace_stop"() : () -> ()
    %324 = vector.extract_strided_slice %303 {offsets = [0, 0, 8], sizes = [2, 8, 8], strides = [1, 1, 1]} : vector<2x8x32xbf16> to vector<2x8x8xbf16>
    %325 = vector.extract_strided_slice %305 {offsets = [0, 0, 8], sizes = [2, 8, 8], strides = [1, 1, 1]} : vector<2x8x32xbf16> to vector<2x8x8xbf16>
    "tpu.trace_start"() <{level = 10 : i32, message = "bqd,bkd->bqk"}> : () -> ()
    %cst_124 = arith.constant dense<0.000000e+00> : vector<2x8x8xf32>
    %326 = tpu.matmul %324, %325, %cst_124 {dimension_numbers = #tpu.dot_dimension_numbers<[2], [2], [1], [1], [0, 0, 0, 1, 1, 1], [0], [0]>} : vector<2x8x8xbf16>, vector<2x8x8xbf16>, vector<2x8x8xf32> -> vector<2x8x8xf32>
    "tpu.trace_stop"() : () -> ()
    %cst_125 = arith.constant dense<0xFF800000> : vector<2x8xf32>
    %327 = vector.multi_reduction <maximumf>, %326, %cst_125 [2] : vector<2x8x8xf32> to vector<2x8xf32>
    %328 = vector.shape_cast %327 : vector<2x8xf32> to vector<2x8x1xf32>
    %329 = vector.broadcast %328 : vector<2x8x1xf32> to vector<2x8x8xf32>
    %330 = arith.subf %326, %329 : vector<2x8x8xf32>
    %331 = math.exp %330 : vector<2x8x8xf32>
    %cst_126 = arith.constant dense<0.000000e+00> : vector<2x8xf32>
    %332 = vector.multi_reduction <add>, %331, %cst_126 [2] : vector<2x8x8xf32> to vector<2x8xf32>
    %333 = vector.shape_cast %332 : vector<2x8xf32> to vector<2x8x1xf32>
    %334 = tpu.reciprocal %333 {approx = true} : vector<2x8x1xf32> -> vector<2x8x1xf32>
    %335 = vector.broadcast %334 : vector<2x8x1xf32> to vector<2x8x8xf32>
    %336 = arith.mulf %331, %335 : vector<2x8x8xf32>
    %337 = arith.truncf %336 : vector<2x8x8xf32> to vector<2x8x8xbf16>
    %338 = vector.extract_strided_slice %307 {offsets = [0, 0, 8], sizes = [2, 8, 8], strides = [1, 1, 1]} : vector<2x8x32xbf16> to vector<2x8x8xbf16>
    "tpu.trace_start"() <{level = 10 : i32, message = "bqk,bkd->bqd"}> : () -> ()
    %cst_127 = arith.constant dense<0.000000e+00> : vector<2x8x8xf32>
    %339 = tpu.matmul %337, %338, %cst_127 {dimension_numbers = #tpu.dot_dimension_numbers<[2], [1], [1], [2], [0, 0, 0, 1, 1, 2], [0], [0]>} : vector<2x8x8xbf16>, vector<2x8x8xbf16>, vector<2x8x8xf32> -> vector<2x8x8xf32>
    "tpu.trace_stop"() : () -> ()
    %340 = vector.extract_strided_slice %303 {offsets = [0, 0, 16], sizes = [2, 8, 8], strides = [1, 1, 1]} : vector<2x8x32xbf16> to vector<2x8x8xbf16>
    %341 = vector.extract_strided_slice %305 {offsets = [0, 0, 16], sizes = [2, 8, 8], strides = [1, 1, 1]} : vector<2x8x32xbf16> to vector<2x8x8xbf16>
    "tpu.trace_start"() <{level = 10 : i32, message = "bqd,bkd->bqk"}> : () -> ()
    %cst_128 = arith.constant dense<0.000000e+00> : vector<2x8x8xf32>
    %342 = tpu.matmul %340, %341, %cst_128 {dimension_numbers = #tpu.dot_dimension_numbers<[2], [2], [1], [1], [0, 0, 0, 1, 1, 1], [0], [0]>} : vector<2x8x8xbf16>, vector<2x8x8xbf16>, vector<2x8x8xf32> -> vector<2x8x8xf32>
    "tpu.trace_stop"() : () -> ()
    %cst_129 = arith.constant dense<0xFF800000> : vector<2x8xf32>
    %343 = vector.multi_reduction <maximumf>, %342, %cst_129 [2] : vector<2x8x8xf32> to vector<2x8xf32>
    %344 = vector.shape_cast %343 : vector<2x8xf32> to vector<2x8x1xf32>
    %345 = vector.broadcast %344 : vector<2x8x1xf32> to vector<2x8x8xf32>
    %346 = arith.subf %342, %345 : vector<2x8x8xf32>
    %347 = math.exp %346 : vector<2x8x8xf32>
    %cst_130 = arith.constant dense<0.000000e+00> : vector<2x8xf32>
    %348 = vector.multi_reduction <add>, %347, %cst_130 [2] : vector<2x8x8xf32> to vector<2x8xf32>
    %349 = vector.shape_cast %348 : vector<2x8xf32> to vector<2x8x1xf32>
    %350 = tpu.reciprocal %349 {approx = true} : vector<2x8x1xf32> -> vector<2x8x1xf32>
    %351 = vector.broadcast %350 : vector<2x8x1xf32> to vector<2x8x8xf32>
    %352 = arith.mulf %347, %351 : vector<2x8x8xf32>
    %353 = arith.truncf %352 : vector<2x8x8xf32> to vector<2x8x8xbf16>
    %354 = vector.extract_strided_slice %307 {offsets = [0, 0, 16], sizes = [2, 8, 8], strides = [1, 1, 1]} : vector<2x8x32xbf16> to vector<2x8x8xbf16>
    "tpu.trace_start"() <{level = 10 : i32, message = "bqk,bkd->bqd"}> : () -> ()
    %cst_131 = arith.constant dense<0.000000e+00> : vector<2x8x8xf32>
    %355 = tpu.matmul %353, %354, %cst_131 {dimension_numbers = #tpu.dot_dimension_numbers<[2], [1], [1], [2], [0, 0, 0, 1, 1, 2], [0], [0]>} : vector<2x8x8xbf16>, vector<2x8x8xbf16>, vector<2x8x8xf32> -> vector<2x8x8xf32>
    "tpu.trace_stop"() : () -> ()
    %356 = vector.extract_strided_slice %303 {offsets = [0, 0, 24], sizes = [2, 8, 8], strides = [1, 1, 1]} : vector<2x8x32xbf16> to vector<2x8x8xbf16>
    %357 = vector.extract_strided_slice %305 {offsets = [0, 0, 24], sizes = [2, 8, 8], strides = [1, 1, 1]} : vector<2x8x32xbf16> to vector<2x8x8xbf16>
    "tpu.trace_start"() <{level = 10 : i32, message = "bqd,bkd->bqk"}> : () -> ()
    %cst_132 = arith.constant dense<0.000000e+00> : vector<2x8x8xf32>
    %358 = tpu.matmul %356, %357, %cst_132 {dimension_numbers = #tpu.dot_dimension_numbers<[2], [2], [1], [1], [0, 0, 0, 1, 1, 1], [0], [0]>} : vector<2x8x8xbf16>, vector<2x8x8xbf16>, vector<2x8x8xf32> -> vector<2x8x8xf32>
    "tpu.trace_stop"() : () -> ()
    %cst_133 = arith.constant dense<0xFF800000> : vector<2x8xf32>
    %359 = vector.multi_reduction <maximumf>, %358, %cst_133 [2] : vector<2x8x8xf32> to vector<2x8xf32>
    %360 = vector.shape_cast %359 : vector<2x8xf32> to vector<2x8x1xf32>
    %361 = vector.broadcast %360 : vector<2x8x1xf32> to vector<2x8x8xf32>
    %362 = arith.subf %358, %361 : vector<2x8x8xf32>
    %363 = math.exp %362 : vector<2x8x8xf32>
    %cst_134 = arith.constant dense<0.000000e+00> : vector<2x8xf32>
    %364 = vector.multi_reduction <add>, %363, %cst_134 [2] : vector<2x8x8xf32> to vector<2x8xf32>
    %365 = vector.shape_cast %364 : vector<2x8xf32> to vector<2x8x1xf32>
    %366 = tpu.reciprocal %365 {approx = true} : vector<2x8x1xf32> -> vector<2x8x1xf32>
    %367 = vector.broadcast %366 : vector<2x8x1xf32> to vector<2x8x8xf32>
    %368 = arith.mulf %363, %367 : vector<2x8x8xf32>
    %369 = arith.truncf %368 : vector<2x8x8xf32> to vector<2x8x8xbf16>
    %370 = vector.extract_strided_slice %307 {offsets = [0, 0, 24], sizes = [2, 8, 8], strides = [1, 1, 1]} : vector<2x8x32xbf16> to vector<2x8x8xbf16>
    "tpu.trace_start"() <{level = 10 : i32, message = "bqk,bkd->bqd"}> : () -> ()
    %cst_135 = arith.constant dense<0.000000e+00> : vector<2x8x8xf32>
    %371 = tpu.matmul %369, %370, %cst_135 {dimension_numbers = #tpu.dot_dimension_numbers<[2], [1], [1], [2], [0, 0, 0, 1, 1, 2], [0], [0]>} : vector<2x8x8xbf16>, vector<2x8x8xbf16>, vector<2x8x8xf32> -> vector<2x8x8xf32>
    "tpu.trace_stop"() : () -> ()
    %372 = tpu.concatenate %323, %339, %355, %371 in 2 : vector<2x8x8xf32>, vector<2x8x8xf32>, vector<2x8x8xf32>, vector<2x8x8xf32> -> vector<2x8x32xf32>
    %373 = vector.shape_cast %372 : vector<2x8x32xf32> to vector<16x32xf32>
    %c1_136 = arith.constant 1 : index
    %c0_137 = arith.constant 0 : index
    %c0_138 = arith.constant 0 : index
    %374 = vector.load %arg4[%c1_136, %c0_137, %c0_138] : memref<2x32x32xbf16, #tpu.memory_space<vmem>>, vector<1x32x32xbf16>
    %375 = vector.shape_cast %374 : vector<1x32x32xbf16> to vector<32x32xbf16>
    %c1_139 = arith.constant 1 : index
    %c0_140 = arith.constant 0 : index
    %c0_141 = arith.constant 0 : index
    %376 = vector.load %arg5[%c1_139, %c0_140, %c0_141] : memref<2x1x32xf32, #tpu.memory_space<vmem>>, vector<1x1x32xf32>
    %377 = vector.shape_cast %376 : vector<1x1x32xf32> to vector<1x32xf32>
    %378 = arith.truncf %373 : vector<16x32xf32> to vector<16x32xbf16>
    %cst_142 = arith.constant dense<0.000000e+00> : vector<16x32xf32>
    %379 = tpu.matmul %378, %375, %cst_142 {dimension_numbers = #tpu.dot_dimension_numbers<[1], [0], [0], [1], [0, 0, 1, 1], [], []>} : vector<16x32xbf16>, vector<32x32xbf16>, vector<16x32xf32> -> vector<16x32xf32>
    %380 = vector.broadcast %377 : vector<1x32xf32> to vector<16x32xf32>
    %381 = arith.addf %379, %380 : vector<16x32xf32>
    %382 = arith.addf %284, %381 : vector<16x32xf32>
    %cst_143 = arith.constant dense<0.000000e+00> : vector<16xf32>
    %383 = vector.multi_reduction <add>, %382, %cst_143 [1] : vector<16x32xf32> to vector<16xf32>
    %384 = vector.shape_cast %383 : vector<16xf32> to vector<16x1xf32>
    %cst_144 = arith.constant 3.200000e+01 : f32
    %385 = vector.broadcast %cst_144 : f32 to vector<16x1xf32>
    %386 = arith.divf %384, %385 : vector<16x1xf32>
    %387 = vector.broadcast %386 : vector<16x1xf32> to vector<16x32xf32>
    %388 = arith.subf %382, %387 : vector<16x32xf32>
    %389 = arith.mulf %388, %388 : vector<16x32xf32>
    %cst_145 = arith.constant dense<0.000000e+00> : vector<16xf32>
    %390 = vector.multi_reduction <add>, %389, %cst_145 [1] : vector<16x32xf32> to vector<16xf32>
    %391 = vector.shape_cast %390 : vector<16xf32> to vector<16x1xf32>
    %cst_146 = arith.constant 3.200000e+01 : f32
    %392 = vector.broadcast %cst_146 : f32 to vector<16x1xf32>
    %393 = arith.divf %391, %392 : vector<16x1xf32>
    %394 = vector.broadcast %386 : vector<16x1xf32> to vector<16x32xf32>
    %395 = arith.subf %382, %394 : vector<16x32xf32>
    %cst_147 = arith.constant 9.99999974E-6 : f32
    %396 = vector.broadcast %cst_147 : f32 to vector<16x1xf32>
    %397 = arith.addf %393, %396 : vector<16x1xf32>
    %398 = math.rsqrt %397 : vector<16x1xf32>
    %399 = vector.broadcast %398 : vector<16x1xf32> to vector<16x32xf32>
    %400 = arith.mulf %395, %399 : vector<16x32xf32>
    %401 = vector.broadcast %286 : vector<1x32xf32> to vector<16x32xf32>
    %402 = arith.mulf %400, %401 : vector<16x32xf32>
    %403 = vector.broadcast %288 : vector<1x32xf32> to vector<16x32xf32>
    %404 = arith.addf %402, %403 : vector<16x32xf32>
    %c1_148 = arith.constant 1 : index
    %c0_149 = arith.constant 0 : index
    %c0_150 = arith.constant 0 : index
    %405 = vector.load %arg6[%c1_148, %c0_149, %c0_150] : memref<2x32x32xbf16, #tpu.memory_space<vmem>>, vector<1x32x32xbf16>
    %406 = vector.shape_cast %405 : vector<1x32x32xbf16> to vector<32x32xbf16>
    %c1_151 = arith.constant 1 : index
    %c0_152 = arith.constant 0 : index
    %c0_153 = arith.constant 0 : index
    %407 = vector.load %arg7[%c1_151, %c0_152, %c0_153] : memref<2x1x32xf32, #tpu.memory_space<vmem>>, vector<1x1x32xf32>
    %408 = vector.shape_cast %407 : vector<1x1x32xf32> to vector<1x32xf32>
    %409 = arith.truncf %404 : vector<16x32xf32> to vector<16x32xbf16>
    %cst_154 = arith.constant dense<0.000000e+00> : vector<16x32xf32>
    %410 = tpu.matmul %409, %406, %cst_154 {dimension_numbers = #tpu.dot_dimension_numbers<[1], [0], [0], [1], [0, 0, 1, 1], [], []>} : vector<16x32xbf16>, vector<32x32xbf16>, vector<16x32xf32> -> vector<16x32xf32>
    %411 = vector.broadcast %408 : vector<1x32xf32> to vector<16x32xf32>
    %412 = arith.addf %410, %411 : vector<16x32xf32>
    %cst_155 = arith.constant 0.353553385 : f32
    %413 = vector.broadcast %cst_155 : f32 to vector<16x32xf32>
    %414 = arith.mulf %412, %413 : vector<16x32xf32>
    %c1_156 = arith.constant 1 : index
    %c0_157 = arith.constant 0 : index
    %c0_158 = arith.constant 0 : index
    %415 = vector.load %arg8[%c1_156, %c0_157, %c0_158] : memref<2x32x64xbf16, #tpu.memory_space<vmem>>, vector<1x32x64xbf16>
    %416 = vector.shape_cast %415 : vector<1x32x64xbf16> to vector<32x64xbf16>
    %c1_159 = arith.constant 1 : index
    %c0_160 = arith.constant 0 : index
    %c0_161 = arith.constant 0 : index
    %417 = vector.load %arg9[%c1_159, %c0_160, %c0_161] : memref<2x1x64xf32, #tpu.memory_space<vmem>>, vector<1x1x64xf32>
    %418 = vector.shape_cast %417 : vector<1x1x64xf32> to vector<1x64xf32>
    %cst_162 = arith.constant dense<0.000000e+00> : vector<16x64xf32>
    %419 = tpu.matmul %1, %416, %cst_162 {dimension_numbers = #tpu.dot_dimension_numbers<[1], [0], [0], [1], [0, 0, 1, 1], [], []>} : vector<16x32xbf16>, vector<32x64xbf16>, vector<16x64xf32> -> vector<16x64xf32>
    %420 = vector.broadcast %418 : vector<1x64xf32> to vector<16x64xf32>
    %421 = arith.addf %419, %420 : vector<16x64xf32>
    %422 = vector.extract_strided_slice %421 {offsets = [0, 0], sizes = [16, 32], strides = [1, 1]} : vector<16x64xf32> to vector<16x32xf32>
    %423 = vector.extract_strided_slice %421 {offsets = [0, 32], sizes = [16, 32], strides = [1, 1]} : vector<16x64xf32> to vector<16x32xf32>
    %424 = vector.shape_cast %414 : vector<16x32xf32> to vector<2x8x32xf32>
    %425 = arith.truncf %424 : vector<2x8x32xf32> to vector<2x8x32xbf16>
    %426 = vector.shape_cast %422 : vector<16x32xf32> to vector<2x8x32xf32>
    %427 = arith.truncf %426 : vector<2x8x32xf32> to vector<2x8x32xbf16>
    %428 = vector.shape_cast %423 : vector<16x32xf32> to vector<2x8x32xf32>
    %429 = arith.truncf %428 : vector<2x8x32xf32> to vector<2x8x32xbf16>
    %430 = vector.extract_strided_slice %425 {offsets = [0, 0, 0], sizes = [2, 8, 8], strides = [1, 1, 1]} : vector<2x8x32xbf16> to vector<2x8x8xbf16>
    %431 = vector.extract_strided_slice %427 {offsets = [0, 0, 0], sizes = [2, 8, 8], strides = [1, 1, 1]} : vector<2x8x32xbf16> to vector<2x8x8xbf16>
    "tpu.trace_start"() <{level = 10 : i32, message = "bqd,bkd->bqk"}> : () -> ()
    %cst_163 = arith.constant dense<0.000000e+00> : vector<2x8x8xf32>
    %432 = tpu.matmul %430, %431, %cst_163 {dimension_numbers = #tpu.dot_dimension_numbers<[2], [2], [1], [1], [0, 0, 0, 1, 1, 1], [0], [0]>} : vector<2x8x8xbf16>, vector<2x8x8xbf16>, vector<2x8x8xf32> -> vector<2x8x8xf32>
    "tpu.trace_stop"() : () -> ()
    %cst_164 = arith.constant dense<0xFF800000> : vector<2x8xf32>
    %433 = vector.multi_reduction <maximumf>, %432, %cst_164 [2] : vector<2x8x8xf32> to vector<2x8xf32>
    %434 = vector.shape_cast %433 : vector<2x8xf32> to vector<2x8x1xf32>
    %435 = vector.broadcast %434 : vector<2x8x1xf32> to vector<2x8x8xf32>
    %436 = arith.subf %432, %435 : vector<2x8x8xf32>
    %437 = math.exp %436 : vector<2x8x8xf32>
    %cst_165 = arith.constant dense<0.000000e+00> : vector<2x8xf32>
    %438 = vector.multi_reduction <add>, %437, %cst_165 [2] : vector<2x8x8xf32> to vector<2x8xf32>
    %439 = vector.shape_cast %438 : vector<2x8xf32> to vector<2x8x1xf32>
    %440 = tpu.reciprocal %439 {approx = true} : vector<2x8x1xf32> -> vector<2x8x1xf32>
    %441 = vector.broadcast %440 : vector<2x8x1xf32> to vector<2x8x8xf32>
    %442 = arith.mulf %437, %441 : vector<2x8x8xf32>
    %443 = arith.truncf %442 : vector<2x8x8xf32> to vector<2x8x8xbf16>
    %444 = vector.extract_strided_slice %429 {offsets = [0, 0, 0], sizes = [2, 8, 8], strides = [1, 1, 1]} : vector<2x8x32xbf16> to vector<2x8x8xbf16>
    "tpu.trace_start"() <{level = 10 : i32, message = "bqk,bkd->bqd"}> : () -> ()
    %cst_166 = arith.constant dense<0.000000e+00> : vector<2x8x8xf32>
    %445 = tpu.matmul %443, %444, %cst_166 {dimension_numbers = #tpu.dot_dimension_numbers<[2], [1], [1], [2], [0, 0, 0, 1, 1, 2], [0], [0]>} : vector<2x8x8xbf16>, vector<2x8x8xbf16>, vector<2x8x8xf32> -> vector<2x8x8xf32>
    "tpu.trace_stop"() : () -> ()
    %446 = vector.extract_strided_slice %425 {offsets = [0, 0, 8], sizes = [2, 8, 8], strides = [1, 1, 1]} : vector<2x8x32xbf16> to vector<2x8x8xbf16>
    %447 = vector.extract_strided_slice %427 {offsets = [0, 0, 8], sizes = [2, 8, 8], strides = [1, 1, 1]} : vector<2x8x32xbf16> to vector<2x8x8xbf16>
    "tpu.trace_start"() <{level = 10 : i32, message = "bqd,bkd->bqk"}> : () -> ()
    %cst_167 = arith.constant dense<0.000000e+00> : vector<2x8x8xf32>
    %448 = tpu.matmul %446, %447, %cst_167 {dimension_numbers = #tpu.dot_dimension_numbers<[2], [2], [1], [1], [0, 0, 0, 1, 1, 1], [0], [0]>} : vector<2x8x8xbf16>, vector<2x8x8xbf16>, vector<2x8x8xf32> -> vector<2x8x8xf32>
    "tpu.trace_stop"() : () -> ()
    %cst_168 = arith.constant dense<0xFF800000> : vector<2x8xf32>
    %449 = vector.multi_reduction <maximumf>, %448, %cst_168 [2] : vector<2x8x8xf32> to vector<2x8xf32>
    %450 = vector.shape_cast %449 : vector<2x8xf32> to vector<2x8x1xf32>
    %451 = vector.broadcast %450 : vector<2x8x1xf32> to vector<2x8x8xf32>
    %452 = arith.subf %448, %451 : vector<2x8x8xf32>
    %453 = math.exp %452 : vector<2x8x8xf32>
    %cst_169 = arith.constant dense<0.000000e+00> : vector<2x8xf32>
    %454 = vector.multi_reduction <add>, %453, %cst_169 [2] : vector<2x8x8xf32> to vector<2x8xf32>
    %455 = vector.shape_cast %454 : vector<2x8xf32> to vector<2x8x1xf32>
    %456 = tpu.reciprocal %455 {approx = true} : vector<2x8x1xf32> -> vector<2x8x1xf32>
    %457 = vector.broadcast %456 : vector<2x8x1xf32> to vector<2x8x8xf32>
    %458 = arith.mulf %453, %457 : vector<2x8x8xf32>
    %459 = arith.truncf %458 : vector<2x8x8xf32> to vector<2x8x8xbf16>
    %460 = vector.extract_strided_slice %429 {offsets = [0, 0, 8], sizes = [2, 8, 8], strides = [1, 1, 1]} : vector<2x8x32xbf16> to vector<2x8x8xbf16>
    "tpu.trace_start"() <{level = 10 : i32, message = "bqk,bkd->bqd"}> : () -> ()
    %cst_170 = arith.constant dense<0.000000e+00> : vector<2x8x8xf32>
    %461 = tpu.matmul %459, %460, %cst_170 {dimension_numbers = #tpu.dot_dimension_numbers<[2], [1], [1], [2], [0, 0, 0, 1, 1, 2], [0], [0]>} : vector<2x8x8xbf16>, vector<2x8x8xbf16>, vector<2x8x8xf32> -> vector<2x8x8xf32>
    "tpu.trace_stop"() : () -> ()
    %462 = vector.extract_strided_slice %425 {offsets = [0, 0, 16], sizes = [2, 8, 8], strides = [1, 1, 1]} : vector<2x8x32xbf16> to vector<2x8x8xbf16>
    %463 = vector.extract_strided_slice %427 {offsets = [0, 0, 16], sizes = [2, 8, 8], strides = [1, 1, 1]} : vector<2x8x32xbf16> to vector<2x8x8xbf16>
    "tpu.trace_start"() <{level = 10 : i32, message = "bqd,bkd->bqk"}> : () -> ()
    %cst_171 = arith.constant dense<0.000000e+00> : vector<2x8x8xf32>
    %464 = tpu.matmul %462, %463, %cst_171 {dimension_numbers = #tpu.dot_dimension_numbers<[2], [2], [1], [1], [0, 0, 0, 1, 1, 1], [0], [0]>} : vector<2x8x8xbf16>, vector<2x8x8xbf16>, vector<2x8x8xf32> -> vector<2x8x8xf32>
    "tpu.trace_stop"() : () -> ()
    %cst_172 = arith.constant dense<0xFF800000> : vector<2x8xf32>
    %465 = vector.multi_reduction <maximumf>, %464, %cst_172 [2] : vector<2x8x8xf32> to vector<2x8xf32>
    %466 = vector.shape_cast %465 : vector<2x8xf32> to vector<2x8x1xf32>
    %467 = vector.broadcast %466 : vector<2x8x1xf32> to vector<2x8x8xf32>
    %468 = arith.subf %464, %467 : vector<2x8x8xf32>
    %469 = math.exp %468 : vector<2x8x8xf32>
    %cst_173 = arith.constant dense<0.000000e+00> : vector<2x8xf32>
    %470 = vector.multi_reduction <add>, %469, %cst_173 [2] : vector<2x8x8xf32> to vector<2x8xf32>
    %471 = vector.shape_cast %470 : vector<2x8xf32> to vector<2x8x1xf32>
    %472 = tpu.reciprocal %471 {approx = true} : vector<2x8x1xf32> -> vector<2x8x1xf32>
    %473 = vector.broadcast %472 : vector<2x8x1xf32> to vector<2x8x8xf32>
    %474 = arith.mulf %469, %473 : vector<2x8x8xf32>
    %475 = arith.truncf %474 : vector<2x8x8xf32> to vector<2x8x8xbf16>
    %476 = vector.extract_strided_slice %429 {offsets = [0, 0, 16], sizes = [2, 8, 8], strides = [1, 1, 1]} : vector<2x8x32xbf16> to vector<2x8x8xbf16>
    "tpu.trace_start"() <{level = 10 : i32, message = "bqk,bkd->bqd"}> : () -> ()
    %cst_174 = arith.constant dense<0.000000e+00> : vector<2x8x8xf32>
    %477 = tpu.matmul %475, %476, %cst_174 {dimension_numbers = #tpu.dot_dimension_numbers<[2], [1], [1], [2], [0, 0, 0, 1, 1, 2], [0], [0]>} : vector<2x8x8xbf16>, vector<2x8x8xbf16>, vector<2x8x8xf32> -> vector<2x8x8xf32>
    "tpu.trace_stop"() : () -> ()
    %478 = vector.extract_strided_slice %425 {offsets = [0, 0, 24], sizes = [2, 8, 8], strides = [1, 1, 1]} : vector<2x8x32xbf16> to vector<2x8x8xbf16>
    %479 = vector.extract_strided_slice %427 {offsets = [0, 0, 24], sizes = [2, 8, 8], strides = [1, 1, 1]} : vector<2x8x32xbf16> to vector<2x8x8xbf16>
    "tpu.trace_start"() <{level = 10 : i32, message = "bqd,bkd->bqk"}> : () -> ()
    %cst_175 = arith.constant dense<0.000000e+00> : vector<2x8x8xf32>
    %480 = tpu.matmul %478, %479, %cst_175 {dimension_numbers = #tpu.dot_dimension_numbers<[2], [2], [1], [1], [0, 0, 0, 1, 1, 1], [0], [0]>} : vector<2x8x8xbf16>, vector<2x8x8xbf16>, vector<2x8x8xf32> -> vector<2x8x8xf32>
    "tpu.trace_stop"() : () -> ()
    %cst_176 = arith.constant dense<0xFF800000> : vector<2x8xf32>
    %481 = vector.multi_reduction <maximumf>, %480, %cst_176 [2] : vector<2x8x8xf32> to vector<2x8xf32>
    %482 = vector.shape_cast %481 : vector<2x8xf32> to vector<2x8x1xf32>
    %483 = vector.broadcast %482 : vector<2x8x1xf32> to vector<2x8x8xf32>
    %484 = arith.subf %480, %483 : vector<2x8x8xf32>
    %485 = math.exp %484 : vector<2x8x8xf32>
    %cst_177 = arith.constant dense<0.000000e+00> : vector<2x8xf32>
    %486 = vector.multi_reduction <add>, %485, %cst_177 [2] : vector<2x8x8xf32> to vector<2x8xf32>
    %487 = vector.shape_cast %486 : vector<2x8xf32> to vector<2x8x1xf32>
    %488 = tpu.reciprocal %487 {approx = true} : vector<2x8x1xf32> -> vector<2x8x1xf32>
    %489 = vector.broadcast %488 : vector<2x8x1xf32> to vector<2x8x8xf32>
    %490 = arith.mulf %485, %489 : vector<2x8x8xf32>
    %491 = arith.truncf %490 : vector<2x8x8xf32> to vector<2x8x8xbf16>
    %492 = vector.extract_strided_slice %429 {offsets = [0, 0, 24], sizes = [2, 8, 8], strides = [1, 1, 1]} : vector<2x8x32xbf16> to vector<2x8x8xbf16>
    "tpu.trace_start"() <{level = 10 : i32, message = "bqk,bkd->bqd"}> : () -> ()
    %cst_178 = arith.constant dense<0.000000e+00> : vector<2x8x8xf32>
    %493 = tpu.matmul %491, %492, %cst_178 {dimension_numbers = #tpu.dot_dimension_numbers<[2], [1], [1], [2], [0, 0, 0, 1, 1, 2], [0], [0]>} : vector<2x8x8xbf16>, vector<2x8x8xbf16>, vector<2x8x8xf32> -> vector<2x8x8xf32>
    "tpu.trace_stop"() : () -> ()
    %494 = tpu.concatenate %445, %461, %477, %493 in 2 : vector<2x8x8xf32>, vector<2x8x8xf32>, vector<2x8x8xf32>, vector<2x8x8xf32> -> vector<2x8x32xf32>
    %495 = vector.shape_cast %494 : vector<2x8x32xf32> to vector<16x32xf32>
    %c1_179 = arith.constant 1 : index
    %c0_180 = arith.constant 0 : index
    %c0_181 = arith.constant 0 : index
    %496 = vector.load %arg10[%c1_179, %c0_180, %c0_181] : memref<2x32x32xbf16, #tpu.memory_space<vmem>>, vector<1x32x32xbf16>
    %497 = vector.shape_cast %496 : vector<1x32x32xbf16> to vector<32x32xbf16>
    %c1_182 = arith.constant 1 : index
    %c0_183 = arith.constant 0 : index
    %c0_184 = arith.constant 0 : index
    %498 = vector.load %arg11[%c1_182, %c0_183, %c0_184] : memref<2x1x32xf32, #tpu.memory_space<vmem>>, vector<1x1x32xf32>
    %499 = vector.shape_cast %498 : vector<1x1x32xf32> to vector<1x32xf32>
    %500 = arith.truncf %495 : vector<16x32xf32> to vector<16x32xbf16>
    %cst_185 = arith.constant dense<0.000000e+00> : vector<16x32xf32>
    %501 = tpu.matmul %500, %497, %cst_185 {dimension_numbers = #tpu.dot_dimension_numbers<[1], [0], [0], [1], [0, 0, 1, 1], [], []>} : vector<16x32xbf16>, vector<32x32xbf16>, vector<16x32xf32> -> vector<16x32xf32>
    %502 = vector.broadcast %499 : vector<1x32xf32> to vector<16x32xf32>
    %503 = arith.addf %501, %502 : vector<16x32xf32>
    %504 = arith.addf %404, %503 : vector<16x32xf32>
    %cst_186 = arith.constant dense<0.000000e+00> : vector<16xf32>
    %505 = vector.multi_reduction <add>, %504, %cst_186 [1] : vector<16x32xf32> to vector<16xf32>
    %506 = vector.shape_cast %505 : vector<16xf32> to vector<16x1xf32>
    %cst_187 = arith.constant 3.200000e+01 : f32
    %507 = vector.broadcast %cst_187 : f32 to vector<16x1xf32>
    %508 = arith.divf %506, %507 : vector<16x1xf32>
    %509 = vector.broadcast %508 : vector<16x1xf32> to vector<16x32xf32>
    %510 = arith.subf %504, %509 : vector<16x32xf32>
    %511 = arith.mulf %510, %510 : vector<16x32xf32>
    %cst_188 = arith.constant dense<0.000000e+00> : vector<16xf32>
    %512 = vector.multi_reduction <add>, %511, %cst_188 [1] : vector<16x32xf32> to vector<16xf32>
    %513 = vector.shape_cast %512 : vector<16xf32> to vector<16x1xf32>
    %cst_189 = arith.constant 3.200000e+01 : f32
    %514 = vector.broadcast %cst_189 : f32 to vector<16x1xf32>
    %515 = arith.divf %513, %514 : vector<16x1xf32>
    %516 = vector.broadcast %508 : vector<16x1xf32> to vector<16x32xf32>
    %517 = arith.subf %504, %516 : vector<16x32xf32>
    %cst_190 = arith.constant 9.99999974E-6 : f32
    %518 = vector.broadcast %cst_190 : f32 to vector<16x1xf32>
    %519 = arith.addf %515, %518 : vector<16x1xf32>
    %520 = math.rsqrt %519 : vector<16x1xf32>
    %521 = vector.broadcast %520 : vector<16x1xf32> to vector<16x32xf32>
    %522 = arith.mulf %517, %521 : vector<16x32xf32>
    %523 = vector.broadcast %286 : vector<1x32xf32> to vector<16x32xf32>
    %524 = arith.mulf %522, %523 : vector<16x32xf32>
    %525 = vector.broadcast %288 : vector<1x32xf32> to vector<16x32xf32>
    %526 = arith.addf %524, %525 : vector<16x32xf32>
    %c1_191 = arith.constant 1 : index
    %c0_192 = arith.constant 0 : index
    %c0_193 = arith.constant 0 : index
    %527 = vector.load %arg14[%c1_191, %c0_192, %c0_193] : memref<2x32x64xbf16, #tpu.memory_space<vmem>>, vector<1x32x64xbf16>
    %528 = vector.shape_cast %527 : vector<1x32x64xbf16> to vector<32x64xbf16>
    %c1_194 = arith.constant 1 : index
    %c0_195 = arith.constant 0 : index
    %c0_196 = arith.constant 0 : index
    %529 = vector.load %arg15[%c1_194, %c0_195, %c0_196] : memref<2x1x64xf32, #tpu.memory_space<vmem>>, vector<1x1x64xf32>
    %530 = vector.shape_cast %529 : vector<1x1x64xf32> to vector<1x64xf32>
    %531 = arith.truncf %526 : vector<16x32xf32> to vector<16x32xbf16>
    %cst_197 = arith.constant dense<0.000000e+00> : vector<16x64xf32>
    %532 = tpu.matmul %531, %528, %cst_197 {dimension_numbers = #tpu.dot_dimension_numbers<[1], [0], [0], [1], [0, 0, 1, 1], [], []>} : vector<16x32xbf16>, vector<32x64xbf16>, vector<16x64xf32> -> vector<16x64xf32>
    %533 = vector.broadcast %530 : vector<1x64xf32> to vector<16x64xf32>
    %534 = arith.addf %532, %533 : vector<16x64xf32>
    %cst_198 = arith.constant 0.000000e+00 : f32
    %535 = vector.broadcast %cst_198 : f32 to vector<16x64xf32>
    %536 = arith.maximumf %534, %535 : vector<16x64xf32>
    %c1_199 = arith.constant 1 : index
    %c0_200 = arith.constant 0 : index
    %c0_201 = arith.constant 0 : index
    %537 = vector.load %arg16[%c1_199, %c0_200, %c0_201] : memref<2x64x32xbf16, #tpu.memory_space<vmem>>, vector<1x64x32xbf16>
    %538 = vector.shape_cast %537 : vector<1x64x32xbf16> to vector<64x32xbf16>
    %c1_202 = arith.constant 1 : index
    %c0_203 = arith.constant 0 : index
    %c0_204 = arith.constant 0 : index
    %539 = vector.load %arg17[%c1_202, %c0_203, %c0_204] : memref<2x1x32xf32, #tpu.memory_space<vmem>>, vector<1x1x32xf32>
    %540 = vector.shape_cast %539 : vector<1x1x32xf32> to vector<1x32xf32>
    %541 = arith.truncf %536 : vector<16x64xf32> to vector<16x64xbf16>
    %cst_205 = arith.constant dense<0.000000e+00> : vector<16x32xf32>
    %542 = tpu.matmul %541, %538, %cst_205 {dimension_numbers = #tpu.dot_dimension_numbers<[1], [0], [0], [1], [0, 0, 1, 1], [], []>} : vector<16x64xbf16>, vector<64x32xbf16>, vector<16x32xf32> -> vector<16x32xf32>
    %543 = vector.broadcast %540 : vector<1x32xf32> to vector<16x32xf32>
    %544 = arith.addf %542, %543 : vector<16x32xf32>
    %545 = arith.addf %526, %544 : vector<16x32xf32>
    %cst_206 = arith.constant dense<0.000000e+00> : vector<16xf32>
    %546 = vector.multi_reduction <add>, %545, %cst_206 [1] : vector<16x32xf32> to vector<16xf32>
    %547 = vector.shape_cast %546 : vector<16xf32> to vector<16x1xf32>
    %cst_207 = arith.constant 3.200000e+01 : f32
    %548 = vector.broadcast %cst_207 : f32 to vector<16x1xf32>
    %549 = arith.divf %547, %548 : vector<16x1xf32>
    %550 = vector.broadcast %549 : vector<16x1xf32> to vector<16x32xf32>
    %551 = arith.subf %545, %550 : vector<16x32xf32>
    %552 = arith.mulf %551, %551 : vector<16x32xf32>
    %cst_208 = arith.constant dense<0.000000e+00> : vector<16xf32>
    %553 = vector.multi_reduction <add>, %552, %cst_208 [1] : vector<16x32xf32> to vector<16xf32>
    %554 = vector.shape_cast %553 : vector<16xf32> to vector<16x1xf32>
    %cst_209 = arith.constant 3.200000e+01 : f32
    %555 = vector.broadcast %cst_209 : f32 to vector<16x1xf32>
    %556 = arith.divf %554, %555 : vector<16x1xf32>
    %557 = vector.broadcast %549 : vector<16x1xf32> to vector<16x32xf32>
    %558 = arith.subf %545, %557 : vector<16x32xf32>
    %cst_210 = arith.constant 9.99999974E-6 : f32
    %559 = vector.broadcast %cst_210 : f32 to vector<16x1xf32>
    %560 = arith.addf %556, %559 : vector<16x1xf32>
    %561 = math.rsqrt %560 : vector<16x1xf32>
    %562 = vector.broadcast %561 : vector<16x1xf32> to vector<16x32xf32>
    %563 = arith.mulf %558, %562 : vector<16x32xf32>
    %564 = vector.broadcast %286 : vector<1x32xf32> to vector<16x32xf32>
    %565 = arith.mulf %563, %564 : vector<16x32xf32>
    %566 = vector.broadcast %288 : vector<1x32xf32> to vector<16x32xf32>
    %567 = arith.addf %565, %566 : vector<16x32xf32>
    %c0_211 = arith.constant 0 : index
    %c0_212 = arith.constant 0 : index
    %568 = vector.load %arg18[%c0_211, %c0_212] : memref<32x128xbf16, #tpu.memory_space<vmem>>, vector<32x128xbf16>
    %c0_213 = arith.constant 0 : index
    %c0_214 = arith.constant 0 : index
    %569 = vector.load %arg19[%c0_213, %c0_214] : memref<1x128xf32, #tpu.memory_space<vmem>>, vector<1x128xf32>
    %570 = arith.truncf %567 : vector<16x32xf32> to vector<16x32xbf16>
    %cst_215 = arith.constant dense<0.000000e+00> : vector<16x128xf32>
    %571 = tpu.matmul %570, %568, %cst_215 {dimension_numbers = #tpu.dot_dimension_numbers<[1], [0], [0], [1], [0, 0, 1, 1], [], []>} : vector<16x32xbf16>, vector<32x128xbf16>, vector<16x128xf32> -> vector<16x128xf32>
    %572 = vector.broadcast %569 : vector<1x128xf32> to vector<16x128xf32>
    %573 = arith.addf %571, %572 : vector<16x128xf32>
    %c0_216 = arith.constant 0 : index
    %c0_217 = arith.constant 0 : index
    %574 = vector.load %arg20[%c0_216, %c0_217] : memref<16x128xf32, #tpu.memory_space<vmem>>, vector<16x128xf32>
    tpu.vector_store %arg20[%c0_216, %c0_217], %573 {strides = array<i32>} : memref<16x128xf32, #tpu.memory_space<vmem>>, vector<16x128xf32>,
    %c0_218 = arith.constant 0 : index
    %c0_219 = arith.constant 0 : index
    %c0_220 = arith.constant 0 : index
    %c0_221 = arith.constant 0 : index
    %575 = vector.load %arg21[%c0_218, %c0_219, %c0_220, %c0_221] : memref<4x2x8x8xf32, #tpu.memory_space<vmem>>, vector<1x2x8x8xf32>
    %576 = vector.shape_cast %575 : vector<1x2x8x8xf32> to vector<2x8x8xf32>
    %577 = vector.shape_cast %442 : vector<2x8x8xf32> to vector<1x2x8x8xf32>
    tpu.vector_store %arg21[%c0_218, %c0_219, %c0_220, %c0_221], %577 {strides = array<i32>} : memref<4x2x8x8xf32, #tpu.memory_space<vmem>>, vector<1x2x8x8xf32>,
    %c1_222 = arith.constant 1 : index
    %c0_223 = arith.constant 0 : index
    %c0_224 = arith.constant 0 : index
    %c0_225 = arith.constant 0 : index
    %578 = vector.load %arg21[%c1_222, %c0_223, %c0_224, %c0_225] : memref<4x2x8x8xf32, #tpu.memory_space<vmem>>, vector<1x2x8x8xf32>
    %579 = vector.shape_cast %578 : vector<1x2x8x8xf32> to vector<2x8x8xf32>
    %580 = vector.shape_cast %458 : vector<2x8x8xf32> to vector<1x2x8x8xf32>
    tpu.vector_store %arg21[%c1_222, %c0_223, %c0_224, %c0_225], %580 {strides = array<i32>} : memref<4x2x8x8xf32, #tpu.memory_space<vmem>>, vector<1x2x8x8xf32>,
    %c2 = arith.constant 2 : index
    %c0_226 = arith.constant 0 : index
    %c0_227 = arith.constant 0 : index
    %c0_228 = arith.constant 0 : index
    %581 = vector.load %arg21[%c2, %c0_226, %c0_227, %c0_228] : memref<4x2x8x8xf32, #tpu.memory_space<vmem>>, vector<1x2x8x8xf32>
    %582 = vector.shape_cast %581 : vector<1x2x8x8xf32> to vector<2x8x8xf32>
    %583 = vector.shape_cast %474 : vector<2x8x8xf32> to vector<1x2x8x8xf32>
    tpu.vector_store %arg21[%c2, %c0_226, %c0_227, %c0_228], %583 {strides = array<i32>} : memref<4x2x8x8xf32, #tpu.memory_space<vmem>>, vector<1x2x8x8xf32>,
    %c3 = arith.constant 3 : index
    %c0_229 = arith.constant 0 : index
    %c0_230 = arith.constant 0 : index
    %c0_231 = arith.constant 0 : index
    %584 = vector.load %arg21[%c3, %c0_229, %c0_230, %c0_231] : memref<4x2x8x8xf32, #tpu.memory_space<vmem>>, vector<1x2x8x8xf32>
    %585 = vector.shape_cast %584 : vector<1x2x8x8xf32> to vector<2x8x8xf32>
    %586 = vector.shape_cast %490 : vector<2x8x8xf32> to vector<1x2x8x8xf32>
    tpu.vector_store %arg21[%c3, %c0_229, %c0_230, %c0_231], %586 {strides = array<i32>} : memref<4x2x8x8xf32, #tpu.memory_space<vmem>>, vector<1x2x8x8xf32>,
    return
  }
}

</mosaic_0001>

<bundles_post_ra>
// kernel: tpu_custom_call.1
= control target key start
LH: loop header
LB: loop body
LE: loop exit
PB: predicated region body
PF: predicated region fallthrough
CT: control target
= control target key end

     0   :  { %s7759_s0 = inlined_call_operand.hbm [shape: f32[16,32], index: 0, kind: input, shape index: {}]   ;;  %s7760_s1 = inlined_call_operand.hbm [shape: bf16[16,32], index: 1, kind: input, shape index: {}]   ;;  %s7761_s2 = inlined_call_operand.vmem [shape: bf16[2,32,96], index: 2, kind: input, shape index: {}]   ;;  %s7762_s3 = inlined_call_operand.vmem [shape: f32[2,1,96], index: 3, kind: input, shape index: {}]   ;;  %s7763_s4 = inlined_call_operand.vmem [shape: bf16[2,32,32], index: 4, kind: input, shape index: {}]   ;;  %s7764_s5 = inlined_call_operand.hbm [shape: f32[2,1,32], index: 5, kind: input, shape index: {}]   ;;  %s7765_s6 = inlined_call_operand.vmem [shape: bf16[2,32,32], index: 6, kind: input, shape index: {}]   ;;  %s7766_s7 = inlined_call_operand.vmem [shape: f32[2,1,32], index: 7, kind: input, shape index: {}]   ;;  %s7767_s8 = inlined_call_operand.hbm [shape: bf16[2,32,64], index: 8, kind: input, shape index: {}]   ;;  %s7768_s9 = inlined_call_operand.vmem [shape: f32[2,1,64], index: 9, kind: input, shape index: {}]   ;;  %s7769_s10 = inlined_call_operand.hbm [shape: bf16[2,32,32], index: 10, kind: input, shape index: {}]   ;;  %s7770_s11 = inlined_call_operand.vmem [shape: f32[2,1,32], index: 11, kind: input, shape index: {}]   ;;  %s7771_s12 = inlined_call_operand.vmem [shape: f32[2,1,32], index: 12, kind: input, shape index: {}]   ;;  %s7772_s13 = inlined_call_operand.vmem [shape: f32[2,1,32], index: 13, kind: input, shape index: {}]   ;;  %s7773_s14 = inlined_call_operand.hbm [shape: bf16[2,32,64], index: 14, kind: input, shape index: {}]   ;;  %s7774_s15 = inlined_call_operand.hbm [shape: f32[2,1,64], index: 15, kind: input, shape index: {}]   ;;  %s7775_s16 = inlined_call_operand.vmem [shape: bf16[2,64,32], index: 16, kind: input, shape index: {}]   ;;  %s7776_s17 = inlined_call_operand.vmem [shape: f32[2,1,32], index: 17, kind: input, shape index: {}]   ;;  %s7777_s18 = inlined_call_operand.vmem [shape: bf16[32,128], index: 18, kind: input, shape index: {}]   ;;  %s7778_s19 = inlined_call_operand.vmem [shape: f32[1,128], index: 19, kind: input, shape index: {}]   ;;  %s7779_s20 = inlined_call_operand.hbm [shape: f32[16,128], index: 20, kind: output, shape index: {0}]   ;;  %s7780_s21 = inlined_call_operand.hbm [shape: f32[4,2,8,8], index: 21, kind: output, shape index: {1}]  }
   0x1   :  { %7792 = sst [smem:[#allocation23_spill]] %s7759_s0 }
   0x2   :  { %7793 = sst [smem:[#allocation24_spill]] %s7760_s1 }
   0x3   :  { %7794 = sst [smem:[#allocation25_spill]] %s7761_s2 }
   0x4   :  { %7795 = sst [smem:[#allocation26_spill]] %s7762_s3 }
   0x5   :  { %7796 = sst [smem:[#allocation27_spill]] %s7763_s4 }
   0x6   :  { %7797 = sst [smem:[#allocation28_spill]] %s7764_s5 }
   0x7   :  { %7798 = sst [smem:[#allocation29_spill]] %s7778_s19 }
   0x8   :  { %7799 = sst [smem:[#allocation30_spill]] %s7779_s20 }
   0x9   :  { %27 = vsyncpa [#allocation3], 0 }
   0xa   :  { %28 = vsyncpa [#allocation6], 0 }
   0xb   :  { %29 = vsyncpa [#allocation9], 0 }
   0xc   :  { %30 = vsyncpa [#allocation12], 0 }
   0xd   :  { %31 = vsyncpa [#allocation4], 0 }
   0xe   :  { %32 = vsyncpa [#allocation16], 0  ;;  %s6508_s2 = smov [#allocation5]   ;;  %s7800_s3 = sld [smem:[#allocation24_spill]] }
   0xf   :  { %s50_s25 = sshll.u32 %s6508_s2, 4  ;;  %s51_s25 = int_to_ptr.vmem [resolvable:$true] %s50_s25 }
  0x14   :  { %s6298_s28 = scalar_lea.hbm %s7800_s3, 128 }
  0x15   :  { %p6299_p0 = scmp.ne.s32.totalorder %s7800_s3, %s6298_s28  ;;  %p6302_p1 = scmp.lt.u32.totalorder %s6298_s28, %s7800_s3 }
  0x17   :  { %p6304_p2 = pnand %p6302_p1, %p6299_p0 }
  0x19   :  { %6307 = shalt.err (!%p6304_p2)
}
  0x1a   :  { %s6308_s5 = scalar_lea.vmem %s51_s25, 128  ;;  %p6313_p4 = scmp.lt.s32.totalorder %s51_s25, %s51_s25 }
  0x1b   :  { %p6309_p3 = scmp.ne.s32.totalorder %s51_s25, %s6308_s5  ;;  %p6314_p5 = scmp.lt.s32.totalorder %s6308_s5, %s6308_s5 }
  0x1d   :  { %p6315_p6 = por %p6314_p5, %p6313_p4 }
  0x1f   :  { %p6316_p7 = pnand %p6315_p6, %p6309_p3 }
  0x21   :  { %6319 = shalt.err (!%p6316_p7)
}
  0x22   :  { %s6509_s22 = smov 64   ;;  %s6510_s23 = smov 4  }
  0x23   :  { %56 = dma.hbm_to_vmem [thread:$0]  %s7800_s3, 128, %s51_s25, [#allocation6], %s6509_s22, %s6509_s22, %s6510_s23  }
  0x24   :  { %s6511_s2 = smov [#allocation8]   ;;  %s6512_s27 = smov [#allocation11]  }
  0x25   :  { %s84_s26 = sshll.u32 %s6511_s2, 4  ;;  %s116_s28 = sshll.u32 %s6512_s27, 4  ;;  %s85_s26 = int_to_ptr.vmem [resolvable:$true] %s84_s26  ;;  %s117_s28 = int_to_ptr.vmem [resolvable:$true] %s116_s28 }
  0x26   :  { %s6320_s4 = scalar_lea.hbm %s7767_s8, 512 }
  0x27   :  { %p6321_p8 = scmp.ne.s32.totalorder %s7767_s8, %s6320_s4  ;;  %p6324_p9 = scmp.lt.u32.totalorder %s6320_s4, %s7767_s8 }
  0x29   :  { %p6326_p10 = pnand %p6324_p9, %p6321_p8 }
  0x2b   :  { %6329 = shalt.err (!%p6326_p10)
}
  0x2c   :  { %s6330_s25 = scalar_lea.vmem %s85_s26, 512  ;;  %p6335_p12 = scmp.lt.s32.totalorder %s85_s26, %s85_s26 }
  0x2d   :  { %p6331_p11 = scmp.ne.s32.totalorder %s85_s26, %s6330_s25  ;;  %p6336_p13 = scmp.lt.s32.totalorder %s6330_s25, %s6330_s25 }
  0x2f   :  { %p6337_p0 = por %p6336_p13, %p6335_p12 }
  0x31   :  { %p6338_p1 = pnand %p6337_p0, %p6331_p11 }
  0x33   :  { %6341 = shalt.err (!%p6338_p1)
}
  0x34   :  { %90 = dma.hbm_to_vmem [thread:$0]  %s7767_s8, 512, %s85_s26, [#allocation9], %s6509_s22, %s6509_s22, %s6510_s23  }
  0x35   :  { %s6342_s20 = scalar_lea.hbm %s7773_s14, 512 }
  0x36   :  { %p6343_p2 = scmp.ne.s32.totalorder %s7773_s14, %s6342_s20  ;;  %p6346_p3 = scmp.lt.u32.totalorder %s6342_s20, %s7773_s14 }
  0x38   :  { %p6348_p4 = pnand %p6346_p3, %p6343_p2 }
  0x3a   :  { %6351 = shalt.err (!%p6348_p4)
}
  0x3b   :  { %s6352_s4 = scalar_lea.vmem %s117_s28, 512  ;;  %p6357_p6 = scmp.lt.s32.totalorder %s117_s28, %s117_s28 }
  0x3c   :  { %p6353_p5 = scmp.ne.s32.totalorder %s117_s28, %s6352_s4  ;;  %p6358_p7 = scmp.lt.s32.totalorder %s6352_s4, %s6352_s4 }
  0x3e   :  { %p6359_p8 = por %p6358_p7, %p6357_p6 }
  0x40   :  { %p6360_p9 = pnand %p6359_p8, %p6353_p5 }
  0x42   :  { %6363 = shalt.err (!%p6360_p9)
}
  0x43   :  { %122 = dma.hbm_to_vmem [thread:$0]  %s7773_s14, 512, %s117_s28, [#allocation12], %s6509_s22, %s6509_s22, %s6510_s23  }
  0x44   :  { %s6513_s30 = smov [#allocation2]   ;;  %s7801_s1 = sld [smem:[#allocation23_spill]] }
  0x45   :  { %s38_s5 = sshll.u32 %s6513_s30, 4  ;;  %s39_s5 = int_to_ptr.vmem [resolvable:$true] %s38_s5 }
  0x4a   :  { %s6364_s24 = scalar_lea.hbm %s7801_s1, 256 }
  0x4b   :  { %p6365_p10 = scmp.ne.s32.totalorder %s7801_s1, %s6364_s24  ;;  %p6368_p11 = scmp.lt.u32.totalorder %s6364_s24, %s7801_s1 }
  0x4d   :  { %p6370_p12 = pnand %p6368_p11, %p6365_p10 }
  0x4f   :  { %6373 = shalt.err (!%p6370_p12)
}
  0x50   :  { %s6374_s29 = scalar_lea.vmem %s39_s5, 256  ;;  %p6379_p0 = scmp.lt.s32.totalorder %s39_s5, %s39_s5 }
  0x51   :  { %p6375_p13 = scmp.ne.s32.totalorder %s39_s5, %s6374_s29  ;;  %p6380_p1 = scmp.lt.s32.totalorder %s6374_s29, %s6374_s29 }
  0x53   :  { %p6381_p2 = por %p6380_p1, %p6379_p0 }
  0x55   :  { %p6382_p3 = pnand %p6381_p2, %p6375_p13 }
  0x57   :  { %6385 = shalt.err (!%p6382_p3)
}
  0x58   :  { %s7788_s14 = smov 128   ;;  %s7790_s28 = smov 8  }
  0x59   :  { %44 = dma.hbm_to_vmem [thread:$0]  %s7801_s1, 256, %s39_s5, [#allocation3], %s7788_s14, %s7788_s14, %s7790_s28  }
  0x5a   :  { %s6516_s8 = smov [#allocation7]   ;;  %s7802_s3 = sld [smem:[#allocation28_spill]] }
  0x5b   :  { %s68_s26 = sshll.u32 %s6516_s8, 4  ;;  %s69_s26 = int_to_ptr.vmem [resolvable:$true] %s68_s26 }
  0x60   :  { %s6386_s24 = scalar_lea.hbm %s7802_s3, 32 }
  0x61   :  { %p6387_p4 = scmp.ne.s32.totalorder %s7802_s3, %s6386_s24  ;;  %p6390_p5 = scmp.lt.u32.totalorder %s6386_s24, %s7802_s3 }
  0x63   :  { %p6392_p6 = pnand %p6390_p5, %p6387_p4 }
  0x65   :  { %6395 = shalt.err (!%p6392_p6)
}
  0x66   :  { %s6396_s29 = scalar_lea.vmem %s69_s26, 32  ;;  %p6401_p8 = scmp.lt.s32.totalorder %s69_s26, %s69_s26 }
  0x67   :  { %p6397_p7 = scmp.ne.s32.totalorder %s69_s26, %s6396_s29  ;;  %p6402_p9 = scmp.lt.s32.totalorder %s6396_s29, %s6396_s29 }
  0x69   :  { %p6403_p10 = por %p6402_p9, %p6401_p8 }
  0x6b   :  { %p6404_p11 = pnand %p6403_p10, %p6397_p7 }
  0x6d   :  { %6407 = shalt.err (!%p6404_p11)
}
  0x6e   :  { %s6517_s5 = smov 16   ;;  %s6518_s1 = smov 1  }
  0x6f   :  { %74 = dma.hbm_to_vmem [thread:$0]  %s7802_s3, 32, %s69_s26, [#allocation6], %s6517_s5, %s6517_s5, %s6518_s1  }
  0x70   :  { %s6519_s8 = smov [#allocation10]   ;;  %s6520_s25 = smov [#allocation13]  }
  0x71   :  { %s98_s30 = sshll.u32 %s6519_s8, 4  ;;  %s128_s24 = sshll.u32 %s6520_s25, 4  ;;  %s99_s30 = int_to_ptr.vmem [resolvable:$true] %s98_s30  ;;  %s129_s24 = int_to_ptr.vmem [resolvable:$true] %s128_s24 }
  0x72   :  { %s6408_s2 = scalar_lea.hbm %s7769_s10, 512 }
  0x73   :  { %p6409_p12 = scmp.ne.s32.totalorder %s7769_s10, %s6408_s2  ;;  %p6412_p13 = scmp.lt.u32.totalorder %s6408_s2, %s7769_s10 }
  0x75   :  { %p6414_p0 = pnand %p6412_p13, %p6409_p12 }
  0x77   :  { %6417 = shalt.err (!%p6414_p0)
}
  0x78   :  { %s6418_s26 = scalar_lea.vmem %s99_s30, 512  ;;  %p6423_p2 = scmp.lt.s32.totalorder %s99_s30, %s99_s30 }
  0x79   :  { %p6419_p1 = scmp.ne.s32.totalorder %s99_s30, %s6418_s26  ;;  %p6424_p3 = scmp.lt.s32.totalorder %s6418_s26, %s6418_s26 }
  0x7b   :  { %p6425_p4 = por %p6424_p3, %p6423_p2 }
  0x7d   :  { %p6426_p5 = pnand %p6425_p4, %p6419_p1 }
  0x7f   :  { %6429 = shalt.err (!%p6426_p5)
}
  0x80   :  { %104 = dma.hbm_to_vmem [thread:$0]  %s7769_s10, 512, %s99_s30, [#allocation9], %s6509_s22, %s6509_s22, %s6510_s23  }
  0x81   :  { %s6430_s28 = scalar_lea.hbm %s7774_s15, 32 }
  0x82   :  { %p6431_p6 = scmp.ne.s32.totalorder %s7774_s15, %s6430_s28  ;;  %p6434_p7 = scmp.lt.u32.totalorder %s6430_s28, %s7774_s15 }
  0x84   :  { %p6436_p8 = pnand %p6434_p7, %p6431_p6 }
  0x86   :  { %6439 = shalt.err (!%p6436_p8)
}
  0x87   :  { %s6440_s2 = scalar_lea.vmem %s129_s24, 32  ;;  %p6445_p10 = scmp.lt.s32.totalorder %s129_s24, %s129_s24 }
  0x88   :  { %p6441_p9 = scmp.ne.s32.totalorder %s129_s24, %s6440_s2  ;;  %p6446_p11 = scmp.lt.s32.totalorder %s6440_s2, %s6440_s2 }
  0x8a   :  { %p6447_p12 = por %p6446_p11, %p6445_p10 }
  0x8c   :  { %p6448_p13 = pnand %p6447_p12, %p6441_p9 }
  0x8e   :  { %6451 = shalt.err (!%p6448_p13)
}
  0x8f   :  { %134 = dma.hbm_to_vmem [thread:$0]  %s7774_s15, 32, %s129_s24, [#allocation12], %s6517_s5, %s6517_s5, %s6518_s1  }
  0x90   :  { %6496 = dma.done.wait [#allocation3], 256  }
  0x91   :  { %6497 = vsyncadd [#allocation3], 4294967040 }
  0x92   :  { %6498 = dma.done.wait [#allocation6], 160  }
  0x93   :  { %6499 = vsyncadd [#allocation6], 4294967136 }
  0x94   :  { %6500 = dma.done.wait [#allocation9], 1024  }
  0x95   :  { %6501 = vsyncadd [#allocation9], 4294966272 }
  0x96   :  { %6502 = dma.done.wait [#allocation12], 544  }
  0x97   :  { %6503 = vsyncadd [#allocation12], 4294966752  ;;  %v6521_v0 = vmov 0.0   ;;  %vm6522_vm0 = vmmov 0   ;;  %s7803_s30 = sld [smem:[#allocation25_spill]]  ;;  %v6763_v3 = vld [vmem:[#allocation2] sm:$0xff] }
  0x98   :  { %5510 = vmatprep.subr.bf16.mxu0 %v6521_v0  ;;  %5514 = vmatprep.mubr.msk.bf16.mxu0 %vm6522_vm0, %v6521_v0  ;;  %v6765_v4 = vld [vmem:[#allocation2 + $0x8] sm:$0xff]  ;;  %vm195_vm1 = vcmask 261120   ;;  %s7804_s3 = sld [smem:[#allocation26_spill]]  ;;  %s6523_s0 = smov 96   ;;  %vm249_vm2 = vcmask 64512   ;;  %vm374_vm3 = vcmask 1043456  }
  0x99   :  { %5518 = vmatprep.subr.bf16.mxu1 %v6521_v0  ;;  %5520 = vmatprep.mubr.msk.bf16.mxu1 %vm6522_vm0, %v6521_v0  ;;  %v176_v5 = vpack.c.bf16 %v6765_v4, %v6763_v3  ;;  %s6524_s4 = smov 88   ;;  %s6525_s14 = smov 120   ;;  %vm1154_vm4 = vcmask 130048   ;;  %vm1157_vm5 = vcmask 195584   ;;  %vm2535_vm6 = vcmask 523264  }
  0x9a   :  { %s6526_s28 = smov 56   ;;  %s6527_s8 = smov 80  }
  0x9b   :  { %s6528_s25 = smov 112   ;;  %s6529_s19 = smov 48  }
  0x9c   :  { %s6530_s20 = smov 72   ;;  %s6531_s2 = smov 104  }
  0x9d   :  { %v6110_v1 = vld [vmem:[%s7803_s30] sm:$0xff]   ;;  %v6111_v2 = vld [vmem:[%s7803_s30 + $0x8] sm:$0xff]   ;;  %s6532_s10 = smov 40   ;;  %s7805_s23 = smov 8  }
  0x9e   :  { %5511 = vmatpush3.bf16.msra.mxu0 %v6110_v1  ;;  %v5173_v6 = vld [vmem:[%s7804_s3] ss:$0 sm:$0xff]  ;;  %s7806_s24 = sld [smem:[#allocation27_spill]]  ;;  %s6533_s26 = smov 24  }
  0x9f   :  { %5512 = vmatprep.subr.bf16.mxu0 %v6521_v0 }
  0xa2   :  { %5513 = vmatpush3.bf16.msra.mxu0 %v6111_v2 }
  0xa3   :  { %5524 = vmatprep.subr.bf16.mxu0 %v6521_v0 }
  0xa5   :  { %5515 = vmatmul.mubr.msk.bf16.vlgmr.msra.gmra.mrb[0].mxu0 %vm195_vm1, %v176_v5 }
  0xa6   :  { %5526 = vmatprep.mubr.msk.bf16.mxu0 %vm6522_vm0, %v6521_v0 }
 0x178   :  { %v233_v7 = vpop.f32.mrb[0].mxu0 }
 0x179   :  { %v234_v8 = vadd.f32 %v5173_v6, %v233_v7  ;;  %v5516_v9 = vpop.f32.mrb[1].mxu0 }
 0x17a   :  { %v236_v10 = vpop.f32.mrb[2].mxu0 }
 0x17b   :  { %v6777_v11 = vpack.c.bf16 %v234_v8, %v234_v8  ;;  %v237_v12 = vadd.f32 %v5173_v6, %v236_v10  ;;  %v5517_v13 = vpop.f32.mrb[3].mxu0  ;;  %v240_v17 = vmul.f32 0.35355338, %v234_v8 }
 0x17d   :  { %247 = vrot.lane.b32.xlu0 %v6777_v11, %s6523_s0  ;;  %v6781_v14 = vpack.c.bf16 %v237_v12, %v237_v12  ;;  %v6788_v20 = vpack.c.bf16 %v240_v17, %v240_v17  ;;  %v241_v21 = vmul.f32 0.35355338, %v237_v12 }
 0x17f   :  { %v6795_v22 = vpack.c.bf16 %v241_v21, %v241_v21 }
 0x181   :  { %297 = vrot.lane.b32.xlu0 %v6781_v14, %s6523_s0 }
 0x1ef   :  { %v248_v15 = vpop.permute.xlu0 %247 }
 0x1f0   :  { %v254_v16 = vsel %vm249_vm2, %v248_v15, 0 }
 0x1f1   :  { %5519 = vmatpush3.bf16.xpose.msra.mxu1 %v254_v16 }
 0x1f2   :  { %5530 = vmatprep.subr.bf16.mxu1 %v6521_v0 }
 0x1f3   :  { %v298_v18 = vpop.permute.xlu0 %297 }
 0x1f4   :  { %v303_v19 = vsel %vm249_vm2, %v298_v18, 0 }
 0x1f5   :  { %5525 = vmatpush3.bf16.xpose.msra.mxu0 %v303_v19 }
 0x1f6   :  { %5536 = vmatprep.subr.bf16.mxu0 %v6521_v0 }
 0x1f8   :  { %5521 = vmatmul.mubr.msk.bf16.vlgmr.msra.gmra.mrb[0].mxu1 %vm249_vm2, %v6788_v20 }
 0x1f9   :  { %5532 = vmatprep.mubr.msk.bf16.mxu1 %vm6522_vm0, %v6521_v0 }
 0x1fc   :  { %5527 = vmatmul.mubr.msk.bf16.vlgmr.msra.gmra.mrb[4].mxu0 %vm249_vm2, %v6795_v22 }
 0x1fd   :  { %5538 = vmatprep.mubr.msk.bf16.mxu0 %vm6522_vm0, %v6521_v0 }
 0x2cb   :  { %v290_v23 = vpop.f32.mrb[0].mxu1 }
 0x2cc   :  { %v5522_v24 = vpop.f32.mrb[1].mxu1  ;;  %v345_v25 = vsel %vm249_vm2, %v290_v23, -inf }
 0x2cd   :  { %346 = vmax.xlane.f32.xlu1 %v345_v25  ;;  %v293_v26 = vpop.f32.mrb[2].mxu1 }
 0x2ce   :  { %v5523_v27 = vpop.f32.mrb[3].mxu1 }
 0x2cf   :  { %v339_v28 = vpop.f32.mrb[4].mxu0 }
 0x2d0   :  { %v5528_v29 = vpop.f32.mrb[5].mxu0  ;;  %v348_v30 = vsel %vm249_vm2, %v339_v28, -inf }
 0x2d1   :  { %349 = vmax.xlane.f32.xlu1 %v348_v30  ;;  %v342_v31 = vpop.f32.mrb[6].mxu0 }
 0x2d2   :  { %v5529_v32 = vpop.f32.mrb[7].mxu0 }
 0x2e2   :  { %369 = vrot.lane.b32.xlu1 %v6777_v11, %s6509_s22 }
 0x2e6   :  { %418 = vrot.lane.b32.xlu1 %v6781_v14, %s6509_s22 }
 0x2ea   :  { %469 = vrot.lane.b32.xlu1 %v6777_v11, %s6524_s4 }
 0x35a   :  { %v347_v33 = vpop.xlane.xlu1 %346 }
 0x35b   :  { %v351_v34 = vsub.f32 %v290_v23, %v347_v33 }
 0x35d   :  { %v353_v35 = vmul.f32 1.442695, %v351_v34 }
 0x35e   :  { %v350_v36 = vpop.xlane.xlu1 %349 }
 0x35f   :  { %6145 = vpow2.f32 %v353_v35  ;;  %v352_v37 = vsub.f32 %v339_v28, %v350_v36 }
 0x361   :  { %v355_v38 = vmul.f32 1.442695, %v352_v37 }
 0x362   :  { %v370_v39 = vpop.permute.xlu1 %369 }
 0x363   :  { %6147 = vpow2.f32 %v355_v38  ;;  %v376_v40 = vsel %vm374_vm3, %v370_v39, 0 }
 0x364   :  { %5531 = vmatpush3.bf16.msra.mxu1 %v376_v40 }
 0x365   :  { %5542 = vmatprep.subr.bf16.mxu1 %v6521_v0 }
 0x366   :  { %v419_v41 = vpop.permute.xlu1 %418 }
 0x367   :  { %v424_v42 = vsel %vm374_vm3, %v419_v41, 0 }
 0x368   :  { %5537 = vmatpush3.bf16.msra.mxu0 %v424_v42 }
 0x369   :  { %v6146_v43 = vpop.eup %6145  ;;  %5548 = vmatprep.subr.bf16.mxu0 %v6521_v0 }
 0x36a   :  { %v357_v44 = vsel %vm249_vm2, %v6146_v43, 0.0  ;;  %v470_v47 = vpop.permute.xlu1 %469 }
 0x36b   :  { %358 = vadd.xlane.f32.xlu0 %v357_v44  ;;  %v475_v54 = vsel %vm249_vm2, %v470_v47, 0 }
 0x36d   :  { %v6148_v45 = vpop.eup %6147 }
 0x36e   :  { %v360_v46 = vsel %vm249_vm2, %v6148_v45, 0.0 }
 0x36f   :  { %361 = vadd.xlane.f32.xlu1 %v360_v46 }
 0x380   :  { %520 = vrot.lane.b32.xlu1 %v6781_v14, %s6524_s4 }
 0x381   :  { %467 = vrot.lane.b32.xlu0 %v6788_v20, %s6525_s14 }
 0x384   :  { %518 = vrot.lane.b32.xlu1 %v6795_v22, %s6525_s14 }
 0x3f8   :  { %v359_v48 = vpop.xlane.xlu0 %358 }
 0x3f9   :  { %6149 = vrcp.f32 %v359_v48 }
 0x3fc   :  { %v362_v49 = vpop.xlane.xlu1 %361  ;;  %v468_v59 = vpop.permute.xlu0 %467 }
 0x3fd   :  { %6151 = vrcp.f32 %v362_v49 }
 0x400   :  { %v521_v56 = vpop.permute.xlu1 %520 }
 0x401   :  { %v526_v58 = vsel %vm249_vm2, %v521_v56, 0 }
 0x403   :  { %v6150_v50 = vpop.eup %6149 }
 0x404   :  { %v365_v51 = vmul.f32 %v6150_v50, %v6146_v43  ;;  %v519_v60 = vpop.permute.xlu1 %518 }
 0x406   :  { %v367_v52 = vpack.c.bf16 %v365_v51, %v365_v51 }
 0x407   :  { %v6152_v53 = vpop.eup %6151 }
 0x408   :  { %5533 = vmatmul.mubr.msk.bf16.vlgmr.msra.gmra.mrb[4].mxu1 %vm249_vm2, %v367_v52  ;;  %v366_v55 = vmul.f32 %v6152_v53, %v6148_v45 }
 0x409   :  { %5543 = vmatpush3.bf16.xpose.msra.mxu1 %v475_v54  ;;  %5544 = vmatprep.mubr.msk.bf16.mxu1 %vm6522_vm0, %v6521_v0 }
 0x40a   :  { %v368_v57 = vpack.c.bf16 %v366_v55, %v366_v55  ;;  %5554 = vmatprep.subr.bf16.mxu1 %v6521_v0 }
 0x40c   :  { %5539 = vmatmul.mubr.msk.bf16.vlgmr.msra.gmra.mrb[8].mxu0 %vm249_vm2, %v368_v57 }
 0x40d   :  { %5549 = vmatpush3.bf16.xpose.msra.mxu0 %v526_v58  ;;  %5550 = vmatprep.mubr.msk.bf16.mxu0 %vm6522_vm0, %v6521_v0 }
 0x40e   :  { %5560 = vmatprep.subr.bf16.mxu0 %v6521_v0 }
 0x410   :  { %5545 = vmatmul.mubr.msk.bf16.vlgmr.msra.gmra.mrb[8].mxu1 %vm249_vm2, %v468_v59 }
 0x411   :  { %5556 = vmatprep.mubr.msk.bf16.mxu1 %vm6522_vm0, %v6521_v0 }
 0x414   :  { %5551 = vmatmul.mubr.msk.bf16.vlgmr.msra.gmra.mrb[12].mxu0 %vm249_vm2, %v519_v60 }
 0x415   :  { %5562 = vmatprep.mubr.msk.bf16.mxu0 %vm6522_vm0, %v6521_v0 }
 0x4db   :  { %v6837_v61 = vpop.f32.mrb[4].mxu1 }
 0x4dc   :  { %v5534_v62 = vpop.f32.mrb[5].mxu1 }
 0x4dd   :  { %v415_v63 = vpop.f32.mrb[6].mxu1 }
 0x4de   :  { %v5535_v1 = vpop.f32.mrb[7].mxu1 }
 0x4df   :  { %v6839_v2 = vpop.f32.mrb[8].mxu0 }
 0x4e0   :  { %v5540_v5 = vpop.f32.mrb[9].mxu0 }
 0x4e1   :  { %v463_v6 = vpop.f32.mrb[10].mxu0 }
 0x4e2   :  { %v5541_v7 = vpop.f32.mrb[11].mxu0 }
 0x4e3   :  { %v511_v8 = vpop.f32.mrb[8].mxu1 }
 0x4e4   :  { %v5546_v9 = vpop.f32.mrb[9].mxu1  ;;  %v568_v10 = vsel %vm249_vm2, %v511_v8, -inf }
 0x4e5   :  { %569 = vmax.xlane.f32.xlu1 %v568_v10  ;;  %v514_v12 = vpop.f32.mrb[10].mxu1 }
 0x4e6   :  { %v5547_v13 = vpop.f32.mrb[11].mxu1 }
 0x4e7   :  { %v562_v15 = vpop.f32.mrb[12].mxu0 }
 0x4e8   :  { %v5552_v16 = vpop.f32.mrb[13].mxu0  ;;  %v571_v17 = vsel %vm249_vm2, %v562_v15, -inf }
 0x4e9   :  { %572 = vmax.xlane.f32.xlu0 %v571_v17  ;;  %v565_v18 = vpop.f32.mrb[14].mxu0 }
 0x4ea   :  { %v5553_v19 = vpop.f32.mrb[15].mxu0 }
 0x4f6   :  { %592 = vrot.lane.b32.xlu1 %v6777_v11, %s6526_s28 }
 0x4fa   :  { %690 = vrot.lane.b32.xlu1 %v6777_v11, %s6527_s8 }
 0x4ff   :  { %640 = vrot.lane.b32.xlu0 %v6781_v14, %s6526_s28 }
 0x503   :  { %688 = vrot.lane.b32.xlu0 %v6788_v20, %s6528_s25 }
 0x572   :  { %v570_v21 = vpop.xlane.xlu1 %569 }
 0x573   :  { %v574_v23 = vsub.f32 %v511_v8, %v570_v21 }
 0x575   :  { %v576_v24 = vmul.f32 1.442695, %v574_v23 }
 0x576   :  { %v593_v25 = vpop.permute.xlu1 %592  ;;  %v573_v26 = vpop.xlane.xlu0 %572 }
 0x577   :  { %6153 = vpow2.f32 %v576_v24  ;;  %v598_v27 = vsel %vm374_vm3, %v593_v25, 0  ;;  %v575_v28 = vsub.f32 %v562_v15, %v573_v26 }
 0x578   :  { %5555 = vmatpush3.bf16.msra.mxu1 %v598_v27 }
 0x579   :  { %v578_v29 = vmul.f32 1.442695, %v575_v28  ;;  %5566 = vmatprep.subr.bf16.mxu1 %v6521_v0 }
 0x57a   :  { %v641_v30 = vpop.permute.xlu0 %640  ;;  %v691_v36 = vpop.permute.xlu1 %690 }
 0x57b   :  { %6155 = vpow2.f32 %v578_v29  ;;  %v646_v31 = vsel %vm374_vm3, %v641_v30, 0  ;;  %v696_v43 = vsel %vm249_vm2, %v691_v36, 0 }
 0x57c   :  { %5561 = vmatpush3.bf16.msra.mxu0 %v646_v31 }
 0x57d   :  { %5572 = vmatprep.subr.bf16.mxu0 %v6521_v0 }
 0x57e   :  { %v689_v48 = vpop.permute.xlu0 %688 }
 0x581   :  { %v6154_v32 = vpop.eup %6153 }
 0x582   :  { %v580_v33 = vsel %vm249_vm2, %v6154_v32, 0.0 }
 0x583   :  { %581 = vadd.xlane.f32.xlu1 %v580_v33 }
 0x585   :  { %v6156_v34 = vpop.eup %6155 }
 0x586   :  { %v583_v35 = vsel %vm249_vm2, %v6156_v34, 0.0 }
 0x587   :  { %584 = vadd.xlane.f32.xlu1 %v583_v35 }
 0x598   :  { %740 = vrot.lane.b32.xlu1 %v6781_v14, %s6527_s8 }
 0x59c   :  { %738 = vrot.lane.b32.xlu1 %v6795_v22, %s6528_s25 }
 0x610   :  { %v582_v37 = vpop.xlane.xlu1 %581 }
 0x611   :  { %6157 = vrcp.f32 %v582_v37 }
 0x614   :  { %v585_v38 = vpop.xlane.xlu1 %584 }
 0x615   :  { %6159 = vrcp.f32 %v585_v38 }
 0x618   :  { %v741_v45 = vpop.permute.xlu1 %740 }
 0x619   :  { %v746_v47 = vsel %vm249_vm2, %v741_v45, 0 }
 0x61b   :  { %v6158_v39 = vpop.eup %6157 }
 0x61c   :  { %v588_v40 = vmul.f32 %v6158_v39, %v6154_v32  ;;  %v739_v49 = vpop.permute.xlu1 %738 }
 0x61e   :  { %v590_v41 = vpack.c.bf16 %v588_v40, %v588_v40 }
 0x61f   :  { %v6160_v42 = vpop.eup %6159 }
 0x620   :  { %5557 = vmatmul.mubr.msk.bf16.vlgmr.msra.gmra.mrb[12].mxu1 %vm249_vm2, %v590_v41  ;;  %v589_v44 = vmul.f32 %v6160_v42, %v6156_v34 }
 0x621   :  { %5567 = vmatpush3.bf16.xpose.msra.mxu1 %v696_v43  ;;  %5568 = vmatprep.mubr.msk.bf16.mxu1 %vm6522_vm0, %v6521_v0 }
 0x622   :  { %v591_v46 = vpack.c.bf16 %v589_v44, %v589_v44  ;;  %5578 = vmatprep.subr.bf16.mxu1 %v6521_v0 }
 0x624   :  { %5563 = vmatmul.mubr.msk.bf16.vlgmr.msra.gmra.mrb[16].mxu0 %vm249_vm2, %v591_v46 }
 0x625   :  { %5573 = vmatpush3.bf16.xpose.msra.mxu0 %v746_v47  ;;  %5574 = vmatprep.mubr.msk.bf16.mxu0 %vm6522_vm0, %v6521_v0 }
 0x626   :  { %5584 = vmatprep.subr.bf16.mxu0 %v6521_v0 }
 0x628   :  { %5569 = vmatmul.mubr.msk.bf16.vlgmr.msra.gmra.mrb[16].mxu1 %vm249_vm2, %v689_v48 }
 0x629   :  { %5580 = vmatprep.mubr.msk.bf16.mxu1 %vm6522_vm0, %v6521_v0 }
 0x62c   :  { %5575 = vmatmul.mubr.msk.bf16.vlgmr.msra.gmra.mrb[20].mxu0 %vm249_vm2, %v739_v49 }
 0x62d   :  { %5586 = vmatprep.mubr.msk.bf16.mxu0 %vm6522_vm0, %v6521_v0 }
 0x6f3   :  { %v6877_v50 = vpop.f32.mrb[12].mxu1 }
 0x6f4   :  { %v5558_v51 = vpop.f32.mrb[13].mxu1 }
 0x6f5   :  { %v637_v52 = vpop.f32.mrb[14].mxu1 }
 0x6f6   :  { %v5559_v53 = vpop.f32.mrb[15].mxu1 }
 0x6f7   :  { %v6879_v54 = vpop.f32.mrb[16].mxu0 }
 0x6f8   :  { %v6050_v55 = vpack.i.bf16 %v6879_v54, %v6877_v50  ;;  %v5564_v56 = vpop.f32.mrb[17].mxu0 }
 0x6f9   :  { %v685_v57 = vpop.f32.mrb[18].mxu0 }
 0x6fa   :  { %v5565_v58 = vpop.f32.mrb[19].mxu0 }
 0x6fb   :  { %v732_v59 = vpop.f32.mrb[16].mxu1 }
 0x6fc   :  { %v5570_v60 = vpop.f32.mrb[17].mxu1  ;;  %v788_v62 = vsel %vm249_vm2, %v732_v59, -inf }
 0x6fd   :  { %789 = vmax.xlane.f32.xlu0 %v788_v62  ;;  %v735_v63 = vpop.f32.mrb[18].mxu1 }
 0x6fe   :  { %v5571_v1 = vpop.f32.mrb[19].mxu1 }
 0x6ff   :  { %v782_v5 = vpop.f32.mrb[20].mxu0 }
 0x700   :  { %v5576_v6 = vpop.f32.mrb[21].mxu0  ;;  %v791_v7 = vsel %vm249_vm2, %v782_v5, -inf }
 0x701   :  { %792 = vmax.xlane.f32.xlu1 %v791_v7  ;;  %v785_v8 = vpop.f32.mrb[22].mxu0 }
 0x702   :  { %v5577_v9 = vpop.f32.mrb[23].mxu0 }
 0x712   :  { %812 = vrot.lane.b32.xlu1 %v6777_v11, %s6529_s19 }
 0x716   :  { %910 = vrot.lane.b32.xlu1 %v6777_v11, %s6530_s20 }
 0x71a   :  { %960 = vrot.lane.b32.xlu1 %v6781_v14, %s6530_s20 }
 0x71e   :  { %958 = vrot.lane.b32.xlu1 %v6795_v22, %s6531_s2 }
 0x78a   :  { %v790_v10 = vpop.xlane.xlu0 %789 }
 0x78b   :  { %v794_v12 = vsub.f32 %v732_v59, %v790_v10 }
 0x78d   :  { %v796_v13 = vmul.f32 1.442695, %v794_v12 }
 0x78e   :  { %v793_v15 = vpop.xlane.xlu1 %792 }
 0x78f   :  { %6161 = vpow2.f32 %v796_v13  ;;  %v795_v16 = vsub.f32 %v782_v5, %v793_v15 }
 0x791   :  { %v798_v17 = vmul.f32 1.442695, %v795_v16 }
 0x792   :  { %v813_v18 = vpop.permute.xlu1 %812 }
 0x793   :  { %6163 = vpow2.f32 %v798_v17  ;;  %v818_v19 = vsel %vm374_vm3, %v813_v18, 0 }
 0x794   :  { %5579 = vmatpush3.bf16.msra.mxu1 %v818_v19 }
 0x795   :  { %5590 = vmatprep.subr.bf16.mxu1 %v6521_v0 }
 0x796   :  { %v911_v30 = vpop.permute.xlu1 %910 }
 0x797   :  { %v916_v34 = vsel %vm249_vm2, %v911_v30, 0 }
 0x799   :  { %v6162_v21 = vpop.eup %6161 }
 0x79a   :  { %v800_v23 = vsel %vm249_vm2, %v6162_v21, 0.0  ;;  %v961_v35 = vpop.permute.xlu1 %960 }
 0x79b   :  { %801 = vadd.xlane.f32.xlu0 %v800_v23  ;;  %v966_v37 = vsel %vm249_vm2, %v961_v35, 0 }
 0x79d   :  { %v6164_v24 = vpop.eup %6163 }
 0x79e   :  { %v803_v22 = vsel %vm249_vm2, %v6164_v24, 0.0  ;;  %v959_v39 = vpop.permute.xlu1 %958 }
 0x79f   :  { %804 = vadd.xlane.f32.xlu0 %v803_v22  ;;  %v6113_v22 = vld [vmem:[%s7806_s24 + $0x8] sm:$0xff]  }
 0x7b5   :  { %860 = vrot.lane.b32.xlu0 %v6781_v14, %s6529_s19 }
 0x7b9   :  { %908 = vrot.lane.b32.xlu0 %v6788_v20, %s6531_s2 }
 0x828   :  { %v802_v25 = vpop.xlane.xlu0 %801 }
 0x829   :  { %6165 = vrcp.f32 %v802_v25 }
 0x82c   :  { %v805_v26 = vpop.xlane.xlu0 %804 }
 0x82d   :  { %6167 = vrcp.f32 %v805_v26 }
 0x830   :  { %v861_v27 = vpop.permute.xlu0 %860 }
 0x831   :  { %v866_v28 = vsel %vm374_vm3, %v861_v27, 0 }
 0x832   :  { %5585 = vmatpush3.bf16.msra.mxu0 %v866_v28 }
 0x833   :  { %v6166_v29 = vpop.eup %6165  ;;  %5596 = vmatprep.subr.bf16.mxu0 %v6521_v0 }
 0x834   :  { %v808_v31 = vmul.f32 %v6166_v29, %v6162_v21  ;;  %v909_v38 = vpop.permute.xlu0 %908 }
 0x836   :  { %v810_v32 = vpack.c.bf16 %v808_v31, %v808_v31 }
 0x837   :  { %v6168_v33 = vpop.eup %6167 }
 0x838   :  { %5581 = vmatmul.mubr.msk.bf16.vlgmr.msra.gmra.mrb[20].mxu1 %vm249_vm2, %v810_v32  ;;  %v809_v20 = vmul.f32 %v6168_v33, %v6164_v24  ;;  %v6112_v24 = vld [vmem:[%s7806_s24] sm:$0xff]  }
 0x839   :  { %5591 = vmatpush3.bf16.xpose.msra.mxu1 %v916_v34  ;;  %5592 = vmatprep.mubr.msk.bf16.mxu1 %vm6522_vm0, %v6521_v0 }
 0x83a   :  { %v811_v36 = vpack.c.bf16 %v809_v20, %v809_v20  ;;  %5602 = vmatprep.subr.bf16.mxu1 %v6521_v0 }
 0x83c   :  { %5587 = vmatmul.mubr.msk.bf16.vlgmr.msra.gmra.mrb[24].mxu0 %vm249_vm2, %v811_v36 }
 0x83d   :  { %5597 = vmatpush3.bf16.xpose.msra.mxu0 %v966_v37  ;;  %5598 = vmatprep.mubr.msk.bf16.mxu0 %vm6522_vm0, %v6521_v0 }
 0x83e   :  { %5608 = vmatprep.subr.bf16.mxu0 %v6521_v0 }
 0x840   :  { %5593 = vmatmul.mubr.msk.bf16.vlgmr.msra.gmra.mrb[24].mxu1 %vm249_vm2, %v909_v38 }
 0x841   :  { %5604 = vmatprep.mubr.msk.bf16.mxu1 %vm6522_vm0, %v6521_v0 }
 0x844   :  { %5599 = vmatmul.mubr.msk.bf16.vlgmr.msra.gmra.mrb[28].mxu0 %vm249_vm2, %v959_v39 }
 0x845   :  { %5610 = vmatprep.mubr.msk.bf16.mxu0 %vm6522_vm0, %v6521_v0 }
 0x90b   :  { %v854_v40 = vpop.f32.mrb[20].mxu1 }
 0x90c   :  { %v5582_v41 = vpop.f32.mrb[21].mxu1 }
 0x90d   :  { %v857_v42 = vpop.f32.mrb[22].mxu1 }
 0x90e   :  { %v5583_v43 = vpop.f32.mrb[23].mxu1 }
 0x90f   :  { %v902_v44 = vpop.f32.mrb[24].mxu0 }
 0x910   :  { %v6055_v45 = vpack.i.bf16 %v902_v44, %v854_v40  ;;  %v5588_v46 = vpop.f32.mrb[25].mxu0 }
 0x911   :  { %v905_v47 = vpop.f32.mrb[26].mxu0 }
 0x912   :  { %v5589_v48 = vpop.f32.mrb[27].mxu0 }
 0x913   :  { %v952_v49 = vpop.f32.mrb[24].mxu1 }
 0x914   :  { %v5594_v51 = vpop.f32.mrb[25].mxu1  ;;  %v1008_v52 = vsel %vm249_vm2, %v952_v49, -inf }
 0x915   :  { %1009 = vmax.xlane.f32.xlu0 %v1008_v52  ;;  %v955_v53 = vpop.f32.mrb[26].mxu1 }
 0x916   :  { %v5595_v56 = vpop.f32.mrb[27].mxu1 }
 0x917   :  { %v1002_v57 = vpop.f32.mrb[28].mxu0 }
 0x918   :  { %v5600_v58 = vpop.f32.mrb[29].mxu0  ;;  %v1011_v59 = vsel %vm249_vm2, %v1002_v57, -inf }
 0x919   :  { %1012 = vmax.xlane.f32.xlu1 %v1011_v59  ;;  %v1005_v60 = vpop.f32.mrb[30].mxu0 }
 0x91a   :  { %v5601_v62 = vpop.f32.mrb[31].mxu0 }
 0x92a   :  { %1032 = vrot.lane.b32.xlu1 %v6777_v11, %s6532_s10 }
 0x92e   :  { %6051 = vrot.lane.b32.xlu1 %v6050_v55, %s7805_s23 }
 0x932   :  { %6056 = vrot.lane.b32.xlu1 %v6055_v45, %s6517_s5 }
 0x9a2   :  { %v1010_v63 = vpop.xlane.xlu0 %1009 }
 0x9a3   :  { %v1014_v1 = vsub.f32 %v952_v49, %v1010_v63 }
 0x9a5   :  { %v1016_v5 = vmul.f32 1.442695, %v1014_v1 }
 0x9a6   :  { %v1013_v6 = vpop.xlane.xlu1 %1012 }
 0x9a7   :  { %6169 = vpow2.f32 %v1016_v5  ;;  %v1015_v7 = vsub.f32 %v1002_v57, %v1013_v6 }
 0x9a9   :  { %v1018_v8 = vmul.f32 1.442695, %v1015_v7 }
 0x9aa   :  { %v1033_v9 = vpop.permute.xlu1 %1032 }
 0x9ab   :  { %6171 = vpow2.f32 %v1018_v8  ;;  %v1038_v10 = vsel %vm374_vm3, %v1033_v9, 0 }
 0x9ac   :  { %5603 = vmatpush3.bf16.msra.mxu1 %v1038_v10 }
 0x9ad   :  { %5614 = vmatprep.subr.bf16.mxu1 %v6521_v0 }
 0x9ae   :  { %v6052_v34 = vpop.permute.xlu1 %6051 }
 0x9af   :  { %v6054_v35 = vunpack.i.h.bf16 %v6052_v34  ;;  %v6053_v36 = vunpack.i.l.bf16 %v6052_v34 }
 0x9b1   :  { %v6170_v11 = vpop.eup %6169  ;;  %v1153_v40 = vsel %vm249_vm2, %v6839_v2, %v6054_v35  ;;  %v1152_v41 = vsel %vm249_vm2, %v6837_v61, %v6053_v36  ;;  %v5193_v2 = vld [vmem:[#allocation7] ss:$0 sm:$0xff] }
 0x9b2   :  { %v1020_v50 = vsel %vm249_vm2, %v6170_v11, 0.0  ;;  %v6057_v20 = vpop.permute.xlu1 %6056 }
 0x9b3   :  { %1021 = vadd.xlane.f32.xlu0 %v1020_v50  ;;  %v6059_v37 = vunpack.i.h.bf16 %v6057_v20  ;;  %v6058_v38 = vunpack.i.l.bf16 %v6057_v20  ;;  %v6116_v50 = vld [vmem:[#allocation5] sm:$0xff]  }
 0x9b5   :  { %v6172_v54 = vpop.eup %6171  ;;  %v1155_v44 = vsel %vm1154_vm4, %v1152_v41, %v6058_v38  ;;  %v1156_v45 = vsel %vm1154_vm4, %v1153_v40, %v6059_v37  ;;  %v5199_v40 = vld [vmem:[%s7766_s7] ss:$0 sm:$0xff] }
 0x9b6   :  { %v1023_v55 = vsel %vm249_vm2, %v6172_v54, 0.0 }
 0x9b7   :  { %1024 = vadd.xlane.f32.xlu0 %v1023_v55  ;;  %v6118_v55 = vld [vmem:[%s7765_s6 + $0x8] sm:$0xff]  }
 0x9cd   :  { %1080 = vrot.lane.b32.xlu0 %v6781_v14, %s6532_s10 }
 0xa40   :  { %v1022_v12 = vpop.xlane.xlu0 %1021 }
 0xa41   :  { %6173 = vrcp.f32 %v1022_v12 }
 0xa44   :  { %v1025_v13 = vpop.xlane.xlu0 %1024 }
 0xa45   :  { %6175 = vrcp.f32 %v1025_v13 }
 0xa48   :  { %v1081_v15 = vpop.permute.xlu0 %1080 }
 0xa49   :  { %v1086_v16 = vsel %vm374_vm3, %v1081_v15, 0 }
 0xa4a   :  { %5609 = vmatpush3.bf16.msra.mxu0 %v1086_v16 }
 0xa4b   :  { %v6174_v17 = vpop.eup %6173  ;;  %5622 = vmatprep.subr.bf16.mxu0 %v6521_v0 }
 0xa4c   :  { %v1028_v18 = vmul.f32 %v6174_v17, %v6170_v11  ;;  %v6114_v11 = vld [vmem:[#allocation8] sm:$0xff]  }
 0xa4e   :  { %v1030_v19 = vpack.c.bf16 %v1028_v18, %v1028_v18 }
 0xa4f   :  { %v6176_v21 = vpop.eup %6175 }
 0xa50   :  { %5605 = vmatmul.mubr.msk.bf16.vlgmr.msra.gmra.mrb[28].mxu1 %vm249_vm2, %v1030_v19  ;;  %v1029_v23 = vmul.f32 %v6176_v21, %v6172_v54  ;;  %v6117_v54 = vld [vmem:[%s7765_s6] sm:$0xff]  }
 0xa51   :  { %5618 = vmatprep.mubr.msk.bf16.mxu1 %vm6522_vm0, %v6521_v0  ;;  %5615 = vmatpush3.bf16.msra.mxu1 %v6112_v24  ;;  %v6984_v21 = vld [vmem:[%s7771_s12] ss:$0 sm:$0xff] }
 0xa52   :  { %v1031_v14 = vpack.c.bf16 %v1029_v23, %v1029_v23  ;;  %5616 = vmatprep.subr.bf16.mxu1 %v6521_v0 }
 0xa54   :  { %5611 = vmatmul.mubr.msk.bf16.vlgmr.msra.gmra.mrb[32].mxu0 %vm249_vm2, %v1031_v14 }
 0xa55   :  { %5626 = vmatprep.mubr.msk.bf16.mxu0 %vm6522_vm0, %v6521_v0  ;;  %5617 = vmatpush3.bf16.msra.mxu1 %v6113_v22 }
 0xa56   :  { %5630 = vmatprep.subr.bf16.mxu1 %v6521_v0  ;;  %5623 = vmatpush3.bf16.msra.mxu0 %v6117_v54 }
 0xa57   :  { %5624 = vmatprep.subr.bf16.mxu0 %v6521_v0 }
 0xa5a   :  { %5625 = vmatpush3.bf16.msra.mxu0 %v6118_v55 }
 0xa5b   :  { %5638 = vmatprep.subr.bf16.mxu0 %v6521_v0 }
 0xb23   :  { %v1074_v25 = vpop.f32.mrb[28].mxu1 }
 0xb24   :  { %v5606_v26 = vpop.f32.mrb[29].mxu1 }
 0xb25   :  { %v1077_v27 = vpop.f32.mrb[30].mxu1 }
 0xb26   :  { %v5607_v28 = vpop.f32.mrb[31].mxu1 }
 0xb27   :  { %v1122_v29 = vpop.f32.mrb[32].mxu0 }
 0xb28   :  { %v6060_v30 = vpack.i.bf16 %v1122_v29, %v1074_v25  ;;  %v5612_v31 = vpop.f32.mrb[33].mxu0  ;;  %v6990_v25 = vld [vmem:[%s7772_s13] ss:$0 sm:$0xff] }
 0xb29   :  { %v1125_v32 = vpop.f32.mrb[34].mxu0 }
 0xb2a   :  { %6061 = vrot.lane.b32.xlu0 %v6060_v30, %s6533_s26  ;;  %v5613_v33 = vpop.f32.mrb[35].mxu0  ;;  %v5203_v30 = vld [vmem:[%s7768_s9] ss:$0 sm:$0xff] }
 0xb9c   :  { %v6062_v39 = vpop.permute.xlu0 %6061 }
 0xb9d   :  { %v6064_v42 = vunpack.i.h.bf16 %v6062_v39  ;;  %v6063_v43 = vunpack.i.l.bf16 %v6062_v39 }
 0xb9f   :  { %v1159_v46 = vsel %vm1157_vm5, %v1156_v45, %v6064_v42  ;;  %v1158_v47 = vsel %vm1157_vm5, %v1155_v44, %v6063_v43 }
 0xba0   :  { %v1165_v48 = vpack.c.bf16 %v1159_v46, %v1158_v47 }
 0xba2   :  { %5619 = vmatmul.mubr.msk.bf16.vlgmr.msra.gmra.mrb[32].mxu1 %vm195_vm1, %v1165_v48 }
 0xba3   :  { %5634 = vmatprep.mubr.msk.bf16.mxu1 %vm6522_vm0, %v6521_v0  ;;  %5631 = vmatpush3.bf16.msra.mxu1 %v6114_v11 }
 0xba4   :  { %5632 = vmatprep.subr.bf16.mxu1 %v6521_v0 }
 0xc75   :  { %v1221_v49 = vpop.f32.mrb[32].mxu1 }
 0xc76   :  { %v1222_v51 = vadd.f32 %v5193_v2, %v1221_v49  ;;  %v5620_v61 = vpop.f32.mrb[33].mxu1 }
 0xc77   :  { %v1224_v52 = vpop.f32.mrb[34].mxu1 }
 0xc78   :  { %v1225_v53 = vadd.f32 %v5193_v2, %v1224_v52  ;;  %v5621_v56 = vpop.f32.mrb[35].mxu1  ;;  %v1228_v57 = vadd.f32 %v1222_v51, %v6763_v3 }
 0xc7a   :  { %v1230_v58 = vsel %vm195_vm1, %v1228_v57, 0.0  ;;  %v1229_v59 = vadd.f32 %v1225_v53, %v6765_v4  ;;  %v6115_v4 = vld [vmem:[#allocation8 + $0x8] sm:$0xff]  }
 0xc7b   :  { %1231 = vadd.xlane.f32.xlu1 %v1230_v58  ;;  %5633 = vmatpush3.bf16.msra.mxu1 %v6115_v4 }
 0xc7c   :  { %v1233_v60 = vsel %vm195_vm1, %v1229_v59, 0.0  ;;  %5644 = vmatprep.subr.bf16.mxu1 %v6521_v0 }
 0xc7d   :  { %1234 = vadd.xlane.f32.xlu0 %v1233_v60 }
 0xc7e   :  { %5635 = vmatmul.mubr.msk.bf16.vlgmr.msra.gmra.mrb[36].mxu1 %vm195_vm1, %v6116_v50 }
 0xc7f   :  { %5646 = vmatprep.mubr.msk.bf16.mxu1 %vm6522_vm0, %v6521_v0 }
 0xd08   :  { %v1232_v62 = vpop.xlane.xlu1 %1231 }
 0xd09   :  { %v1237_v63 = vmul.f32 0.03125, %v1232_v62 }
 0xd0a   :  { %v1235_v1 = vpop.xlane.xlu0 %1234 }
 0xd0b   :  { %v1239_v5 = vsub.f32 %v1228_v57, %v1237_v63  ;;  %v1238_v6 = vmul.f32 0.03125, %v1235_v1 }
 0xd0d   :  { %v1240_v7 = vsub.f32 %v1229_v59, %v1238_v6  ;;  %v1241_v8 = vmul.f32 %v1239_v5, %v1239_v5 }
 0xd0f   :  { %v1243_v9 = vsel %vm195_vm1, %v1241_v8, 0.0  ;;  %v1242_v10 = vmul.f32 %v1240_v7, %v1240_v7 }
 0xd10   :  { %1244 = vadd.xlane.f32.xlu0 %v1243_v9 }
 0xd11   :  { %v1246_v3 = vsel %vm195_vm1, %v1242_v10, 0.0 }
 0xd12   :  { %1247 = vadd.xlane.f32.xlu1 %v1246_v3 }
 0xd51   :  { %v1408_v31 = vpop.f32.mrb[36].mxu1 }
 0xd52   :  { %v1409_v32 = vadd.f32 %v5203_v30, %v1408_v31  ;;  %v5636_v33 = vpop.f32.mrb[37].mxu1 }
 0xd53   :  { %v1411_v34 = vpop.f32.mrb[38].mxu1 }
 0xd54   :  { %v1412_v20 = vadd.f32 %v5203_v30, %v1411_v34  ;;  %v5637_v35 = vpop.f32.mrb[39].mxu1  ;;  %v7007_v36 = vpack.c.bf16 %v1409_v32, %v1409_v32 }
 0xd56   :  { %v7009_v37 = vpack.c.bf16 %v1412_v20, %v1412_v20  ;;  %v1423_v38 = vsel %vm249_vm2, %v7007_v36, 0 }
 0xd58   :  { %v1469_v39 = vsel %vm249_vm2, %v7009_v37, 0 }
 0xd59   :  { %5645 = vmatpush3.bf16.xpose.msra.mxu1 %v1469_v39 }
 0xd5a   :  { %5656 = vmatprep.subr.bf16.mxu1 %v6521_v0 }
 0xd9d   :  { %v1245_v12 = vpop.xlane.xlu0 %1244 }
 0xd9e   :  { %v1249_v13 = vmul.f32 0.03125, %v1245_v12 }
 0xd9f   :  { %v1248_v15 = vpop.xlane.xlu1 %1247 }
 0xda0   :  { %v1251_v16 = vadd.f32 1e-05, %v1249_v13  ;;  %v1250_v17 = vmul.f32 0.03125, %v1248_v15 }
 0xda2   :  { %6177 = vrsqrt.f32 %v1251_v16  ;;  %v1252_v18 = vadd.f32 1e-05, %v1250_v17 }
 0xda4   :  { %6179 = vrsqrt.f32 %v1252_v18 }
 0xdac   :  { %v6178_v19 = vpop.eup %6177 }
 0xdad   :  { %v1255_v23 = vmul.f32 %v6178_v19, %v1239_v5 }
 0xdae   :  { %v6180_v14 = vpop.eup %6179 }
 0xdaf   :  { %v1263_v24 = vmul.f32 %v6984_v21, %v1255_v23  ;;  %v1256_v22 = vmul.f32 %v6180_v14, %v1240_v7 }
 0xdb1   :  { %v1264_v26 = vmul.f32 %v6984_v21, %v1256_v22  ;;  %v6994_v27 = vadd.f32 %v6990_v25, %v1263_v24 }
 0xdb3   :  { %v6997_v28 = vadd.f32 %v6990_v25, %v1264_v26 }
 0xdb5   :  { %v1278_v29 = vpack.c.bf16 %v6997_v28, %v6994_v27 }
 0xdb7   :  { %5627 = vmatmul.mubr.msk.bf16.vlgmr.msra.gmra.mrb[36].mxu0 %vm195_vm1, %v1278_v29 }
 0xdb8   :  { %5640 = vmatprep.mubr.msk.bf16.mxu0 %vm6522_vm0, %v6521_v0  ;;  %5639 = vmatpush3.bf16.xpose.msra.mxu0 %v1423_v38 }
 0xdb9   :  { %5650 = vmatprep.subr.bf16.mxu0 %v6521_v0 }
 0xe8a   :  { %v1334_v41 = vpop.f32.mrb[36].mxu0 }
 0xe8b   :  { %v1335_v42 = vadd.f32 %v5199_v40, %v1334_v41  ;;  %v5628_v43 = vpop.f32.mrb[37].mxu0 }
 0xe8c   :  { %v1337_v44 = vpop.f32.mrb[38].mxu0 }
 0xe8d   :  { %v1341_v45 = vmul.f32 0.35355338, %v1335_v42  ;;  %v1338_v46 = vadd.f32 %v5199_v40, %v1337_v44  ;;  %v5629_v47 = vpop.f32.mrb[39].mxu0 }
 0xe8f   :  { %v7020_v48 = vpack.c.bf16 %v1341_v45, %v1341_v45  ;;  %v1342_v2 = vmul.f32 0.35355338, %v1338_v46 }
 0xe91   :  { %v7022_v49 = vpack.c.bf16 %v1342_v2, %v1342_v2  ;;  %5641 = vmatmul.mubr.msk.bf16.vlgmr.msra.gmra.mrb[40].mxu0 %vm249_vm2, %v7020_v48 }
 0xe92   :  { %5652 = vmatprep.mubr.msk.bf16.mxu0 %vm6522_vm0, %v6521_v0 }
 0xe93   :  { %5647 = vmatmul.mubr.msk.bf16.vlgmr.msra.gmra.mrb[40].mxu1 %vm249_vm2, %v7022_v49 }
 0xe94   :  { %5658 = vmatprep.mubr.msk.bf16.mxu1 %vm6522_vm0, %v6521_v0 }
 0xf64   :  { %v1459_v51 = vpop.f32.mrb[40].mxu0 }
 0xf65   :  { %v5642_v61 = vpop.f32.mrb[41].mxu0  ;;  %v1511_v52 = vsel %vm249_vm2, %v1459_v51, -inf }
 0xf66   :  { %v1505_v53 = vpop.f32.mrb[40].mxu1  ;;  %1512 = vmax.xlane.f32.xlu0 %v1511_v52  ;;  %v1462_v56 = vpop.f32.mrb[42].mxu0 }
 0xf67   :  { %v5643_v57 = vpop.f32.mrb[43].mxu0  ;;  %v5648_v58 = vpop.f32.mrb[41].mxu1  ;;  %v1514_v59 = vsel %vm249_vm2, %v1505_v53, -inf }
 0xf68   :  { %1515 = vmax.xlane.f32.xlu1 %v1514_v59  ;;  %v1508_v60 = vpop.f32.mrb[42].mxu1 }
 0xf69   :  { %v5649_v62 = vpop.f32.mrb[43].mxu1 }
 0xf79   :  { %1585 = vrot.lane.b32.xlu1 %v7009_v37, %s6523_s0 }
 0xf7c   :  { %1536 = vrot.lane.b32.xlu0 %v7007_v36, %s6523_s0 }
 0xff3   :  { %v1513_v63 = vpop.xlane.xlu0 %1512 }
 0xff4   :  { %v1517_v1 = vsub.f32 %v1459_v51, %v1513_v63 }
 0xff5   :  { %v1516_v5 = vpop.xlane.xlu1 %1515 }
 0xff6   :  { %v1519_v6 = vmul.f32 1.442695, %v1517_v1  ;;  %v1518_v7 = vsub.f32 %v1505_v53, %v1516_v5 }
 0xff7   :  { %v1537_v8 = vpop.permute.xlu0 %1536 }
 0xff8   :  { %6181 = vpow2.f32 %v1519_v6  ;;  %v1521_v9 = vmul.f32 1.442695, %v1518_v7  ;;  %v1542_v10 = vsel %vm374_vm3, %v1537_v8, 0 }
 0xff9   :  { %v1586_v3 = vpop.permute.xlu1 %1585  ;;  %5651 = vmatpush3.bf16.msra.mxu0 %v1542_v10 }
 0xffa   :  { %6183 = vpow2.f32 %v1521_v9  ;;  %v1591_v11 = vsel %vm374_vm3, %v1586_v3, 0  ;;  %5662 = vmatprep.subr.bf16.mxu0 %v6521_v0 }
 0xffb   :  { %5657 = vmatpush3.bf16.msra.mxu1 %v1591_v11 }
 0xffc   :  { %5668 = vmatprep.subr.bf16.mxu1 %v6521_v0 }
0x1002   :  { %v6182_v4 = vpop.eup %6181 }
0x1003   :  { %v1523_v50 = vsel %vm249_vm2, %v6182_v4, 0.0 }
0x1004   :  { %v6184_v54 = vpop.eup %6183  ;;  %1524 = vadd.xlane.f32.xlu0 %v1523_v50 }
0x1005   :  { %v1526_v55 = vsel %vm249_vm2, %v6184_v54, 0.0 }
0x1006   :  { %1527 = vadd.xlane.f32.xlu1 %v1526_v55 }
0x1017   :  { %1636 = vrot.lane.b32.xlu1 %v7007_v36, %s6525_s14 }
0x101a   :  { %1687 = vrot.lane.b32.xlu0 %v7009_v37, %s6525_s14 }
0x101b   :  { %1634 = vrot.lane.b32.xlu1 %v7020_v48, %s6525_s14 }
0x101e   :  { %1685 = vrot.lane.b32.xlu0 %v7022_v49, %s6525_s14 }
0x1091   :  { %v1525_v12 = vpop.xlane.xlu0 %1524 }
0x1092   :  { %6185 = vrcp.f32 %v1525_v12 }
0x1093   :  { %v1528_v13 = vpop.xlane.xlu1 %1527 }
0x1094   :  { %6187 = vrcp.f32 %v1528_v13 }
0x1095   :  { %v1688_v14 = vpop.permute.xlu0 %1687 }
0x1096   :  { %v1693_v26 = vsel %vm249_vm2, %v1688_v14, 0 }
0x1097   :  { %v1637_v18 = vpop.permute.xlu1 %1636 }
0x1098   :  { %v1642_v24 = vsel %vm249_vm2, %v1637_v18, 0 }
0x1099   :  { %v1686_v30 = vpop.permute.xlu0 %1685 }
0x109b   :  { %v1635_v29 = vpop.permute.xlu1 %1634 }
0x109c   :  { %v6186_v15 = vpop.eup %6185 }
0x109d   :  { %v1531_v16 = vmul.f32 %v6186_v15, %v6182_v4 }
0x109e   :  { %v6188_v17 = vpop.eup %6187 }
0x109f   :  { %v1533_v19 = vpack.c.bf16 %v1531_v16, %v1531_v16  ;;  %v1532_v23 = vmul.f32 %v6188_v17, %v6184_v54 }
0x10a1   :  { %5653 = vmatmul.mubr.msk.bf16.vlgmr.msra.gmra.mrb[44].mxu0 %vm249_vm2, %v1533_v19  ;;  %v1534_v22 = vpack.c.bf16 %v1532_v23, %v1532_v23 }
0x10a2   :  { %5663 = vmatpush3.bf16.xpose.msra.mxu0 %v1642_v24  ;;  %5664 = vmatprep.mubr.msk.bf16.mxu0 %vm6522_vm0, %v6521_v0 }
0x10a3   :  { %5659 = vmatmul.mubr.msk.bf16.vlgmr.msra.gmra.mrb[44].mxu1 %vm249_vm2, %v1534_v22  ;;  %5674 = vmatprep.subr.bf16.mxu0 %v6521_v0 }
0x10a4   :  { %5669 = vmatpush3.bf16.xpose.msra.mxu1 %v1693_v26  ;;  %5670 = vmatprep.mubr.msk.bf16.mxu1 %vm6522_vm0, %v6521_v0 }
0x10a5   :  { %5680 = vmatprep.subr.bf16.mxu1 %v6521_v0 }
0x10a9   :  { %5665 = vmatmul.mubr.msk.bf16.vlgmr.msra.gmra.mrb[48].mxu0 %vm249_vm2, %v1635_v29 }
0x10aa   :  { %5676 = vmatprep.mubr.msk.bf16.mxu0 %vm6522_vm0, %v6521_v0 }
0x10ab   :  { %5671 = vmatmul.mubr.msk.bf16.vlgmr.msra.gmra.mrb[48].mxu1 %vm249_vm2, %v1686_v30 }
0x10ac   :  { %5682 = vmatprep.mubr.msk.bf16.mxu1 %vm6522_vm0, %v6521_v0 }
0x1174   :  { %v7068_v31 = vpop.f32.mrb[44].mxu0 }
0x1175   :  { %v5654_v32 = vpop.f32.mrb[45].mxu0 }
0x1176   :  { %v1581_v33 = vpop.f32.mrb[46].mxu0  ;;  %v7070_v34 = vpop.f32.mrb[44].mxu1 }
0x1177   :  { %v5655_v20 = vpop.f32.mrb[47].mxu0  ;;  %v5660_v35 = vpop.f32.mrb[45].mxu1 }
0x1178   :  { %v1630_v38 = vpop.f32.mrb[46].mxu1 }
0x1179   :  { %v5661_v39 = vpop.f32.mrb[47].mxu1 }
0x117c   :  { %v1678_v40 = vpop.f32.mrb[48].mxu0 }
0x117d   :  { %v5666_v41 = vpop.f32.mrb[49].mxu0  ;;  %v1735_v42 = vsel %vm249_vm2, %v1678_v40, -inf }
0x117e   :  { %v1729_v43 = vpop.f32.mrb[48].mxu1  ;;  %1736 = vmax.xlane.f32.xlu1 %v1735_v42  ;;  %v1681_v44 = vpop.f32.mrb[50].mxu0 }
0x117f   :  { %v5667_v45 = vpop.f32.mrb[51].mxu0  ;;  %v5672_v46 = vpop.f32.mrb[49].mxu1  ;;  %v1738_v47 = vsel %vm249_vm2, %v1729_v43, -inf }
0x1180   :  { %1739 = vmax.xlane.f32.xlu0 %v1738_v47  ;;  %v1732_v2 = vpop.f32.mrb[50].mxu1 }
0x1181   :  { %v5673_v51 = vpop.f32.mrb[51].mxu1 }
0x118f   :  { %1807 = vrot.lane.b32.xlu1 %v7009_v37, %s6524_s4 }
0x1196   :  { %1759 = vrot.lane.b32.xlu0 %v7007_v36, %s6524_s4 }
0x120b   :  { %v1737_v61 = vpop.xlane.xlu1 %1736 }
0x120c   :  { %v1741_v52 = vsub.f32 %v1678_v40, %v1737_v61 }
0x120d   :  { %v1740_v53 = vpop.xlane.xlu0 %1739 }
0x120e   :  { %v1743_v56 = vmul.f32 1.442695, %v1741_v52  ;;  %v1742_v57 = vsub.f32 %v1729_v43, %v1740_v53 }
0x120f   :  { %v1808_v58 = vpop.permute.xlu1 %1807 }
0x1210   :  { %6189 = vpow2.f32 %v1743_v56  ;;  %v1745_v59 = vmul.f32 1.442695, %v1742_v57  ;;  %v1813_v60 = vsel %vm374_vm3, %v1808_v58, 0 }
0x1211   :  { %v1760_v62 = vpop.permute.xlu0 %1759  ;;  %5681 = vmatpush3.bf16.msra.mxu1 %v1813_v60 }
0x1212   :  { %6191 = vpow2.f32 %v1745_v59  ;;  %v1765_v63 = vsel %vm374_vm3, %v1760_v62, 0  ;;  %5692 = vmatprep.subr.bf16.mxu1 %v6521_v0 }
0x1213   :  { %5675 = vmatpush3.bf16.msra.mxu0 %v1765_v63 }
0x1214   :  { %5686 = vmatprep.subr.bf16.mxu0 %v6521_v0 }
0x121a   :  { %v6190_v1 = vpop.eup %6189 }
0x121b   :  { %v1747_v5 = vsel %vm249_vm2, %v6190_v1, 0.0 }
0x121c   :  { %v6192_v6 = vpop.eup %6191  ;;  %1748 = vadd.xlane.f32.xlu0 %v1747_v5 }
0x121d   :  { %v1750_v7 = vsel %vm249_vm2, %v6192_v6, 0.0 }
0x121e   :  { %1751 = vadd.xlane.f32.xlu1 %v1750_v7 }
0x122f   :  { %1857 = vrot.lane.b32.xlu1 %v7007_v36, %s6528_s25 }
0x1232   :  { %1907 = vrot.lane.b32.xlu0 %v7009_v37, %s6528_s25 }
0x1233   :  { %1855 = vrot.lane.b32.xlu1 %v7020_v48, %s6528_s25 }
0x1236   :  { %1905 = vrot.lane.b32.xlu0 %v7022_v49, %s6528_s25 }
0x12a9   :  { %v1749_v8 = vpop.xlane.xlu0 %1748 }
0x12aa   :  { %6193 = vrcp.f32 %v1749_v8 }
0x12ab   :  { %v1752_v9 = vpop.xlane.xlu1 %1751 }
0x12ac   :  { %6195 = vrcp.f32 %v1752_v9 }
0x12ad   :  { %v1908_v55 = vpop.permute.xlu0 %1907 }
0x12ae   :  { %v1913_v15 = vsel %vm249_vm2, %v1908_v55, 0 }
0x12af   :  { %v1858_v4 = vpop.permute.xlu1 %1857 }
0x12b0   :  { %v1863_v12 = vsel %vm249_vm2, %v1858_v4, 0 }
0x12b1   :  { %v1906_v17 = vpop.permute.xlu0 %1905 }
0x12b3   :  { %v1856_v16 = vpop.permute.xlu1 %1855 }
0x12b4   :  { %v6194_v10 = vpop.eup %6193 }
0x12b5   :  { %v1755_v3 = vmul.f32 %v6194_v10, %v6190_v1 }
0x12b6   :  { %v6196_v11 = vpop.eup %6195 }
0x12b7   :  { %v1757_v50 = vpack.c.bf16 %v1755_v3, %v1755_v3  ;;  %v1756_v54 = vmul.f32 %v6196_v11, %v6192_v6 }
0x12b9   :  { %5677 = vmatmul.mubr.msk.bf16.vlgmr.msra.gmra.mrb[52].mxu0 %vm249_vm2, %v1757_v50  ;;  %v1758_v13 = vpack.c.bf16 %v1756_v54, %v1756_v54 }
0x12ba   :  { %5687 = vmatpush3.bf16.xpose.msra.mxu0 %v1863_v12  ;;  %5688 = vmatprep.mubr.msk.bf16.mxu0 %vm6522_vm0, %v6521_v0 }
0x12bb   :  { %5683 = vmatmul.mubr.msk.bf16.vlgmr.msra.gmra.mrb[52].mxu1 %vm249_vm2, %v1758_v13  ;;  %5698 = vmatprep.subr.bf16.mxu0 %v6521_v0 }
0x12bc   :  { %5693 = vmatpush3.bf16.xpose.msra.mxu1 %v1913_v15  ;;  %5694 = vmatprep.mubr.msk.bf16.mxu1 %vm6522_vm0, %v6521_v0 }
0x12bd   :  { %5704 = vmatprep.subr.bf16.mxu1 %v6521_v0 }
0x12c1   :  { %5689 = vmatmul.mubr.msk.bf16.vlgmr.msra.gmra.mrb[56].mxu0 %vm249_vm2, %v1856_v16 }
0x12c2   :  { %5700 = vmatprep.mubr.msk.bf16.mxu0 %vm6522_vm0, %v6521_v0 }
0x12c3   :  { %5695 = vmatmul.mubr.msk.bf16.vlgmr.msra.gmra.mrb[56].mxu1 %vm249_vm2, %v1906_v17 }
0x12c4   :  { %5706 = vmatprep.mubr.msk.bf16.mxu1 %vm6522_vm0, %v6521_v0 }
0x138c   :  { %v7108_v18 = vpop.f32.mrb[52].mxu0 }
0x138d   :  { %v5678_v19 = vpop.f32.mrb[53].mxu0 }
0x138e   :  { %v1804_v23 = vpop.f32.mrb[54].mxu0  ;;  %v7110_v14 = vpop.f32.mrb[52].mxu1 }
0x138f   :  { %v6065_v24 = vpack.i.bf16 %v7110_v14, %v7108_v18  ;;  %v5679_v22 = vpop.f32.mrb[55].mxu0  ;;  %v5684_v26 = vpop.f32.mrb[53].mxu1 }
0x1390   :  { %v1852_v29 = vpop.f32.mrb[54].mxu1 }
0x1391   :  { %v5685_v30 = vpop.f32.mrb[55].mxu1 }
0x1394   :  { %v1899_v32 = vpop.f32.mrb[56].mxu0 }
0x1395   :  { %v5690_v33 = vpop.f32.mrb[57].mxu0  ;;  %v1955_v20 = vsel %vm249_vm2, %v1899_v32, -inf }
0x1396   :  { %v1949_v35 = vpop.f32.mrb[56].mxu1  ;;  %1956 = vmax.xlane.f32.xlu1 %v1955_v20  ;;  %v1902_v38 = vpop.f32.mrb[58].mxu0 }
0x1397   :  { %v5691_v39 = vpop.f32.mrb[59].mxu0  ;;  %v5696_v40 = vpop.f32.mrb[57].mxu1  ;;  %v1958_v41 = vsel %vm249_vm2, %v1949_v35, -inf }
0x1398   :  { %1959 = vmax.xlane.f32.xlu0 %v1958_v41  ;;  %v1952_v42 = vpop.f32.mrb[58].mxu1 }
0x1399   :  { %v5697_v43 = vpop.f32.mrb[59].mxu1 }
0x13a7   :  { %2027 = vrot.lane.b32.xlu1 %v7009_v37, %s6527_s8 }
0x13ae   :  { %1979 = vrot.lane.b32.xlu0 %v7007_v36, %s6527_s8 }
0x1423   :  { %v1957_v44 = vpop.xlane.xlu1 %1956 }
0x1424   :  { %v1961_v45 = vsub.f32 %v1899_v32, %v1957_v44 }
0x1425   :  { %v1960_v46 = vpop.xlane.xlu0 %1959 }
0x1426   :  { %v1963_v47 = vmul.f32 1.442695, %v1961_v45  ;;  %v1962_v2 = vsub.f32 %v1949_v35, %v1960_v46 }
0x1427   :  { %v2028_v51 = vpop.permute.xlu1 %2027 }
0x1428   :  { %6197 = vpow2.f32 %v1963_v47  ;;  %v1965_v61 = vmul.f32 1.442695, %v1962_v2  ;;  %v2033_v52 = vsel %vm374_vm3, %v2028_v51, 0 }
0x1429   :  { %v1980_v53 = vpop.permute.xlu0 %1979  ;;  %5705 = vmatpush3.bf16.msra.mxu1 %v2033_v52 }
0x142a   :  { %6199 = vpow2.f32 %v1965_v61  ;;  %v1985_v56 = vsel %vm374_vm3, %v1980_v53, 0  ;;  %5716 = vmatprep.subr.bf16.mxu1 %v6521_v0 }
0x142b   :  { %5699 = vmatpush3.bf16.msra.mxu0 %v1985_v56 }
0x142c   :  { %5710 = vmatprep.subr.bf16.mxu0 %v6521_v0 }
0x1432   :  { %v6198_v57 = vpop.eup %6197 }
0x1433   :  { %v1967_v58 = vsel %vm249_vm2, %v6198_v57, 0.0 }
0x1434   :  { %v6200_v59 = vpop.eup %6199  ;;  %1968 = vadd.xlane.f32.xlu0 %v1967_v58 }
0x1435   :  { %v1970_v60 = vsel %vm249_vm2, %v6200_v59, 0.0 }
0x1436   :  { %1971 = vadd.xlane.f32.xlu1 %v1970_v60  ;;  %v6120_v60 = vld [vmem:[#allocation10 + $0x8] sm:$0xff]  }
0x1447   :  { %2077 = vrot.lane.b32.xlu1 %v7007_v36, %s6531_s2 }
0x144a   :  { %2127 = vrot.lane.b32.xlu0 %v7009_v37, %s6531_s2 }
0x144b   :  { %2075 = vrot.lane.b32.xlu1 %v7020_v48, %s6531_s2 }
0x144e   :  { %2125 = vrot.lane.b32.xlu0 %v7022_v49, %s6531_s2 }
0x14c1   :  { %v1969_v62 = vpop.xlane.xlu0 %1968 }
0x14c2   :  { %6201 = vrcp.f32 %v1969_v62 }
0x14c3   :  { %v1972_v63 = vpop.xlane.xlu1 %1971 }
0x14c4   :  { %6203 = vrcp.f32 %v1972_v63 }
0x14c5   :  { %v2128_v10 = vpop.permute.xlu0 %2127 }
0x14c6   :  { %v2133_v48 = vsel %vm249_vm2, %v2128_v10, 0 }
0x14c7   :  { %v2078_v7 = vpop.permute.xlu1 %2077 }
0x14c8   :  { %v2083_v3 = vsel %vm249_vm2, %v2078_v7, 0 }
0x14c9   :  { %v2126_v4 = vpop.permute.xlu0 %2125 }
0x14cb   :  { %v2076_v49 = vpop.permute.xlu1 %2075 }
0x14cc   :  { %v6202_v1 = vpop.eup %6201 }
0x14cd   :  { %v1975_v5 = vmul.f32 %v6202_v1, %v6198_v57 }
0x14ce   :  { %v6204_v6 = vpop.eup %6203 }
0x14cf   :  { %v1977_v8 = vpack.c.bf16 %v1975_v5, %v1975_v5  ;;  %v1976_v9 = vmul.f32 %v6204_v6, %v6200_v59  ;;  %v6119_v59 = vld [vmem:[#allocation10] sm:$0xff]  }
0x14d1   :  { %5701 = vmatmul.mubr.msk.bf16.vlgmr.msra.gmra.mrb[60].mxu0 %vm249_vm2, %v1977_v8  ;;  %v1978_v11 = vpack.c.bf16 %v1976_v9, %v1976_v9 }
0x14d2   :  { %5711 = vmatpush3.bf16.xpose.msra.mxu0 %v2083_v3  ;;  %5712 = vmatprep.mubr.msk.bf16.mxu0 %vm6522_vm0, %v6521_v0 }
0x14d3   :  { %5707 = vmatmul.mubr.msk.bf16.vlgmr.msra.gmra.mrb[60].mxu1 %vm249_vm2, %v1978_v11  ;;  %5722 = vmatprep.subr.bf16.mxu0 %v6521_v0 }
0x14d4   :  { %5717 = vmatpush3.bf16.xpose.msra.mxu1 %v2133_v48  ;;  %5718 = vmatprep.mubr.msk.bf16.mxu1 %vm6522_vm0, %v6521_v0 }
0x14d5   :  { %5728 = vmatprep.subr.bf16.mxu1 %v6521_v0 }
0x14d9   :  { %5713 = vmatmul.mubr.msk.bf16.vlgmr.msra.gmra.mrb[64].mxu0 %vm249_vm2, %v2076_v49 }
0x14da   :  { %5724 = vmatprep.mubr.msk.bf16.mxu0 %vm6522_vm0, %v6521_v0 }
0x14db   :  { %5719 = vmatmul.mubr.msk.bf16.vlgmr.msra.gmra.mrb[64].mxu1 %vm249_vm2, %v2126_v4 }
0x14dc   :  { %5730 = vmatprep.mubr.msk.bf16.mxu1 %vm6522_vm0, %v6521_v0 }
0x15a4   :  { %v2021_v50 = vpop.f32.mrb[60].mxu0 }
0x15a5   :  { %v5702_v54 = vpop.f32.mrb[61].mxu0 }
0x15a6   :  { %v2024_v55 = vpop.f32.mrb[62].mxu0  ;;  %v2069_v12 = vpop.f32.mrb[60].mxu1 }
0x15a7   :  { %v6070_v13 = vpack.i.bf16 %v2069_v12, %v2021_v50  ;;  %v5703_v15 = vpop.f32.mrb[63].mxu0  ;;  %v5708_v16 = vpop.f32.mrb[61].mxu1 }
0x15a8   :  { %v2072_v17 = vpop.f32.mrb[62].mxu1 }
0x15a9   :  { %v5709_v19 = vpop.f32.mrb[63].mxu1 }
0x15ac   :  { %v2119_v23 = vpop.f32.mrb[64].mxu0 }
0x15ad   :  { %v5714_v22 = vpop.f32.mrb[65].mxu0  ;;  %v2175_v26 = vsel %vm249_vm2, %v2119_v23, -inf }
0x15ae   :  { %v2169_v29 = vpop.f32.mrb[64].mxu1  ;;  %2176 = vmax.xlane.f32.xlu1 %v2175_v26  ;;  %v2122_v30 = vpop.f32.mrb[66].mxu0 }
0x15af   :  { %v5715_v32 = vpop.f32.mrb[67].mxu0  ;;  %v5720_v33 = vpop.f32.mrb[65].mxu1  ;;  %v2178_v20 = vsel %vm249_vm2, %v2169_v29, -inf }
0x15b0   :  { %2179 = vmax.xlane.f32.xlu0 %v2178_v20  ;;  %v2172_v35 = vpop.f32.mrb[66].mxu1 }
0x15b1   :  { %v5721_v38 = vpop.f32.mrb[67].mxu1 }
0x163b   :  { %v2177_v39 = vpop.xlane.xlu1 %2176 }
0x163c   :  { %v2181_v40 = vsub.f32 %v2119_v23, %v2177_v39 }
0x163d   :  { %v2180_v41 = vpop.xlane.xlu0 %2179 }
0x163e   :  { %v2183_v42 = vmul.f32 1.442695, %v2181_v40  ;;  %v2182_v43 = vsub.f32 %v2169_v29, %v2180_v41 }
0x1640   :  { %6205 = vpow2.f32 %v2183_v42  ;;  %v2185_v44 = vmul.f32 1.442695, %v2182_v43 }
0x1642   :  { %6207 = vpow2.f32 %v2185_v44 }
0x164a   :  { %v6206_v45 = vpop.eup %6205 }
0x164b   :  { %v2187_v46 = vsel %vm249_vm2, %v6206_v45, 0.0 }
0x164c   :  { %v6208_v47 = vpop.eup %6207  ;;  %2188 = vadd.xlane.f32.xlu0 %v2187_v46 }
0x164d   :  { %v2190_v2 = vsel %vm249_vm2, %v6208_v47, 0.0 }
0x164e   :  { %2191 = vadd.xlane.f32.xlu1 %v2190_v2 }
0x165f   :  { %2247 = vrot.lane.b32.xlu1 %v7009_v37, %s6530_s20 }
0x1662   :  { %2199 = vrot.lane.b32.xlu0 %v7007_v36, %s6530_s20 }
0x1663   :  { %6066 = vrot.lane.b32.xlu1 %v6065_v24, %s7805_s23 }
0x1666   :  { %6071 = vrot.lane.b32.xlu0 %v6070_v13, %s6517_s5 }
0x16d9   :  { %v2189_v51 = vpop.xlane.xlu0 %2188 }
0x16da   :  { %6209 = vrcp.f32 %v2189_v51  ;;  %v6121_v51 = vld [vmem:[#allocation11] sm:$0xff]  }
0x16db   :  { %v2192_v61 = vpop.xlane.xlu1 %2191 }
0x16dc   :  { %6211 = vrcp.f32 %v2192_v61  ;;  %v6123_v61 = vld [vmem:[%s7775_s16] sm:$0xff]  }
0x16dd   :  { %v2200_v52 = vpop.permute.xlu0 %2199 }
0x16de   :  { %v2205_v53 = vsel %vm374_vm3, %v2200_v52, 0  ;;  %v6124_v52 = vld [vmem:[%s7775_s16 + $0x8] sm:$0xff]  }
0x16df   :  { %5723 = vmatpush3.bf16.msra.mxu0 %v2205_v53  ;;  %v2248_v56 = vpop.permute.xlu1 %2247 }
0x16e0   :  { %v2253_v37 = vsel %vm374_vm3, %v2248_v56, 0  ;;  %5734 = vmatprep.subr.bf16.mxu0 %v6521_v0 }
0x16e1   :  { %5729 = vmatpush3.bf16.msra.mxu1 %v2253_v37  ;;  %v6072_v49 = vpop.permute.xlu0 %6071 }
0x16e2   :  { %5742 = vmatprep.subr.bf16.mxu1 %v6521_v0  ;;  %v6074_v54 = vunpack.i.h.bf16 %v6072_v49  ;;  %v6073_v55 = vunpack.i.l.bf16 %v6072_v49 }
0x16e3   :  { %v6067_v3 = vpop.permute.xlu1 %6066 }
0x16e4   :  { %v6210_v36 = vpop.eup %6209  ;;  %v6069_v11 = vunpack.i.h.bf16 %v6067_v3  ;;  %v6068_v48 = vunpack.i.l.bf16 %v6067_v3 }
0x16e5   :  { %v2195_v18 = vmul.f32 %v6210_v36, %v6206_v45 }
0x16e6   :  { %v6212_v14 = vpop.eup %6211  ;;  %v2320_v4 = vsel %vm249_vm2, %v7070_v34, %v6069_v11  ;;  %v2319_v50 = vsel %vm249_vm2, %v7068_v31, %v6068_v48  ;;  %v5224_v31 = vld [vmem:[%s7770_s11] ss:$0 sm:$0xff] }
0x16e7   :  { %v2197_v24 = vpack.c.bf16 %v2195_v18, %v2195_v18  ;;  %v2196_v57 = vmul.f32 %v6212_v14, %v6208_v47  ;;  %v2321_v16 = vsel %vm1154_vm4, %v2319_v50, %v6073_v55  ;;  %v2322_v17 = vsel %vm1154_vm4, %v2320_v4, %v6074_v54  ;;  %v5232_v55 = vld [vmem:[%s7776_s17] ss:$0 sm:$0xff] }
0x16e9   :  { %5725 = vmatmul.mubr.msk.bf16.vlgmr.msra.gmra.mrb[68].mxu0 %vm249_vm2, %v2197_v24  ;;  %v2198_v58 = vpack.c.bf16 %v2196_v57, %v2196_v57 }
0x16ea   :  { %5738 = vmatprep.mubr.msk.bf16.mxu0 %vm6522_vm0, %v6521_v0  ;;  %5735 = vmatpush3.bf16.msra.mxu0 %v6119_v59 }
0x16eb   :  { %5731 = vmatmul.mubr.msk.bf16.vlgmr.msra.gmra.mrb[68].mxu1 %vm249_vm2, %v2198_v58  ;;  %5736 = vmatprep.subr.bf16.mxu0 %v6521_v0 }
0x16ec   :  { %5746 = vmatprep.mubr.msk.bf16.mxu1 %vm6522_vm0, %v6521_v0  ;;  %5743 = vmatpush3.bf16.msra.mxu1 %v6121_v51 }
0x16ed   :  { %5744 = vmatprep.subr.bf16.mxu1 %v6521_v0 }
0x16ee   :  { %5737 = vmatpush3.bf16.msra.mxu0 %v6120_v60 }
0x16ef   :  { %5750 = vmatprep.subr.bf16.mxu0 %v6521_v0 }
0x17bc   :  { %v2241_v62 = vpop.f32.mrb[68].mxu0 }
0x17bd   :  { %v5726_v63 = vpop.f32.mrb[69].mxu0 }
0x17be   :  { %v2244_v1 = vpop.f32.mrb[70].mxu0  ;;  %v2289_v5 = vpop.f32.mrb[68].mxu1 }
0x17bf   :  { %v6075_v6 = vpack.i.bf16 %v2289_v5, %v2241_v62  ;;  %v5727_v7 = vpop.f32.mrb[71].mxu0  ;;  %v5732_v8 = vpop.f32.mrb[69].mxu1 }
0x17c0   :  { %v2292_v9 = vpop.f32.mrb[70].mxu1  ;;  %v6126_v7 = vld [vmem:[%s7775_s16 + $0x18] sm:$0xff]  }
0x17c1   :  { %v5733_v10 = vpop.f32.mrb[71].mxu1  ;;  %6076 = vrot.lane.b32.xlu1 %v6075_v6, %s6533_s26  ;;  %v6125_v6 = vld [vmem:[%s7775_s16 + $0x10] sm:$0xff]   ;;  %v5228_v8 = vld [vmem:[#allocation13] ss:$0 sm:$0xff] }
0x1833   :  { %v6077_v12 = vpop.permute.xlu1 %6076 }
0x1834   :  { %v6079_v13 = vunpack.i.h.bf16 %v6077_v12  ;;  %v6078_v15 = vunpack.i.l.bf16 %v6077_v12 }
0x1836   :  { %v2324_v19 = vsel %vm1157_vm5, %v2322_v17, %v6079_v13  ;;  %v2323_v23 = vsel %vm1157_vm5, %v2321_v16, %v6078_v15 }
0x1837   :  { %v2330_v22 = vpack.c.bf16 %v2324_v19, %v2323_v23 }
0x1839   :  { %5739 = vmatmul.mubr.msk.bf16.vlgmr.msra.gmra.mrb[72].mxu0 %vm195_vm1, %v2330_v22 }
0x183a   :  { %5758 = vmatprep.mubr.msk.bf16.mxu0 %vm6522_vm0, %v6521_v0  ;;  %5751 = vmatpush3.bf16.msra.mxu0 %v6123_v61 }
0x183b   :  { %5752 = vmatprep.subr.bf16.mxu0 %v6521_v0 }
0x183e   :  { %5753 = vmatpush3.bf16.msra.mxu0 %v6124_v52 }
0x183f   :  { %5754 = vmatprep.subr.bf16.mxu0 %v6521_v0 }
0x1842   :  { %5755 = vmatpush3.bf16.msra.mxu0 %v6125_v6 }
0x1843   :  { %5756 = vmatprep.subr.bf16.mxu0 %v6521_v0 }
0x1846   :  { %5757 = vmatpush3.bf16.msra.mxu0 %v6126_v7 }
0x1847   :  { %5776 = vmatprep.subr.bf16.mxu0 %v6521_v0 }
0x190c   :  { %v2386_v34 = vpop.f32.mrb[72].mxu0 }
0x190d   :  { %v2387_v26 = vadd.f32 %v5224_v31, %v2386_v34  ;;  %v5740_v29 = vpop.f32.mrb[73].mxu0 }
0x190e   :  { %v2389_v30 = vpop.f32.mrb[74].mxu0 }
0x190f   :  { %v2390_v32 = vadd.f32 %v5224_v31, %v2389_v30  ;;  %v5741_v33 = vpop.f32.mrb[75].mxu0  ;;  %v2393_v20 = vadd.f32 %v2387_v26, %v6994_v27 }
0x1911   :  { %v2395_v35 = vsel %vm195_vm1, %v2393_v20, 0.0  ;;  %v2394_v38 = vadd.f32 %v2390_v32, %v6997_v28  ;;  %v6122_v28 = vld [vmem:[#allocation11 + $0x8] sm:$0xff]  }
0x1912   :  { %2396 = vadd.xlane.f32.xlu0 %v2395_v35  ;;  %5745 = vmatpush3.bf16.msra.mxu1 %v6122_v28 }
0x1913   :  { %v2398_v39 = vsel %vm195_vm1, %v2394_v38, 0.0  ;;  %5762 = vmatprep.subr.bf16.mxu1 %v6521_v0 }
0x1914   :  { %2399 = vadd.xlane.f32.xlu1 %v2398_v39 }
0x199f   :  { %v2397_v40 = vpop.xlane.xlu0 %2396 }
0x19a0   :  { %v2401_v41 = vmul.f32 0.03125, %v2397_v40 }
0x19a1   :  { %v2400_v42 = vpop.xlane.xlu1 %2399 }
0x19a2   :  { %v2403_v43 = vsub.f32 %v2393_v20, %v2401_v41  ;;  %v2402_v44 = vmul.f32 0.03125, %v2400_v42  ;;  %v6127_v41 = vld [vmem:[%s7803_s30 + $0x10] sm:$0xff]   ;;  %v6128_v42 = vld [vmem:[%s7803_s30 + $0x18] sm:$0xff]  }
0x19a4   :  { %v2404_v45 = vsub.f32 %v2394_v38, %v2402_v44  ;;  %v2405_v46 = vmul.f32 %v2403_v43, %v2403_v43 }
0x19a6   :  { %v2407_v47 = vsel %vm195_vm1, %v2405_v46, 0.0  ;;  %v2406_v2 = vmul.f32 %v2404_v45, %v2404_v45 }
0x19a7   :  { %2408 = vadd.xlane.f32.xlu0 %v2407_v47 }
0x19a8   :  { %v2410_v27 = vsel %vm195_vm1, %v2406_v2, 0.0 }
0x19ab   :  { %2411 = vadd.xlane.f32.xlu0 %v2410_v27 }
0x1a34   :  { %v2409_v53 = vpop.xlane.xlu0 %2408 }
0x1a35   :  { %v2413_v56 = vmul.f32 0.03125, %v2409_v53 }
0x1a37   :  { %v2415_v37 = vadd.f32 1e-05, %v2413_v56 }
0x1a38   :  { %v2412_v36 = vpop.xlane.xlu0 %2411 }
0x1a39   :  { %6213 = vrsqrt.f32 %v2415_v37  ;;  %v2414_v18 = vmul.f32 0.03125, %v2412_v36 }
0x1a3b   :  { %v2416_v14 = vadd.f32 1e-05, %v2414_v18  ;;  %v5245_v18 = vld [vmem:[%s7804_s3 + $0x1] ss:$0 sm:$0xff] }
0x1a3d   :  { %6215 = vrsqrt.f32 %v2416_v14 }
0x1a43   :  { %v6214_v24 = vpop.eup %6213 }
0x1a44   :  { %v2419_v57 = vmul.f32 %v6214_v24, %v2403_v43 }
0x1a46   :  { %v2421_v59 = vmul.f32 %v6984_v21, %v2419_v57 }
0x1a47   :  { %v6216_v58 = vpop.eup %6215 }
0x1a48   :  { %v2420_v60 = vmul.f32 %v6216_v58, %v2404_v45  ;;  %v2423_v63 = vadd.f32 %v6990_v25, %v2421_v59 }
0x1a4a   :  { %v2422_v62 = vmul.f32 %v6984_v21, %v2420_v60 }
0x1a4c   :  { %v2424_v1 = vadd.f32 %v6990_v25, %v2422_v62 }
0x1a4e   :  { %v2430_v5 = vpack.c.bf16 %v2424_v1, %v2423_v63 }
0x1a50   :  { %5747 = vmatmul.mubr.msk.bf16.vlgmr.msra.gmra.mrb[72].mxu1 %vm195_vm1, %v2430_v5 }
0x1a51   :  { %5766 = vmatprep.mubr.msk.bf16.mxu1 %vm6522_vm0, %v6521_v0  ;;  %5763 = vmatpush3.bf16.msra.mxu1 %v6127_v41 }
0x1a52   :  { %5764 = vmatprep.subr.bf16.mxu1 %v6521_v0 }
0x1a55   :  { %5765 = vmatpush3.bf16.msra.mxu1 %v6128_v42 }
0x1a56   :  { %5770 = vmatprep.subr.bf16.mxu1 %v6521_v0 }
0x1b23   :  { %v2486_v9 = vpop.f32.mrb[72].mxu1 }
0x1b24   :  { %v2487_v10 = vadd.f32 %v5228_v8, %v2486_v9  ;;  %v5748_v3 = vpop.f32.mrb[73].mxu1 }
0x1b25   :  { %v2489_v11 = vpop.f32.mrb[74].mxu1 }
0x1b26   :  { %v2490_v48 = vadd.f32 %v5228_v8, %v2489_v11  ;;  %v5749_v49 = vpop.f32.mrb[75].mxu1  ;;  %v2493_v4 = vmax.f32 %v2487_v10, 0.0 }
0x1b28   :  { %v2494_v50 = vmax.f32 %v2490_v48, 0.0 }
0x1b2a   :  { %v2504_v54 = vpack.c.bf16 %v2494_v50, %v2493_v4 }
0x1b2c   :  { %5759 = vmatmul.mubr.msk.bf16.vlgmr.msra.gmra.mrb[76].mxu0 %vm2535_vm6, %v2504_v54 }
0x1b2d   :  { %5778 = vmatprep.mubr.msk.bf16.mxu0 %vm6522_vm0, %v6521_v0 }
0x1bff   :  { %v2573_v12 = vpop.f32.mrb[76].mxu0 }
0x1c00   :  { %v2574_v13 = vadd.f32 %v5232_v55, %v2573_v12  ;;  %v5760_v15 = vpop.f32.mrb[77].mxu0 }
0x1c01   :  { %v2576_v16 = vpop.f32.mrb[78].mxu0 }
0x1c02   :  { %v2577_v17 = vadd.f32 %v5232_v55, %v2576_v16  ;;  %v5761_v19 = vpop.f32.mrb[79].mxu0  ;;  %v2580_v23 = vadd.f32 %v2574_v13, %v2423_v63 }
0x1c04   :  { %v2582_v22 = vsel %vm195_vm1, %v2580_v23, 0.0  ;;  %v2581_v31 = vadd.f32 %v2577_v17, %v2424_v1 }
0x1c05   :  { %2583 = vadd.xlane.f32.xlu1 %v2582_v22 }
0x1c06   :  { %v2585_v34 = vsel %vm195_vm1, %v2581_v31, 0.0 }
0x1c07   :  { %2586 = vadd.xlane.f32.xlu0 %v2585_v34 }
0x1c92   :  { %v2584_v26 = vpop.xlane.xlu1 %2583 }
0x1c93   :  { %v2588_v29 = vmul.f32 0.03125, %v2584_v26 }
0x1c94   :  { %v2587_v30 = vpop.xlane.xlu0 %2586 }
0x1c95   :  { %v2590_v32 = vsub.f32 %v2580_v23, %v2588_v29  ;;  %v2589_v33 = vmul.f32 0.03125, %v2587_v30 }
0x1c97   :  { %v2591_v20 = vsub.f32 %v2581_v31, %v2589_v33  ;;  %v2592_v35 = vmul.f32 %v2590_v32, %v2590_v32 }
0x1c99   :  { %v2594_v38 = vsel %vm195_vm1, %v2592_v35, 0.0  ;;  %v2593_v39 = vmul.f32 %v2591_v20, %v2591_v20 }
0x1c9a   :  { %2595 = vadd.xlane.f32.xlu1 %v2594_v38 }
0x1c9b   :  { %v2597_v40 = vsel %vm195_vm1, %v2593_v39, 0.0 }
0x1c9c   :  { %2598 = vadd.xlane.f32.xlu0 %v2597_v40 }
0x1d27   :  { %v2596_v43 = vpop.xlane.xlu1 %2595 }
0x1d28   :  { %v2600_v44 = vmul.f32 0.03125, %v2596_v43 }
0x1d29   :  { %v2599_v45 = vpop.xlane.xlu0 %2598 }
0x1d2a   :  { %v2602_v46 = vadd.f32 1e-05, %v2600_v44  ;;  %v2601_v47 = vmul.f32 0.03125, %v2599_v45 }
0x1d2c   :  { %6217 = vrsqrt.f32 %v2602_v46  ;;  %v2603_v2 = vadd.f32 1e-05, %v2601_v47 }
0x1d2e   :  { %6219 = vrsqrt.f32 %v2603_v2 }
0x1d36   :  { %v6218_v27 = vpop.eup %6217 }
0x1d37   :  { %v2606_v51 = vmul.f32 %v6218_v27, %v2590_v32 }
0x1d38   :  { %v6220_v28 = vpop.eup %6219 }
0x1d39   :  { %v2608_v61 = vmul.f32 %v6984_v21, %v2606_v51  ;;  %v2607_v52 = vmul.f32 %v6220_v28, %v2591_v20 }
0x1d3b   :  { %v2609_v53 = vmul.f32 %v6984_v21, %v2607_v52  ;;  %v7242_v56 = vadd.f32 %v6990_v25, %v2608_v61 }
0x1d3d   :  { %v7245_v37 = vadd.f32 %v6990_v25, %v2609_v53 }
0x1d3f   :  { %v2623_v36 = vpack.c.bf16 %v7245_v37, %v7242_v56 }
0x1d41   :  { %5767 = vmatmul.mubr.msk.bf16.vlgmr.msra.gmra.mrb[76].mxu1 %vm195_vm1, %v2623_v36 }
0x1d42   :  { %5772 = vmatprep.mubr.msk.bf16.mxu1 %vm6522_vm0, %v6521_v0 }
0x1e14   :  { %v2679_v14 = vpop.f32.mrb[76].mxu1 }
0x1e15   :  { %v2680_v21 = vadd.f32 %v5245_v18, %v2679_v14  ;;  %v5768_v24 = vpop.f32.mrb[77].mxu1 }
0x1e16   :  { %v2682_v57 = vpop.f32.mrb[78].mxu1 }
0x1e17   :  { %v7255_v58 = vpack.c.bf16 %v2680_v21, %v2680_v21  ;;  %v2683_v25 = vadd.f32 %v5245_v18, %v2682_v57  ;;  %v5769_v59 = vpop.f32.mrb[79].mxu1  ;;  %v2686_v5 = vmul.f32 0.35355338, %v2680_v21 }
0x1e19   :  { %v7257_v60 = vpack.c.bf16 %v2683_v25, %v2683_v25  ;;  %2693 = vrot.lane.b32.xlu1 %v7255_v58, %s6523_s0  ;;  %v2687_v7 = vmul.f32 0.35355338, %v2683_v25  ;;  %v7267_v8 = vpack.c.bf16 %v2686_v5, %v2686_v5 }
0x1e1b   :  { %2742 = vrot.lane.b32.xlu0 %v7257_v60, %s6523_s0  ;;  %v7269_v9 = vpack.c.bf16 %v2687_v7, %v2687_v7 }
0x1e8b   :  { %v2694_v62 = vpop.permute.xlu1 %2693 }
0x1e8c   :  { %v2699_v63 = vsel %vm249_vm2, %v2694_v62, 0 }
0x1e8d   :  { %5771 = vmatpush3.bf16.xpose.msra.mxu1 %v2699_v63  ;;  %v2743_v1 = vpop.permute.xlu0 %2742 }
0x1e8e   :  { %v2748_v6 = vsel %vm249_vm2, %v2743_v1, 0  ;;  %5782 = vmatprep.subr.bf16.mxu1 %v6521_v0 }
0x1e8f   :  { %5777 = vmatpush3.bf16.xpose.msra.mxu0 %v2748_v6 }
0x1e90   :  { %5788 = vmatprep.subr.bf16.mxu0 %v6521_v0 }
0x1e94   :  { %5773 = vmatmul.mubr.msk.bf16.vlgmr.msra.gmra.mrb[80].mxu1 %vm249_vm2, %v7267_v8 }
0x1e95   :  { %5784 = vmatprep.mubr.msk.bf16.mxu1 %vm6522_vm0, %v6521_v0 }
0x1e96   :  { %5779 = vmatmul.mubr.msk.bf16.vlgmr.msra.gmra.mrb[80].mxu0 %vm249_vm2, %v7269_v9 }
0x1e97   :  { %5790 = vmatprep.mubr.msk.bf16.mxu0 %vm6522_vm0, %v6521_v0 }
0x1f67   :  { %v2735_v10 = vpop.f32.mrb[80].mxu1 }
0x1f68   :  { %v5774_v3 = vpop.f32.mrb[81].mxu1  ;;  %v2790_v11 = vsel %vm249_vm2, %v2735_v10, -inf }
0x1f69   :  { %2791 = vmax.xlane.f32.xlu1 %v2790_v11  ;;  %v2738_v48 = vpop.f32.mrb[82].mxu1  ;;  %v2784_v49 = vpop.f32.mrb[80].mxu0 }
0x1f6a   :  { %v5775_v4 = vpop.f32.mrb[83].mxu1  ;;  %v5780_v50 = vpop.f32.mrb[81].mxu0  ;;  %v2793_v54 = vsel %vm249_vm2, %v2784_v49, -inf }
0x1f6b   :  { %2794 = vmax.xlane.f32.xlu0 %v2793_v54  ;;  %v2787_v55 = vpop.f32.mrb[82].mxu0 }
0x1f6c   :  { %v5781_v12 = vpop.f32.mrb[83].mxu0 }
0x1f7a   :  { %2814 = vrot.lane.b32.xlu1 %v7255_v58, %s6509_s22 }
0x1ff6   :  { %v2792_v13 = vpop.xlane.xlu1 %2791 }
0x1ff7   :  { %v2796_v15 = vsub.f32 %v2735_v10, %v2792_v13 }
0x1ff8   :  { %v2795_v16 = vpop.xlane.xlu0 %2794 }
0x1ff9   :  { %v2798_v17 = vmul.f32 1.442695, %v2796_v15  ;;  %v2797_v19 = vsub.f32 %v2784_v49, %v2795_v16 }
0x1ffa   :  { %v2815_v23 = vpop.permute.xlu1 %2814 }
0x1ffb   :  { %6221 = vpow2.f32 %v2798_v17  ;;  %v2800_v22 = vmul.f32 1.442695, %v2797_v19  ;;  %v2820_v31 = vsel %vm374_vm3, %v2815_v23, 0 }
0x1ffc   :  { %5783 = vmatpush3.bf16.msra.mxu1 %v2820_v31 }
0x1ffd   :  { %6223 = vpow2.f32 %v2800_v22  ;;  %5794 = vmatprep.subr.bf16.mxu1 %v6521_v0 }
0x2005   :  { %v6222_v34 = vpop.eup %6221 }
0x2006   :  { %v2802_v26 = vsel %vm249_vm2, %v6222_v34, 0.0 }
0x2007   :  { %v6224_v29 = vpop.eup %6223  ;;  %2803 = vadd.xlane.f32.xlu1 %v2802_v26 }
0x2008   :  { %v2805_v30 = vsel %vm249_vm2, %v6224_v29, 0.0 }
0x2009   :  { %2806 = vadd.xlane.f32.xlu0 %v2805_v30 }
0x2018   :  { %2913 = vrot.lane.b32.xlu1 %v7255_v58, %s6524_s4 }
0x201c   :  { %2964 = vrot.lane.b32.xlu1 %v7257_v60, %s6524_s4 }
0x201f   :  { %2862 = vrot.lane.b32.xlu0 %v7257_v60, %s6509_s22 }
0x2020   :  { %2962 = vrot.lane.b32.xlu1 %v7269_v9, %s6525_s14 }
0x2023   :  { %2911 = vrot.lane.b32.xlu0 %v7267_v8, %s6525_s14 }
0x2094   :  { %v2804_v32 = vpop.xlane.xlu1 %2803 }
0x2095   :  { %6225 = vrcp.f32 %v2804_v32 }
0x2096   :  { %v2807_v33 = vpop.xlane.xlu0 %2806 }
0x2097   :  { %6227 = vrcp.f32 %v2807_v33 }
0x2098   :  { %v2914_v38 = vpop.permute.xlu1 %2913 }
0x2099   :  { %v2919_v45 = vsel %vm249_vm2, %v2914_v38, 0 }
0x209a   :  { %v2863_v20 = vpop.permute.xlu0 %2862 }
0x209b   :  { %v2868_v35 = vsel %vm374_vm3, %v2863_v20, 0 }
0x209c   :  { %5789 = vmatpush3.bf16.msra.mxu0 %v2868_v35  ;;  %v2965_v44 = vpop.permute.xlu1 %2964 }
0x209d   :  { %5800 = vmatprep.subr.bf16.mxu0 %v6521_v0  ;;  %v2970_v47 = vsel %vm249_vm2, %v2965_v44, 0 }
0x209e   :  { %v2912_v2 = vpop.permute.xlu0 %2911 }
0x209f   :  { %v6226_v39 = vpop.eup %6225 }
0x20a0   :  { %v2810_v40 = vmul.f32 %v6226_v39, %v6222_v34  ;;  %v2963_v27 = vpop.permute.xlu1 %2962 }
0x20a1   :  { %v6228_v41 = vpop.eup %6227 }
0x20a2   :  { %v2811_v42 = vmul.f32 %v6228_v41, %v6224_v29  ;;  %v2812_v43 = vpack.c.bf16 %v2810_v40, %v2810_v40 }
0x20a4   :  { %5785 = vmatmul.mubr.msk.bf16.vlgmr.msra.gmra.mrb[84].mxu1 %vm249_vm2, %v2812_v43  ;;  %v2813_v46 = vpack.c.bf16 %v2811_v42, %v2811_v42 }
0x20a5   :  { %5795 = vmatpush3.bf16.xpose.msra.mxu1 %v2919_v45  ;;  %5796 = vmatprep.mubr.msk.bf16.mxu1 %vm6522_vm0, %v6521_v0 }
0x20a6   :  { %5791 = vmatmul.mubr.msk.bf16.vlgmr.msra.gmra.mrb[84].mxu0 %vm249_vm2, %v2813_v46  ;;  %5806 = vmatprep.subr.bf16.mxu1 %v6521_v0 }
0x20a7   :  { %5801 = vmatpush3.bf16.xpose.msra.mxu0 %v2970_v47  ;;  %5802 = vmatprep.mubr.msk.bf16.mxu0 %vm6522_vm0, %v6521_v0 }
0x20a8   :  { %5812 = vmatprep.subr.bf16.mxu0 %v6521_v0 }
0x20ac   :  { %5797 = vmatmul.mubr.msk.bf16.vlgmr.msra.gmra.mrb[88].mxu1 %vm249_vm2, %v2912_v2 }
0x20ad   :  { %5808 = vmatprep.mubr.msk.bf16.mxu1 %vm6522_vm0, %v6521_v0 }
0x20ae   :  { %5803 = vmatmul.mubr.msk.bf16.vlgmr.msra.gmra.mrb[88].mxu0 %vm249_vm2, %v2963_v27 }
0x20af   :  { %5814 = vmatprep.mubr.msk.bf16.mxu0 %vm6522_vm0, %v6521_v0 }
0x2177   :  { %v7315_v51 = vpop.f32.mrb[84].mxu1 }
0x2178   :  { %v5786_v28 = vpop.f32.mrb[85].mxu1 }
0x2179   :  { %v2859_v61 = vpop.f32.mrb[86].mxu1  ;;  %v7317_v52 = vpop.f32.mrb[84].mxu0 }
0x217a   :  { %v5787_v53 = vpop.f32.mrb[87].mxu1  ;;  %v5792_v36 = vpop.f32.mrb[85].mxu0 }
0x217b   :  { %v2907_v18 = vpop.f32.mrb[86].mxu0 }
0x217c   :  { %v5793_v14 = vpop.f32.mrb[87].mxu0 }
0x217f   :  { %v2955_v21 = vpop.f32.mrb[88].mxu1 }
0x2180   :  { %v5798_v24 = vpop.f32.mrb[89].mxu1  ;;  %v3012_v57 = vsel %vm249_vm2, %v2955_v21, -inf }
0x2181   :  { %3013 = vmax.xlane.f32.xlu0 %v3012_v57  ;;  %v2958_v25 = vpop.f32.mrb[90].mxu1  ;;  %v3006_v59 = vpop.f32.mrb[88].mxu0 }
0x2182   :  { %v5799_v62 = vpop.f32.mrb[91].mxu1  ;;  %v5804_v63 = vpop.f32.mrb[89].mxu0  ;;  %v3015_v1 = vsel %vm249_vm2, %v3006_v59, -inf }
0x2183   :  { %3016 = vmax.xlane.f32.xlu1 %v3015_v1  ;;  %v3009_v5 = vpop.f32.mrb[90].mxu0 }
0x2184   :  { %v5805_v6 = vpop.f32.mrb[91].mxu0 }
0x2194   :  { %3036 = vrot.lane.b32.xlu1 %v7255_v58, %s6526_s28 }
0x2198   :  { %3134 = vrot.lane.b32.xlu1 %v7255_v58, %s6527_s8 }
0x219c   :  { %3184 = vrot.lane.b32.xlu1 %v7257_v60, %s6527_s8 }
0x21a0   :  { %3182 = vrot.lane.b32.xlu1 %v7269_v9, %s6528_s25 }
0x220e   :  { %v3014_v7 = vpop.xlane.xlu0 %3013 }
0x220f   :  { %v3018_v10 = vsub.f32 %v2955_v21, %v3014_v7 }
0x2210   :  { %v3017_v3 = vpop.xlane.xlu1 %3016 }
0x2211   :  { %v3020_v11 = vmul.f32 1.442695, %v3018_v10  ;;  %v3019_v48 = vsub.f32 %v3006_v59, %v3017_v3 }
0x2213   :  { %6229 = vpow2.f32 %v3020_v11  ;;  %v3022_v49 = vmul.f32 1.442695, %v3019_v48 }
0x2214   :  { %v3037_v4 = vpop.permute.xlu1 %3036 }
0x2215   :  { %6231 = vpow2.f32 %v3022_v49  ;;  %v3042_v50 = vsel %vm374_vm3, %v3037_v4, 0 }
0x2216   :  { %5807 = vmatpush3.bf16.msra.mxu1 %v3042_v50 }
0x2217   :  { %5818 = vmatprep.subr.bf16.mxu1 %v6521_v0 }
0x2218   :  { %v3135_v22 = vpop.permute.xlu1 %3134 }
0x2219   :  { %v3140_v29 = vsel %vm249_vm2, %v3135_v22, 0 }
0x221c   :  { %v3185_v32 = vpop.permute.xlu1 %3184 }
0x221d   :  { %v6230_v54 = vpop.eup %6229  ;;  %v3190_v20 = vsel %vm249_vm2, %v3185_v32, 0 }
0x221e   :  { %v3024_v55 = vsel %vm249_vm2, %v6230_v54, 0.0 }
0x221f   :  { %v6232_v12 = vpop.eup %6231  ;;  %3025 = vadd.xlane.f32.xlu0 %v3024_v55 }
0x2220   :  { %v3027_v13 = vsel %vm249_vm2, %v6232_v12, 0.0  ;;  %v3183_v38 = vpop.permute.xlu1 %3182 }
0x2223   :  { %3028 = vadd.xlane.f32.xlu0 %v3027_v13 }
0x2239   :  { %3084 = vrot.lane.b32.xlu0 %v7257_v60, %s6526_s28 }
0x223d   :  { %3132 = vrot.lane.b32.xlu0 %v7267_v8, %s6528_s25 }
0x22ac   :  { %v3026_v15 = vpop.xlane.xlu0 %3025 }
0x22ad   :  { %6233 = vrcp.f32 %v3026_v15 }
0x22b0   :  { %v3029_v16 = vpop.xlane.xlu0 %3028 }
0x22b1   :  { %6235 = vrcp.f32 %v3029_v16 }
0x22b4   :  { %v3085_v17 = vpop.permute.xlu0 %3084 }
0x22b5   :  { %v3090_v19 = vsel %vm374_vm3, %v3085_v17, 0 }
0x22b6   :  { %5813 = vmatpush3.bf16.msra.mxu0 %v3090_v19 }
0x22b7   :  { %v6234_v23 = vpop.eup %6233  ;;  %5824 = vmatprep.subr.bf16.mxu0 %v6521_v0 }
0x22b8   :  { %v3032_v31 = vmul.f32 %v6234_v23, %v6230_v54  ;;  %v3133_v35 = vpop.permute.xlu0 %3132 }
0x22ba   :  { %v3034_v34 = vpack.c.bf16 %v3032_v31, %v3032_v31 }
0x22bb   :  { %v6236_v26 = vpop.eup %6235 }
0x22bc   :  { %v3033_v30 = vmul.f32 %v6236_v26, %v6232_v12  ;;  %5809 = vmatmul.mubr.msk.bf16.vlgmr.msra.gmra.mrb[92].mxu1 %vm249_vm2, %v3034_v34 }
0x22bd   :  { %5819 = vmatpush3.bf16.xpose.msra.mxu1 %v3140_v29  ;;  %5820 = vmatprep.mubr.msk.bf16.mxu1 %vm6522_vm0, %v6521_v0 }
0x22be   :  { %v3035_v33 = vpack.c.bf16 %v3033_v30, %v3033_v30  ;;  %5830 = vmatprep.subr.bf16.mxu1 %v6521_v0 }
0x22c0   :  { %5815 = vmatmul.mubr.msk.bf16.vlgmr.msra.gmra.mrb[92].mxu0 %vm249_vm2, %v3035_v33 }
0x22c1   :  { %5825 = vmatpush3.bf16.xpose.msra.mxu0 %v3190_v20  ;;  %5826 = vmatprep.mubr.msk.bf16.mxu0 %vm6522_vm0, %v6521_v0 }
0x22c2   :  { %5836 = vmatprep.subr.bf16.mxu0 %v6521_v0 }
0x22c4   :  { %5821 = vmatmul.mubr.msk.bf16.vlgmr.msra.gmra.mrb[96].mxu1 %vm249_vm2, %v3133_v35 }
0x22c5   :  { %5832 = vmatprep.mubr.msk.bf16.mxu1 %vm6522_vm0, %v6521_v0 }
0x22c8   :  { %5827 = vmatmul.mubr.msk.bf16.vlgmr.msra.gmra.mrb[96].mxu0 %vm249_vm2, %v3183_v38 }
0x22c9   :  { %5838 = vmatprep.mubr.msk.bf16.mxu0 %vm6522_vm0, %v6521_v0 }
0x238f   :  { %v7355_v39 = vpop.f32.mrb[92].mxu1 }
0x2390   :  { %v5810_v40 = vpop.f32.mrb[93].mxu1 }
0x2391   :  { %v3081_v41 = vpop.f32.mrb[94].mxu1 }
0x2392   :  { %v5811_v42 = vpop.f32.mrb[95].mxu1 }
0x2393   :  { %v7357_v43 = vpop.f32.mrb[92].mxu0 }
0x2394   :  { %v6080_v44 = vpack.i.bf16 %v7357_v43, %v7355_v39  ;;  %v5816_v45 = vpop.f32.mrb[93].mxu0 }
0x2395   :  { %v3129_v46 = vpop.f32.mrb[94].mxu0 }
0x2396   :  { %v5817_v47 = vpop.f32.mrb[95].mxu0 }
0x2397   :  { %v3176_v2 = vpop.f32.mrb[96].mxu1 }
0x2398   :  { %v5822_v27 = vpop.f32.mrb[97].mxu1  ;;  %v3232_v28 = vsel %vm249_vm2, %v3176_v2, -inf }
0x2399   :  { %3233 = vmax.xlane.f32.xlu0 %v3232_v28  ;;  %v3179_v61 = vpop.f32.mrb[98].mxu1 }
0x239a   :  { %v5823_v53 = vpop.f32.mrb[99].mxu1 }
0x239b   :  { %v3226_v36 = vpop.f32.mrb[96].mxu0 }
0x239c   :  { %v5828_v18 = vpop.f32.mrb[97].mxu0  ;;  %v3235_v14 = vsel %vm249_vm2, %v3226_v36, -inf }
0x239d   :  { %3236 = vmax.xlane.f32.xlu1 %v3235_v14  ;;  %v3229_v21 = vpop.f32.mrb[98].mxu0 }
0x239e   :  { %v5829_v24 = vpop.f32.mrb[99].mxu0 }
0x23ae   :  { %3256 = vrot.lane.b32.xlu1 %v7255_v58, %s6529_s19 }
0x23b2   :  { %3354 = vrot.lane.b32.xlu1 %v7255_v58, %s6530_s20 }
0x23b6   :  { %3404 = vrot.lane.b32.xlu1 %v7257_v60, %s6530_s20 }
0x23ba   :  { %3402 = vrot.lane.b32.xlu1 %v7269_v9, %s6531_s2 }
0x2426   :  { %v3234_v57 = vpop.xlane.xlu0 %3233 }
0x2427   :  { %v3238_v25 = vsub.f32 %v3176_v2, %v3234_v57 }
0x2429   :  { %v3240_v59 = vmul.f32 1.442695, %v3238_v25 }
0x242a   :  { %v3237_v62 = vpop.xlane.xlu1 %3236 }
0x242b   :  { %6237 = vpow2.f32 %v3240_v59  ;;  %v3239_v63 = vsub.f32 %v3226_v36, %v3237_v62 }
0x242d   :  { %v3242_v1 = vmul.f32 1.442695, %v3239_v63 }
0x242e   :  { %v3257_v5 = vpop.permute.xlu1 %3256 }
0x242f   :  { %6239 = vpow2.f32 %v3242_v1  ;;  %v3262_v6 = vsel %vm374_vm3, %v3257_v5, 0 }
0x2430   :  { %5831 = vmatpush3.bf16.msra.mxu1 %v3262_v6 }
0x2431   :  { %5842 = vmatprep.subr.bf16.mxu1 %v6521_v0 }
0x2432   :  { %v3355_v54 = vpop.permute.xlu1 %3354 }
0x2433   :  { %v3360_v15 = vsel %vm249_vm2, %v3355_v54, 0 }
0x2435   :  { %v6238_v7 = vpop.eup %6237 }
0x2436   :  { %v3244_v10 = vsel %vm249_vm2, %v6238_v7, 0.0 }
0x2437   :  { %3245 = vadd.xlane.f32.xlu0 %v3244_v10 }
0x2439   :  { %v6240_v3 = vpop.eup %6239 }
0x243a   :  { %v3247_v9 = vsel %vm249_vm2, %v6240_v3, 0.0 }
0x243b   :  { %3248 = vadd.xlane.f32.xlu0 %v3247_v9  ;;  %v6130_v9 = vld [vmem:[%s7806_s24 + $0x18] sm:$0xff]  }
0x2451   :  { %3304 = vrot.lane.b32.xlu0 %v7257_v60, %s6529_s19 }
0x2455   :  { %3352 = vrot.lane.b32.xlu0 %v7267_v8, %s6531_s2  ;;  %v3405_v8 = vpop.permute.xlu1 %3404 }
0x2456   :  { %v3410_v19 = vsel %vm249_vm2, %v3405_v8, 0 }
0x2459   :  { %v3403_v22 = vpop.permute.xlu1 %3402 }
0x24c4   :  { %v3246_v11 = vpop.xlane.xlu0 %3245 }
0x24c5   :  { %6241 = vrcp.f32 %v3246_v11 }
0x24c8   :  { %v3249_v48 = vpop.xlane.xlu0 %3248 }
0x24c9   :  { %6243 = vrcp.f32 %v3249_v48 }
0x24cc   :  { %v3305_v49 = vpop.permute.xlu0 %3304 }
0x24cd   :  { %v3310_v4 = vsel %vm374_vm3, %v3305_v49, 0 }
0x24ce   :  { %5837 = vmatpush3.bf16.msra.mxu0 %v3310_v4 }
0x24cf   :  { %v6242_v50 = vpop.eup %6241  ;;  %5848 = vmatprep.subr.bf16.mxu0 %v6521_v0 }
0x24d0   :  { %v3252_v55 = vmul.f32 %v6242_v50, %v6238_v7  ;;  %v3353_v23 = vpop.permute.xlu0 %3352 }
0x24d2   :  { %v3254_v12 = vpack.c.bf16 %v3252_v55, %v3252_v55 }
0x24d3   :  { %v6244_v13 = vpop.eup %6243 }
0x24d4   :  { %v3253_v16 = vmul.f32 %v6244_v13, %v6240_v3  ;;  %5833 = vmatmul.mubr.msk.bf16.vlgmr.msra.gmra.mrb[100].mxu1 %vm249_vm2, %v3254_v12  ;;  %v6129_v3 = vld [vmem:[%s7806_s24 + $0x10] sm:$0xff]  }
0x24d5   :  { %5843 = vmatpush3.bf16.xpose.msra.mxu1 %v3360_v15  ;;  %5844 = vmatprep.mubr.msk.bf16.mxu1 %vm6522_vm0, %v6521_v0 }
0x24d6   :  { %v3255_v17 = vpack.c.bf16 %v3253_v16, %v3253_v16  ;;  %5854 = vmatprep.subr.bf16.mxu1 %v6521_v0 }
0x24d8   :  { %5839 = vmatmul.mubr.msk.bf16.vlgmr.msra.gmra.mrb[100].mxu0 %vm249_vm2, %v3255_v17 }
0x24d9   :  { %5849 = vmatpush3.bf16.xpose.msra.mxu0 %v3410_v19  ;;  %5850 = vmatprep.mubr.msk.bf16.mxu0 %vm6522_vm0, %v6521_v0 }
0x24da   :  { %5860 = vmatprep.subr.bf16.mxu0 %v6521_v0 }
0x24dc   :  { %5845 = vmatmul.mubr.msk.bf16.vlgmr.msra.gmra.mrb[104].mxu1 %vm249_vm2, %v3353_v23 }
0x24dd   :  { %5856 = vmatprep.mubr.msk.bf16.mxu1 %vm6522_vm0, %v6521_v0 }
0x24e0   :  { %5851 = vmatmul.mubr.msk.bf16.vlgmr.msra.gmra.mrb[104].mxu0 %vm249_vm2, %v3403_v22 }
0x24e1   :  { %5862 = vmatprep.mubr.msk.bf16.mxu0 %vm6522_vm0, %v6521_v0 }
0x25a7   :  { %v3298_v31 = vpop.f32.mrb[100].mxu1 }
0x25a8   :  { %v5834_v34 = vpop.f32.mrb[101].mxu1 }
0x25a9   :  { %v3301_v26 = vpop.f32.mrb[102].mxu1 }
0x25aa   :  { %v5835_v29 = vpop.f32.mrb[103].mxu1 }
0x25ab   :  { %v3346_v30 = vpop.f32.mrb[100].mxu0 }
0x25ac   :  { %v6085_v32 = vpack.i.bf16 %v3346_v30, %v3298_v31  ;;  %v5840_v33 = vpop.f32.mrb[101].mxu0 }
0x25ad   :  { %v3349_v20 = vpop.f32.mrb[102].mxu0 }
0x25ae   :  { %v5841_v35 = vpop.f32.mrb[103].mxu0 }
0x25af   :  { %v3396_v38 = vpop.f32.mrb[104].mxu1 }
0x25b0   :  { %v5846_v40 = vpop.f32.mrb[105].mxu1  ;;  %v3452_v41 = vsel %vm249_vm2, %v3396_v38, -inf }
0x25b1   :  { %3453 = vmax.xlane.f32.xlu0 %v3452_v41  ;;  %v3399_v42 = vpop.f32.mrb[106].mxu1 }
0x25b2   :  { %v5847_v45 = vpop.f32.mrb[107].mxu1 }
0x25b3   :  { %v3446_v46 = vpop.f32.mrb[104].mxu0 }
0x25b4   :  { %v5852_v47 = vpop.f32.mrb[105].mxu0  ;;  %v3455_v2 = vsel %vm249_vm2, %v3446_v46, -inf }
0x25b5   :  { %3456 = vmax.xlane.f32.xlu1 %v3455_v2  ;;  %v3449_v27 = vpop.f32.mrb[106].mxu0 }
0x25b6   :  { %v5853_v28 = vpop.f32.mrb[107].mxu0 }
0x25c6   :  { %3476 = vrot.lane.b32.xlu1 %v7255_v58, %s6532_s10 }
0x25ca   :  { %6081 = vrot.lane.b32.xlu1 %v6080_v44, %s7805_s23 }
0x25ce   :  { %6086 = vrot.lane.b32.xlu1 %v6085_v32, %s6517_s5 }
0x263e   :  { %v3454_v61 = vpop.xlane.xlu0 %3453 }
0x263f   :  { %v3458_v53 = vsub.f32 %v3396_v38, %v3454_v61 }
0x2641   :  { %v3460_v36 = vmul.f32 1.442695, %v3458_v53 }
0x2642   :  { %v3457_v18 = vpop.xlane.xlu1 %3456 }
0x2643   :  { %6245 = vpow2.f32 %v3460_v36  ;;  %v3459_v14 = vsub.f32 %v3446_v46, %v3457_v18 }
0x2645   :  { %v3462_v21 = vmul.f32 1.442695, %v3459_v14 }
0x2646   :  { %v3477_v24 = vpop.permute.xlu1 %3476 }
0x2647   :  { %6247 = vpow2.f32 %v3462_v21  ;;  %v3482_v57 = vsel %vm374_vm3, %v3477_v24, 0 }
0x2648   :  { %5855 = vmatpush3.bf16.msra.mxu1 %v3482_v57 }
0x2649   :  { %5866 = vmatprep.subr.bf16.mxu1 %v6521_v0 }
0x264a   :  { %v6082_v15 = vpop.permute.xlu1 %6081 }
0x264b   :  { %v6084_v8 = vunpack.i.h.bf16 %v6082_v15  ;;  %v6083_v17 = vunpack.i.l.bf16 %v6082_v15 }
0x264d   :  { %v6246_v58 = vpop.eup %6245  ;;  %v3597_v31 = vsel %vm249_vm2, %v7317_v52, %v6084_v8  ;;  %v3596_v34 = vsel %vm249_vm2, %v7315_v51, %v6083_v17  ;;  %v5269_v52 = vld [vmem:[#allocation7 + $0x1] ss:$0 sm:$0xff] }
0x264e   :  { %v3464_v39 = vsel %vm249_vm2, %v6246_v58, 0.0  ;;  %v6087_v16 = vpop.permute.xlu1 %6086 }
0x264f   :  { %3465 = vadd.xlane.f32.xlu0 %v3464_v39  ;;  %v6089_v19 = vunpack.i.h.bf16 %v6087_v16  ;;  %v6088_v23 = vunpack.i.l.bf16 %v6087_v16  ;;  %v6297_v39 = vld [vmem:[#allocation5] sm:$0xff]  }
0x2651   :  { %v6248_v43 = vpop.eup %6247  ;;  %v3598_v30 = vsel %vm1154_vm4, %v3596_v34, %v6088_v23  ;;  %v3599_v32 = vsel %vm1154_vm4, %v3597_v31, %v6089_v19  ;;  %v5280_v31 = vld [vmem:[%s7766_s7 + $0x1] ss:$0 sm:$0xff] }
0x2652   :  { %v3467_v44 = vsel %vm249_vm2, %v6248_v43, 0.0 }
0x2653   :  { %3468 = vadd.xlane.f32.xlu0 %v3467_v44  ;;  %v6134_v44 = vld [vmem:[%s7765_s6 + $0x18] sm:$0xff]  }
0x2669   :  { %3524 = vrot.lane.b32.xlu0 %v7257_v60, %s6532_s10 }
0x26dc   :  { %v3466_v25 = vpop.xlane.xlu0 %3465 }
0x26dd   :  { %6249 = vrcp.f32 %v3466_v25 }
0x26e0   :  { %v3469_v59 = vpop.xlane.xlu0 %3468 }
0x26e1   :  { %6251 = vrcp.f32 %v3469_v59 }
0x26e4   :  { %v3525_v62 = vpop.permute.xlu0 %3524 }
0x26e5   :  { %v3530_v63 = vsel %vm374_vm3, %v3525_v62, 0 }
0x26e6   :  { %5861 = vmatpush3.bf16.msra.mxu0 %v3530_v63 }
0x26e7   :  { %v6250_v1 = vpop.eup %6249  ;;  %5874 = vmatprep.subr.bf16.mxu0 %v6521_v0 }
0x26e8   :  { %v3472_v5 = vmul.f32 %v6250_v1, %v6246_v58  ;;  %v6132_v58 = vld [vmem:[#allocation8 + $0x18] sm:$0xff]  }
0x26ea   :  { %v3474_v6 = vpack.c.bf16 %v3472_v5, %v3472_v5 }
0x26eb   :  { %v6252_v7 = vpop.eup %6251 }
0x26ec   :  { %v3473_v10 = vmul.f32 %v6252_v7, %v6248_v43  ;;  %5857 = vmatmul.mubr.msk.bf16.vlgmr.msra.gmra.mrb[108].mxu1 %vm249_vm2, %v3474_v6  ;;  %v6133_v43 = vld [vmem:[%s7765_s6 + $0x10] sm:$0xff]   ;;  %v7462_v7 = vld [vmem:[%s7771_s12 + $0x1] ss:$0 sm:$0xff] }
0x26ed   :  { %5870 = vmatprep.mubr.msk.bf16.mxu1 %vm6522_vm0, %v6521_v0  ;;  %5867 = vmatpush3.bf16.msra.mxu1 %v6129_v3 }
0x26ee   :  { %v3475_v60 = vpack.c.bf16 %v3473_v10, %v3473_v10  ;;  %5868 = vmatprep.subr.bf16.mxu1 %v6521_v0 }
0x26f0   :  { %5863 = vmatmul.mubr.msk.bf16.vlgmr.msra.gmra.mrb[108].mxu0 %vm249_vm2, %v3475_v60 }
0x26f1   :  { %5878 = vmatprep.mubr.msk.bf16.mxu0 %vm6522_vm0, %v6521_v0  ;;  %5869 = vmatpush3.bf16.msra.mxu1 %v6130_v9 }
0x26f2   :  { %5882 = vmatprep.subr.bf16.mxu1 %v6521_v0  ;;  %5875 = vmatpush3.bf16.msra.mxu0 %v6133_v43 }
0x26f3   :  { %5876 = vmatprep.subr.bf16.mxu0 %v6521_v0 }
0x26f6   :  { %5877 = vmatpush3.bf16.msra.mxu0 %v6134_v44 }
0x26f7   :  { %5890 = vmatprep.subr.bf16.mxu0 %v6521_v0 }
0x27bf   :  { %v3518_v11 = vpop.f32.mrb[108].mxu1 }
0x27c0   :  { %v5858_v48 = vpop.f32.mrb[109].mxu1 }
0x27c1   :  { %v3521_v49 = vpop.f32.mrb[110].mxu1 }
0x27c2   :  { %v5859_v4 = vpop.f32.mrb[111].mxu1 }
0x27c3   :  { %v3566_v50 = vpop.f32.mrb[108].mxu0 }
0x27c4   :  { %v6090_v54 = vpack.i.bf16 %v3566_v50, %v3518_v11  ;;  %v5864_v55 = vpop.f32.mrb[109].mxu0  ;;  %v7468_v11 = vld [vmem:[%s7772_s13 + $0x1] ss:$0 sm:$0xff] }
0x27c5   :  { %v3569_v12 = vpop.f32.mrb[110].mxu0 }
0x27c6   :  { %6091 = vrot.lane.b32.xlu0 %v6090_v54, %s6533_s26  ;;  %v5865_v13 = vpop.f32.mrb[111].mxu0  ;;  %v5285_v54 = vld [vmem:[%s7768_s9 + $0x1] ss:$0 sm:$0xff] }
0x2838   :  { %v6092_v22 = vpop.permute.xlu0 %6091 }
0x2839   :  { %v6094_v26 = vunpack.i.h.bf16 %v6092_v22  ;;  %v6093_v29 = vunpack.i.l.bf16 %v6092_v22 }
0x283b   :  { %v3601_v33 = vsel %vm1157_vm5, %v3599_v32, %v6094_v26  ;;  %v3600_v20 = vsel %vm1157_vm5, %v3598_v30, %v6093_v29 }
0x283c   :  { %v3609_v35 = vpack.c.bf16 %v3601_v33, %v3600_v20 }
0x283e   :  { %5871 = vmatmul.mubr.msk.bf16.vlgmr.msra.gmra.mrb[112].mxu1 %vm195_vm1, %v3609_v35 }
0x283f   :  { %5886 = vmatprep.mubr.msk.bf16.mxu1 %vm6522_vm0, %v6521_v0 }
0x2911   :  { %v3665_v38 = vpop.f32.mrb[112].mxu1 }
0x2912   :  { %v3666_v40 = vadd.f32 %v5269_v52, %v3665_v38  ;;  %v5872_v51 = vpop.f32.mrb[113].mxu1 }
0x2913   :  { %v3668_v41 = vpop.f32.mrb[114].mxu1 }
0x2914   :  { %v3672_v42 = vadd.f32 %v3666_v40, %v7242_v56  ;;  %v3669_v45 = vadd.f32 %v5269_v52, %v3668_v41  ;;  %v5873_v46 = vpop.f32.mrb[115].mxu1 }
0x2916   :  { %v3673_v47 = vadd.f32 %v3669_v45, %v7245_v37  ;;  %v3674_v2 = vsel %vm195_vm1, %v3672_v42, 0.0  ;;  %v6131_v37 = vld [vmem:[#allocation8 + $0x10] sm:$0xff]  }
0x2917   :  { %3675 = vadd.xlane.f32.xlu1 %v3674_v2  ;;  %5883 = vmatpush3.bf16.msra.mxu1 %v6131_v37 }
0x2918   :  { %v3677_v27 = vsel %vm195_vm1, %v3673_v47, 0.0  ;;  %5884 = vmatprep.subr.bf16.mxu1 %v6521_v0 }
0x2919   :  { %3678 = vadd.xlane.f32.xlu0 %v3677_v27 }
0x291b   :  { %5885 = vmatpush3.bf16.msra.mxu1 %v6132_v58 }
0x291c   :  { %5896 = vmatprep.subr.bf16.mxu1 %v6521_v0 }
0x291e   :  { %5887 = vmatmul.mubr.msk.bf16.vlgmr.msra.gmra.mrb[116].mxu1 %vm195_vm1, %v6297_v39 }
0x291f   :  { %5898 = vmatprep.mubr.msk.bf16.mxu1 %vm6522_vm0, %v6521_v0 }
0x29a4   :  { %v3676_v28 = vpop.xlane.xlu1 %3675 }
0x29a5   :  { %v3680_v61 = vmul.f32 0.03125, %v3676_v28 }
0x29a6   :  { %v3679_v53 = vpop.xlane.xlu0 %3678 }
0x29a7   :  { %v3682_v36 = vsub.f32 %v3672_v42, %v3680_v61  ;;  %v3681_v18 = vmul.f32 0.03125, %v3679_v53 }
0x29a9   :  { %v3683_v14 = vsub.f32 %v3673_v47, %v3681_v18  ;;  %v3684_v21 = vmul.f32 %v3682_v36, %v3682_v36 }
0x29ab   :  { %v3686_v24 = vsel %vm195_vm1, %v3684_v21, 0.0  ;;  %v3685_v56 = vmul.f32 %v3683_v14, %v3683_v14 }
0x29ac   :  { %3687 = vadd.xlane.f32.xlu0 %v3686_v24 }
0x29ad   :  { %v3689_v57 = vsel %vm195_vm1, %v3685_v56, 0.0 }
0x29ae   :  { %3690 = vadd.xlane.f32.xlu1 %v3689_v57 }
0x29f1   :  { %v3847_v55 = vpop.f32.mrb[116].mxu1 }
0x29f2   :  { %v3848_v12 = vadd.f32 %v5285_v54, %v3847_v55  ;;  %v5888_v13 = vpop.f32.mrb[117].mxu1 }
0x29f3   :  { %v3850_v15 = vpop.f32.mrb[118].mxu1 }
0x29f4   :  { %v3851_v16 = vadd.f32 %v5285_v54, %v3850_v15  ;;  %v5889_v8 = vpop.f32.mrb[119].mxu1  ;;  %v7485_v17 = vpack.c.bf16 %v3848_v12, %v3848_v12 }
0x29f6   :  { %v7487_v19 = vpack.c.bf16 %v3851_v16, %v3851_v16  ;;  %v3862_v23 = vsel %vm249_vm2, %v7485_v17, 0 }
0x29f8   :  { %v3908_v22 = vsel %vm249_vm2, %v7487_v19, 0 }
0x29f9   :  { %5897 = vmatpush3.bf16.xpose.msra.mxu1 %v3908_v22 }
0x29fa   :  { %5908 = vmatprep.subr.bf16.mxu1 %v6521_v0 }
0x2a39   :  { %v3688_v25 = vpop.xlane.xlu0 %3687 }
0x2a3a   :  { %v3692_v59 = vmul.f32 0.03125, %v3688_v25 }
0x2a3b   :  { %v3691_v62 = vpop.xlane.xlu1 %3690 }
0x2a3c   :  { %v3694_v63 = vadd.f32 1e-05, %v3692_v59  ;;  %v3693_v1 = vmul.f32 0.03125, %v3691_v62 }
0x2a3e   :  { %6253 = vrsqrt.f32 %v3694_v63  ;;  %v3695_v5 = vadd.f32 1e-05, %v3693_v1 }
0x2a40   :  { %6255 = vrsqrt.f32 %v3695_v5 }
0x2a48   :  { %v6254_v6 = vpop.eup %6253 }
0x2a49   :  { %v3698_v10 = vmul.f32 %v6254_v6, %v3682_v36 }
0x2a4a   :  { %v6256_v60 = vpop.eup %6255 }
0x2a4b   :  { %v3706_v3 = vmul.f32 %v7462_v7, %v3698_v10  ;;  %v3699_v9 = vmul.f32 %v6256_v60, %v3683_v14 }
0x2a4d   :  { %v3707_v48 = vmul.f32 %v7462_v7, %v3699_v9  ;;  %v7472_v49 = vadd.f32 %v7468_v11, %v3706_v3 }
0x2a4f   :  { %v7475_v4 = vadd.f32 %v7468_v11, %v3707_v48 }
0x2a51   :  { %v3723_v50 = vpack.c.bf16 %v7475_v4, %v7472_v49 }
0x2a53   :  { %5879 = vmatmul.mubr.msk.bf16.vlgmr.msra.gmra.mrb[112].mxu0 %vm195_vm1, %v3723_v50 }
0x2a54   :  { %5892 = vmatprep.mubr.msk.bf16.mxu0 %vm6522_vm0, %v6521_v0  ;;  %5891 = vmatpush3.bf16.xpose.msra.mxu0 %v3862_v23 }
0x2a55   :  { %5902 = vmatprep.subr.bf16.mxu0 %v6521_v0 }
0x2b26   :  { %v3779_v34 = vpop.f32.mrb[112].mxu0 }
0x2b27   :  { %v3780_v26 = vadd.f32 %v5280_v31, %v3779_v34  ;;  %v5880_v29 = vpop.f32.mrb[113].mxu0 }
0x2b28   :  { %v3782_v30 = vpop.f32.mrb[114].mxu0 }
0x2b29   :  { %v3786_v32 = vmul.f32 0.35355338, %v3780_v26  ;;  %v3783_v33 = vadd.f32 %v5280_v31, %v3782_v30  ;;  %v5881_v20 = vpop.f32.mrb[115].mxu0 }
0x2b2b   :  { %v7498_v35 = vpack.c.bf16 %v3786_v32, %v3786_v32  ;;  %v3787_v52 = vmul.f32 0.35355338, %v3783_v33 }
0x2b2d   :  { %v7500_v38 = vpack.c.bf16 %v3787_v52, %v3787_v52  ;;  %5893 = vmatmul.mubr.msk.bf16.vlgmr.msra.gmra.mrb[116].mxu0 %vm249_vm2, %v7498_v35 }
0x2b2e   :  { %5904 = vmatprep.mubr.msk.bf16.mxu0 %vm6522_vm0, %v6521_v0 }
0x2b2f   :  { %5899 = vmatmul.mubr.msk.bf16.vlgmr.msra.gmra.mrb[120].mxu1 %vm249_vm2, %v7500_v38 }
0x2b30   :  { %5910 = vmatprep.mubr.msk.bf16.mxu1 %vm6522_vm0, %v6521_v0 }
0x2c00   :  { %v3898_v40 = vpop.f32.mrb[116].mxu0 }
0x2c01   :  { %v5894_v51 = vpop.f32.mrb[117].mxu0  ;;  %v3950_v41 = vsel %vm249_vm2, %v3898_v40, -inf }
0x2c02   :  { %v3944_v42 = vpop.f32.mrb[120].mxu1  ;;  %3951 = vmax.xlane.f32.xlu0 %v3950_v41  ;;  %v3901_v45 = vpop.f32.mrb[118].mxu0 }
0x2c03   :  { %v5895_v46 = vpop.f32.mrb[119].mxu0  ;;  %v5900_v47 = vpop.f32.mrb[121].mxu1  ;;  %v3953_v2 = vsel %vm249_vm2, %v3944_v42, -inf }
0x2c04   :  { %3954 = vmax.xlane.f32.xlu1 %v3953_v2  ;;  %v3947_v27 = vpop.f32.mrb[122].mxu1 }
0x2c05   :  { %v5901_v28 = vpop.f32.mrb[123].mxu1 }
0x2c15   :  { %4024 = vrot.lane.b32.xlu1 %v7487_v19, %s6523_s0 }
0x2c18   :  { %3975 = vrot.lane.b32.xlu0 %v7485_v17, %s6523_s0 }
0x2c8f   :  { %v3952_v61 = vpop.xlane.xlu0 %3951 }
0x2c90   :  { %v3956_v53 = vsub.f32 %v3898_v40, %v3952_v61 }
0x2c91   :  { %v3955_v36 = vpop.xlane.xlu1 %3954 }
0x2c92   :  { %v3958_v18 = vmul.f32 1.442695, %v3956_v53  ;;  %v3957_v14 = vsub.f32 %v3944_v42, %v3955_v36 }
0x2c93   :  { %v3976_v21 = vpop.permute.xlu0 %3975 }
0x2c94   :  { %6257 = vpow2.f32 %v3958_v18  ;;  %v3960_v24 = vmul.f32 1.442695, %v3957_v14  ;;  %v3981_v56 = vsel %vm374_vm3, %v3976_v21, 0 }
0x2c95   :  { %v4025_v57 = vpop.permute.xlu1 %4024  ;;  %5903 = vmatpush3.bf16.msra.mxu0 %v3981_v56 }
0x2c96   :  { %6259 = vpow2.f32 %v3960_v24  ;;  %v4030_v37 = vsel %vm374_vm3, %v4025_v57, 0  ;;  %5914 = vmatprep.subr.bf16.mxu0 %v6521_v0 }
0x2c97   :  { %5909 = vmatpush3.bf16.msra.mxu1 %v4030_v37 }
0x2c98   :  { %5920 = vmatprep.subr.bf16.mxu1 %v6521_v0 }
0x2c9e   :  { %v6258_v58 = vpop.eup %6257 }
0x2c9f   :  { %v3962_v39 = vsel %vm249_vm2, %v6258_v58, 0.0 }
0x2ca0   :  { %v6260_v43 = vpop.eup %6259  ;;  %3963 = vadd.xlane.f32.xlu0 %v3962_v39 }
0x2ca1   :  { %v3965_v44 = vsel %vm249_vm2, %v6260_v43, 0.0 }
0x2ca2   :  { %3966 = vadd.xlane.f32.xlu1 %v3965_v44 }
0x2cb3   :  { %4075 = vrot.lane.b32.xlu1 %v7485_v17, %s6525_s14 }
0x2cb6   :  { %4126 = vrot.lane.b32.xlu0 %v7487_v19, %s6525_s14 }
0x2cb7   :  { %4073 = vrot.lane.b32.xlu1 %v7498_v35, %s6525_s14 }
0x2cba   :  { %4124 = vrot.lane.b32.xlu0 %v7500_v38, %s6525_s14 }
0x2d2d   :  { %v3964_v25 = vpop.xlane.xlu0 %3963 }
0x2d2e   :  { %6261 = vrcp.f32 %v3964_v25 }
0x2d2f   :  { %v3967_v59 = vpop.xlane.xlu1 %3966 }
0x2d30   :  { %6263 = vrcp.f32 %v3967_v59 }
0x2d31   :  { %v4127_v60 = vpop.permute.xlu0 %4126 }
0x2d32   :  { %v4132_v48 = vsel %vm249_vm2, %v4127_v60, 0 }
0x2d33   :  { %v4076_v5 = vpop.permute.xlu1 %4075 }
0x2d34   :  { %v4081_v3 = vsel %vm249_vm2, %v4076_v5, 0 }
0x2d35   :  { %v4125_v54 = vpop.permute.xlu0 %4124 }
0x2d37   :  { %v4074_v50 = vpop.permute.xlu1 %4073 }
0x2d38   :  { %v6262_v62 = vpop.eup %6261 }
0x2d39   :  { %v3970_v63 = vmul.f32 %v6262_v62, %v6258_v58 }
0x2d3a   :  { %v6264_v1 = vpop.eup %6263 }
0x2d3b   :  { %5126 = vst.msk [vmem:[#allocation15] sm:$0xff] %vm249_vm2, %v3970_v63  ;;  %v3971_v6 = vmul.f32 %v6264_v1, %v6260_v43  ;;  %v3972_v10 = vpack.c.bf16 %v3970_v63, %v3970_v63 }
0x2d3d   :  { %5127 = vst.msk [vmem:[#allocation15 + $0x8] sm:$0xff] %vm249_vm2, %v3971_v6  ;;  %5905 = vmatmul.mubr.msk.bf16.vlgmr.msra.gmra.mrb[120].mxu0 %vm249_vm2, %v3972_v10  ;;  %v3973_v9 = vpack.c.bf16 %v3971_v6, %v3971_v6 }
0x2d3e   :  { %5915 = vmatpush3.bf16.xpose.msra.mxu0 %v4081_v3  ;;  %5916 = vmatprep.mubr.msk.bf16.mxu0 %vm6522_vm0, %v6521_v0 }
0x2d3f   :  { %5911 = vmatmul.mubr.msk.bf16.vlgmr.msra.gmra.mrb[124].mxu1 %vm249_vm2, %v3973_v9  ;;  %5926 = vmatprep.subr.bf16.mxu0 %v6521_v0 }
0x2d40   :  { %5921 = vmatpush3.bf16.xpose.msra.mxu1 %v4132_v48  ;;  %5922 = vmatprep.mubr.msk.bf16.mxu1 %vm6522_vm0, %v6521_v0 }
0x2d41   :  { %5932 = vmatprep.subr.bf16.mxu1 %v6521_v0 }
0x2d45   :  { %5917 = vmatmul.mubr.msk.bf16.vlgmr.msra.gmra.mrb[124].mxu0 %vm249_vm2, %v4074_v50 }
0x2d46   :  { %5928 = vmatprep.mubr.msk.bf16.mxu0 %vm6522_vm0, %v6521_v0 }
0x2d47   :  { %5923 = vmatmul.mubr.msk.bf16.vlgmr.msra.gmra.mrb[128].mxu1 %vm249_vm2, %v4125_v54 }
0x2d48   :  { %5934 = vmatprep.mubr.msk.bf16.mxu1 %vm6522_vm0, %v6521_v0 }
0x2e10   :  { %v7548_v55 = vpop.f32.mrb[120].mxu0 }
0x2e11   :  { %v5906_v12 = vpop.f32.mrb[121].mxu0 }
0x2e12   :  { %v4020_v13 = vpop.f32.mrb[122].mxu0  ;;  %v7550_v15 = vpop.f32.mrb[124].mxu1 }
0x2e13   :  { %v5907_v16 = vpop.f32.mrb[123].mxu0  ;;  %v5912_v8 = vpop.f32.mrb[125].mxu1 }
0x2e14   :  { %v4069_v23 = vpop.f32.mrb[126].mxu1 }
0x2e15   :  { %v5913_v22 = vpop.f32.mrb[127].mxu1 }
0x2e18   :  { %v4117_v31 = vpop.f32.mrb[124].mxu0 }
0x2e19   :  { %v5918_v34 = vpop.f32.mrb[125].mxu0  ;;  %v4174_v26 = vsel %vm249_vm2, %v4117_v31, -inf }
0x2e1a   :  { %v4168_v29 = vpop.f32.mrb[128].mxu1  ;;  %4175 = vmax.xlane.f32.xlu1 %v4174_v26  ;;  %v4120_v30 = vpop.f32.mrb[126].mxu0 }
0x2e1b   :  { %v5919_v32 = vpop.f32.mrb[127].mxu0  ;;  %v5924_v33 = vpop.f32.mrb[129].mxu1  ;;  %v4177_v20 = vsel %vm249_vm2, %v4168_v29, -inf }
0x2e1c   :  { %4178 = vmax.xlane.f32.xlu0 %v4177_v20  ;;  %v4171_v52 = vpop.f32.mrb[130].mxu1 }
0x2e1d   :  { %v5925_v40 = vpop.f32.mrb[131].mxu1 }
0x2e2b   :  { %4246 = vrot.lane.b32.xlu1 %v7487_v19, %s6524_s4 }
0x2e32   :  { %4198 = vrot.lane.b32.xlu0 %v7485_v17, %s6524_s4 }
0x2ea7   :  { %v4176_v51 = vpop.xlane.xlu1 %4175 }
0x2ea8   :  { %v4180_v41 = vsub.f32 %v4117_v31, %v4176_v51 }
0x2ea9   :  { %v4179_v42 = vpop.xlane.xlu0 %4178 }
0x2eaa   :  { %v4182_v45 = vmul.f32 1.442695, %v4180_v41  ;;  %v4181_v46 = vsub.f32 %v4168_v29, %v4179_v42 }
0x2eab   :  { %v4247_v47 = vpop.permute.xlu1 %4246 }
0x2eac   :  { %6265 = vpow2.f32 %v4182_v45  ;;  %v4184_v2 = vmul.f32 1.442695, %v4181_v46  ;;  %v4252_v27 = vsel %vm374_vm3, %v4247_v47, 0 }
0x2ead   :  { %v4199_v28 = vpop.permute.xlu0 %4198  ;;  %5933 = vmatpush3.bf16.msra.mxu1 %v4252_v27 }
0x2eae   :  { %6267 = vpow2.f32 %v4184_v2  ;;  %v4204_v61 = vsel %vm374_vm3, %v4199_v28, 0  ;;  %5944 = vmatprep.subr.bf16.mxu1 %v6521_v0 }
0x2eaf   :  { %5927 = vmatpush3.bf16.msra.mxu0 %v4204_v61 }
0x2eb0   :  { %5938 = vmatprep.subr.bf16.mxu0 %v6521_v0 }
0x2eb6   :  { %v6266_v53 = vpop.eup %6265 }
0x2eb7   :  { %v4186_v36 = vsel %vm249_vm2, %v6266_v53, 0.0 }
0x2eb8   :  { %v6268_v18 = vpop.eup %6267  ;;  %4187 = vadd.xlane.f32.xlu0 %v4186_v36 }
0x2eb9   :  { %v4189_v14 = vsel %vm249_vm2, %v6268_v18, 0.0 }
0x2eba   :  { %4190 = vadd.xlane.f32.xlu1 %v4189_v14 }
0x2ecb   :  { %4296 = vrot.lane.b32.xlu1 %v7485_v17, %s6528_s25 }
0x2ece   :  { %4346 = vrot.lane.b32.xlu0 %v7487_v19, %s6528_s25 }
0x2ecf   :  { %4294 = vrot.lane.b32.xlu1 %v7498_v35, %s6528_s25 }
0x2ed2   :  { %4344 = vrot.lane.b32.xlu0 %v7500_v38, %s6528_s25 }
0x2f45   :  { %v4188_v21 = vpop.xlane.xlu0 %4187 }
0x2f46   :  { %6269 = vrcp.f32 %v4188_v21 }
0x2f47   :  { %v4191_v24 = vpop.xlane.xlu1 %4190 }
0x2f48   :  { %6271 = vrcp.f32 %v4191_v24 }
0x2f49   :  { %v4347_v44 = vpop.permute.xlu0 %4346 }
0x2f4a   :  { %v4352_v62 = vsel %vm249_vm2, %v4347_v44, 0 }
0x2f4b   :  { %v4297_v58 = vpop.permute.xlu1 %4296 }
0x2f4c   :  { %v4302_v25 = vsel %vm249_vm2, %v4297_v58, 0 }
0x2f4d   :  { %v4345_v1 = vpop.permute.xlu0 %4344 }
0x2f4f   :  { %v4295_v63 = vpop.permute.xlu1 %4294 }
0x2f50   :  { %v6270_v56 = vpop.eup %6269 }
0x2f51   :  { %v4194_v57 = vmul.f32 %v6270_v56, %v6266_v53 }
0x2f52   :  { %v6272_v37 = vpop.eup %6271 }
0x2f53   :  { %5129 = vst.msk [vmem:[#allocation15 + $0x10] sm:$0xff] %vm249_vm2, %v4194_v57  ;;  %v4195_v39 = vmul.f32 %v6272_v37, %v6268_v18  ;;  %v4196_v43 = vpack.c.bf16 %v4194_v57, %v4194_v57 }
0x2f55   :  { %5130 = vst.msk [vmem:[#allocation15 + $0x18] sm:$0xff] %vm249_vm2, %v4195_v39  ;;  %5929 = vmatmul.mubr.msk.bf16.vlgmr.msra.gmra.mrb[128].mxu0 %vm249_vm2, %v4196_v43  ;;  %v4197_v59 = vpack.c.bf16 %v4195_v39, %v4195_v39 }
0x2f56   :  { %5939 = vmatpush3.bf16.xpose.msra.mxu0 %v4302_v25  ;;  %5940 = vmatprep.mubr.msk.bf16.mxu0 %vm6522_vm0, %v6521_v0 }
0x2f57   :  { %5935 = vmatmul.mubr.msk.bf16.vlgmr.msra.gmra.mrb[132].mxu1 %vm249_vm2, %v4197_v59  ;;  %5950 = vmatprep.subr.bf16.mxu0 %v6521_v0 }
0x2f58   :  { %5945 = vmatpush3.bf16.xpose.msra.mxu1 %v4352_v62  ;;  %5946 = vmatprep.mubr.msk.bf16.mxu1 %vm6522_vm0, %v6521_v0 }
0x2f59   :  { %5956 = vmatprep.subr.bf16.mxu1 %v6521_v0 }
0x2f5d   :  { %5941 = vmatmul.mubr.msk.bf16.vlgmr.msra.gmra.mrb[132].mxu0 %vm249_vm2, %v4295_v63 }
0x2f5e   :  { %5952 = vmatprep.mubr.msk.bf16.mxu0 %vm6522_vm0, %v6521_v0 }
0x2f5f   :  { %5947 = vmatmul.mubr.msk.bf16.vlgmr.msra.gmra.mrb[136].mxu1 %vm249_vm2, %v4345_v1 }
0x2f60   :  { %5958 = vmatprep.mubr.msk.bf16.mxu1 %vm6522_vm0, %v6521_v0 }
0x3028   :  { %v7590_v5 = vpop.f32.mrb[128].mxu0 }
0x3029   :  { %v5930_v6 = vpop.f32.mrb[129].mxu0 }
0x302a   :  { %v4243_v10 = vpop.f32.mrb[130].mxu0  ;;  %v7592_v60 = vpop.f32.mrb[132].mxu1 }
0x302b   :  { %v6095_v3 = vpack.i.bf16 %v7592_v60, %v7590_v5  ;;  %v5931_v9 = vpop.f32.mrb[131].mxu0  ;;  %v5936_v48 = vpop.f32.mrb[133].mxu1 }
0x302c   :  { %v4291_v50 = vpop.f32.mrb[134].mxu1 }
0x302d   :  { %v5937_v54 = vpop.f32.mrb[135].mxu1 }
0x3030   :  { %v4338_v12 = vpop.f32.mrb[132].mxu0 }
0x3031   :  { %v5942_v13 = vpop.f32.mrb[133].mxu0  ;;  %v4394_v16 = vsel %vm249_vm2, %v4338_v12, -inf }
0x3032   :  { %v4388_v8 = vpop.f32.mrb[136].mxu1  ;;  %4395 = vmax.xlane.f32.xlu1 %v4394_v16  ;;  %v4341_v23 = vpop.f32.mrb[134].mxu0 }
0x3033   :  { %v5943_v22 = vpop.f32.mrb[135].mxu0  ;;  %v5948_v31 = vpop.f32.mrb[137].mxu1  ;;  %v4397_v34 = vsel %vm249_vm2, %v4388_v8, -inf }
0x3034   :  { %4398 = vmax.xlane.f32.xlu0 %v4397_v34  ;;  %v4391_v26 = vpop.f32.mrb[138].mxu1 }
0x3035   :  { %v5949_v29 = vpop.f32.mrb[139].mxu1 }
0x3043   :  { %4466 = vrot.lane.b32.xlu1 %v7487_v19, %s6527_s8 }
0x304a   :  { %4418 = vrot.lane.b32.xlu0 %v7485_v17, %s6527_s8 }
0x30bf   :  { %v4396_v30 = vpop.xlane.xlu1 %4395 }
0x30c0   :  { %v4400_v32 = vsub.f32 %v4338_v12, %v4396_v30 }
0x30c1   :  { %v4399_v33 = vpop.xlane.xlu0 %4398 }
0x30c2   :  { %v4402_v20 = vmul.f32 1.442695, %v4400_v32  ;;  %v4401_v52 = vsub.f32 %v4388_v8, %v4399_v33 }
0x30c3   :  { %v4467_v40 = vpop.permute.xlu1 %4466 }
0x30c4   :  { %6273 = vpow2.f32 %v4402_v20  ;;  %v4404_v51 = vmul.f32 1.442695, %v4401_v52  ;;  %v4472_v41 = vsel %vm374_vm3, %v4467_v40, 0 }
0x30c5   :  { %v4419_v42 = vpop.permute.xlu0 %4418  ;;  %5957 = vmatpush3.bf16.msra.mxu1 %v4472_v41 }
0x30c6   :  { %6275 = vpow2.f32 %v4404_v51  ;;  %v4424_v45 = vsel %vm374_vm3, %v4419_v42, 0  ;;  %5968 = vmatprep.subr.bf16.mxu1 %v6521_v0 }
0x30c7   :  { %5951 = vmatpush3.bf16.msra.mxu0 %v4424_v45 }
0x30c8   :  { %5962 = vmatprep.subr.bf16.mxu0 %v6521_v0 }
0x30ce   :  { %v6274_v46 = vpop.eup %6273 }
0x30cf   :  { %v4406_v47 = vsel %vm249_vm2, %v6274_v46, 0.0 }
0x30d0   :  { %v6276_v2 = vpop.eup %6275  ;;  %4407 = vadd.xlane.f32.xlu0 %v4406_v47 }
0x30d1   :  { %v4409_v27 = vsel %vm249_vm2, %v6276_v2, 0.0 }
0x30d2   :  { %4410 = vadd.xlane.f32.xlu1 %v4409_v27  ;;  %v6136_v27 = vld [vmem:[#allocation10 + $0x18] sm:$0xff]  }
0x30e3   :  { %4516 = vrot.lane.b32.xlu1 %v7485_v17, %s6531_s2 }
0x30e6   :  { %4566 = vrot.lane.b32.xlu0 %v7487_v19, %s6531_s2 }
0x30e7   :  { %4514 = vrot.lane.b32.xlu1 %v7498_v35, %s6531_s2 }
0x30ea   :  { %4564 = vrot.lane.b32.xlu0 %v7500_v38, %s6531_s2 }
0x315d   :  { %v4408_v28 = vpop.xlane.xlu0 %4407 }
0x315e   :  { %6277 = vrcp.f32 %v4408_v28 }
0x315f   :  { %v4411_v61 = vpop.xlane.xlu1 %4410 }
0x3160   :  { %6279 = vrcp.f32 %v4411_v61 }
0x3161   :  { %v4567_v56 = vpop.permute.xlu0 %4566 }
0x3162   :  { %v4572_v57 = vsel %vm249_vm2, %v4567_v56, 0 }
0x3163   :  { %v4517_v14 = vpop.permute.xlu1 %4516 }
0x3164   :  { %v4522_v35 = vsel %vm249_vm2, %v4517_v14, 0 }
0x3165   :  { %v4565_v58 = vpop.permute.xlu0 %4564 }
0x3167   :  { %v4515_v37 = vpop.permute.xlu1 %4514 }
0x3168   :  { %v6278_v53 = vpop.eup %6277 }
0x3169   :  { %v4414_v36 = vmul.f32 %v6278_v53, %v6274_v46 }
0x316a   :  { %v6280_v18 = vpop.eup %6279 }
0x316b   :  { %5132 = vst.msk [vmem:[#allocation15 + $0x20] sm:$0xff] %vm249_vm2, %v4414_v36  ;;  %v4415_v21 = vmul.f32 %v6280_v18, %v6276_v2  ;;  %v4416_v24 = vpack.c.bf16 %v4414_v36, %v4414_v36  ;;  %v6135_v2 = vld [vmem:[#allocation10 + $0x10] sm:$0xff]  }
0x316d   :  { %5133 = vst.msk [vmem:[#allocation15 + $0x28] sm:$0xff] %vm249_vm2, %v4415_v21  ;;  %5953 = vmatmul.mubr.msk.bf16.vlgmr.msra.gmra.mrb[136].mxu0 %vm249_vm2, %v4416_v24  ;;  %v4417_v38 = vpack.c.bf16 %v4415_v21, %v4415_v21 }
0x316e   :  { %5963 = vmatpush3.bf16.xpose.msra.mxu0 %v4522_v35  ;;  %5964 = vmatprep.mubr.msk.bf16.mxu0 %vm6522_vm0, %v6521_v0 }
0x316f   :  { %5959 = vmatmul.mubr.msk.bf16.vlgmr.msra.gmra.mrb[140].mxu1 %vm249_vm2, %v4417_v38  ;;  %5974 = vmatprep.subr.bf16.mxu0 %v6521_v0 }
0x3170   :  { %5969 = vmatpush3.bf16.xpose.msra.mxu1 %v4572_v57  ;;  %5970 = vmatprep.mubr.msk.bf16.mxu1 %vm6522_vm0, %v6521_v0 }
0x3171   :  { %5980 = vmatprep.subr.bf16.mxu1 %v6521_v0 }
0x3175   :  { %5965 = vmatmul.mubr.msk.bf16.vlgmr.msra.gmra.mrb[140].mxu0 %vm249_vm2, %v4515_v37 }
0x3176   :  { %5976 = vmatprep.mubr.msk.bf16.mxu0 %vm6522_vm0, %v6521_v0 }
0x3177   :  { %5971 = vmatmul.mubr.msk.bf16.vlgmr.msra.gmra.mrb[144].mxu1 %vm249_vm2, %v4565_v58 }
0x3178   :  { %5982 = vmatprep.mubr.msk.bf16.mxu1 %vm6522_vm0, %v6521_v0 }
0x3240   :  { %v4460_v39 = vpop.f32.mrb[136].mxu0 }
0x3241   :  { %v5954_v43 = vpop.f32.mrb[137].mxu0 }
0x3242   :  { %v4463_v44 = vpop.f32.mrb[138].mxu0  ;;  %v4508_v25 = vpop.f32.mrb[140].mxu1 }
0x3243   :  { %v6100_v59 = vpack.i.bf16 %v4508_v25, %v4460_v39  ;;  %v5955_v62 = vpop.f32.mrb[139].mxu0  ;;  %v5960_v63 = vpop.f32.mrb[141].mxu1 }
0x3244   :  { %v4511_v1 = vpop.f32.mrb[142].mxu1 }
0x3245   :  { %v5961_v6 = vpop.f32.mrb[143].mxu1 }
0x3248   :  { %v4558_v10 = vpop.f32.mrb[140].mxu0 }
0x3249   :  { %v5966_v9 = vpop.f32.mrb[141].mxu0  ;;  %v4614_v48 = vsel %vm249_vm2, %v4558_v10, -inf }
0x324a   :  { %v4608_v50 = vpop.f32.mrb[144].mxu1  ;;  %4615 = vmax.xlane.f32.xlu1 %v4614_v48  ;;  %v4561_v54 = vpop.f32.mrb[142].mxu0 }
0x324b   :  { %v5967_v12 = vpop.f32.mrb[143].mxu0  ;;  %v5972_v13 = vpop.f32.mrb[145].mxu1  ;;  %v4617_v16 = vsel %vm249_vm2, %v4608_v50, -inf }
0x324c   :  { %4618 = vmax.xlane.f32.xlu0 %v4617_v16  ;;  %v4611_v8 = vpop.f32.mrb[146].mxu1 }
0x324d   :  { %v5973_v23 = vpop.f32.mrb[147].mxu1 }
0x32d7   :  { %v4616_v22 = vpop.xlane.xlu1 %4615 }
0x32d8   :  { %v4620_v31 = vsub.f32 %v4558_v10, %v4616_v22 }
0x32d9   :  { %v4619_v34 = vpop.xlane.xlu0 %4618 }
0x32da   :  { %v4622_v26 = vmul.f32 1.442695, %v4620_v31  ;;  %v4621_v29 = vsub.f32 %v4608_v50, %v4619_v34 }
0x32dc   :  { %6281 = vpow2.f32 %v4622_v26  ;;  %v4624_v30 = vmul.f32 1.442695, %v4621_v29 }
0x32de   :  { %6283 = vpow2.f32 %v4624_v30 }
0x32e6   :  { %v6282_v32 = vpop.eup %6281 }
0x32e7   :  { %v4626_v33 = vsel %vm249_vm2, %v6282_v32, 0.0 }
0x32e8   :  { %v6284_v20 = vpop.eup %6283  ;;  %4627 = vadd.xlane.f32.xlu0 %v4626_v33 }
0x32e9   :  { %v4629_v52 = vsel %vm249_vm2, %v6284_v20, 0.0 }
0x32ea   :  { %4630 = vadd.xlane.f32.xlu1 %v4629_v52 }
0x32fb   :  { %4686 = vrot.lane.b32.xlu1 %v7487_v19, %s6530_s20 }
0x32fe   :  { %4638 = vrot.lane.b32.xlu0 %v7485_v17, %s6530_s20 }
0x32ff   :  { %6096 = vrot.lane.b32.xlu1 %v6095_v3, %s7805_s23 }
0x3302   :  { %6101 = vrot.lane.b32.xlu0 %v6100_v59, %s6517_s5 }
0x3375   :  { %v4628_v40 = vpop.xlane.xlu0 %4627 }
0x3376   :  { %6285 = vrcp.f32 %v4628_v40  ;;  %v6138_v40 = vld [vmem:[#allocation11 + $0x18] sm:$0xff]  }
0x3377   :  { %v4631_v51 = vpop.xlane.xlu1 %4630 }
0x3378   :  { %6287 = vrcp.f32 %v4631_v51  ;;  %v6139_v51 = vld [vmem:[%s7775_s16 + $0x20] sm:$0xff]  }
0x3379   :  { %v4639_v41 = vpop.permute.xlu0 %4638 }
0x337a   :  { %v4644_v42 = vsel %vm374_vm3, %v4639_v41, 0  ;;  %v6140_v41 = vld [vmem:[%s7775_s16 + $0x28] sm:$0xff]  }
0x337b   :  { %5975 = vmatpush3.bf16.msra.mxu0 %v4644_v42  ;;  %v4687_v45 = vpop.permute.xlu1 %4686 }
0x337c   :  { %v4692_v19 = vsel %vm374_vm3, %v4687_v45, 0  ;;  %5986 = vmatprep.subr.bf16.mxu0 %v6521_v0 }
0x337d   :  { %5981 = vmatpush3.bf16.msra.mxu1 %v4692_v19  ;;  %v6102_v37 = vpop.permute.xlu0 %6101 }
0x337e   :  { %5994 = vmatprep.subr.bf16.mxu1 %v6521_v0  ;;  %v6104_v43 = vunpack.i.h.bf16 %v6102_v37  ;;  %v6103_v44 = vunpack.i.l.bf16 %v6102_v37 }
0x337f   :  { %v6097_v35 = vpop.permute.xlu1 %6096 }
0x3380   :  { %v6286_v17 = vpop.eup %6285  ;;  %v6099_v38 = vunpack.i.h.bf16 %v6097_v35  ;;  %v6098_v57 = vunpack.i.l.bf16 %v6097_v35 }
0x3381   :  { %v4634_v5 = vmul.f32 %v6286_v17, %v6282_v32 }
0x3382   :  { %v6288_v60 = vpop.eup %6287  ;;  %v4759_v58 = vsel %vm249_vm2, %v7550_v15, %v6099_v38  ;;  %v4758_v39 = vsel %vm249_vm2, %v7548_v55, %v6098_v57  ;;  %v5306_v55 = vld [vmem:[%s7770_s11 + $0x1] ss:$0 sm:$0xff] }
0x3383   :  { %5135 = vst.msk [vmem:[#allocation15 + $0x30] sm:$0xff] %vm249_vm2, %v4634_v5  ;;  %v4635_v3 = vmul.f32 %v6288_v60, %v6284_v20  ;;  %v4636_v46 = vpack.c.bf16 %v4634_v5, %v4634_v5  ;;  %v4760_v63 = vsel %vm1154_vm4, %v4758_v39, %v6103_v44  ;;  %v4761_v1 = vsel %vm1154_vm4, %v4759_v58, %v6104_v43  ;;  %v5323_v44 = vld [vmem:[%s7776_s17 + $0x1] ss:$0 sm:$0xff] }
0x3385   :  { %5136 = vst.msk [vmem:[#allocation15 + $0x38] sm:$0xff] %vm249_vm2, %v4635_v3  ;;  %5977 = vmatmul.mubr.msk.bf16.vlgmr.msra.gmra.mrb[144].mxu0 %vm249_vm2, %v4636_v46  ;;  %v4637_v47 = vpack.c.bf16 %v4635_v3, %v4635_v3 }
0x3386   :  { %5990 = vmatprep.mubr.msk.bf16.mxu0 %vm6522_vm0, %v6521_v0  ;;  %5987 = vmatpush3.bf16.msra.mxu0 %v6135_v2 }
0x3387   :  { %5983 = vmatmul.mubr.msk.bf16.vlgmr.msra.gmra.mrb[148].mxu1 %vm249_vm2, %v4637_v47  ;;  %5988 = vmatprep.subr.bf16.mxu0 %v6521_v0 }
0x3388   :  { %5998 = vmatprep.mubr.msk.bf16.mxu1 %vm6522_vm0, %v6521_v0 }
0x338a   :  { %5989 = vmatpush3.bf16.msra.mxu0 %v6136_v27 }
0x338b   :  { %6002 = vmatprep.subr.bf16.mxu0 %v6521_v0 }
0x3458   :  { %v4680_v28 = vpop.f32.mrb[144].mxu0 }
0x3459   :  { %v5978_v61 = vpop.f32.mrb[145].mxu0 }
0x345a   :  { %v4683_v53 = vpop.f32.mrb[146].mxu0  ;;  %v4728_v36 = vpop.f32.mrb[148].mxu1 }
0x345b   :  { %v6105_v18 = vpack.i.bf16 %v4728_v36, %v4680_v28  ;;  %v5979_v14 = vpop.f32.mrb[147].mxu0  ;;  %v5984_v21 = vpop.f32.mrb[149].mxu1 }
0x345c   :  { %v4731_v24 = vpop.f32.mrb[150].mxu1  ;;  %v6142_v14 = vld [vmem:[%s7775_s16 + $0x38] sm:$0xff]  }
0x345d   :  { %v5985_v56 = vpop.f32.mrb[151].mxu1  ;;  %6106 = vrot.lane.b32.xlu1 %v6105_v18, %s6533_s26  ;;  %v6141_v18 = vld [vmem:[%s7775_s16 + $0x30] sm:$0xff]   ;;  %v5310_v21 = vld [vmem:[#allocation13 + $0x1] ss:$0 sm:$0xff] }
0x34cf   :  { %v6107_v25 = vpop.permute.xlu1 %6106 }
0x34d0   :  { %v6109_v59 = vunpack.i.h.bf16 %v6107_v25  ;;  %v6108_v62 = vunpack.i.l.bf16 %v6107_v25 }
0x34d2   :  { %v4763_v6 = vsel %vm1157_vm5, %v4761_v1, %v6109_v59  ;;  %v4762_v10 = vsel %vm1157_vm5, %v4760_v63, %v6108_v62 }
0x34d3   :  { %v4771_v9 = vpack.c.bf16 %v4763_v6, %v4762_v10 }
0x34d5   :  { %5991 = vmatmul.mubr.msk.bf16.vlgmr.msra.gmra.mrb[148].mxu0 %vm195_vm1, %v4771_v9 }
0x34d6   :  { %6010 = vmatprep.mubr.msk.bf16.mxu0 %vm6522_vm0, %v6521_v0  ;;  %6003 = vmatpush3.bf16.msra.mxu0 %v6139_v51 }
0x34d7   :  { %6004 = vmatprep.subr.bf16.mxu0 %v6521_v0 }
0x34da   :  { %6005 = vmatpush3.bf16.msra.mxu0 %v6140_v41 }
0x34db   :  { %6006 = vmatprep.subr.bf16.mxu0 %v6521_v0 }
0x34de   :  { %6007 = vmatpush3.bf16.msra.mxu0 %v6141_v18 }
0x34df   :  { %6008 = vmatprep.subr.bf16.mxu0 %v6521_v0 }
0x34e2   :  { %6009 = vmatpush3.bf16.msra.mxu0 %v6142_v14 }
0x35a8   :  { %v4827_v15 = vpop.f32.mrb[148].mxu0 }
0x35a9   :  { %v4828_v48 = vadd.f32 %v5306_v55, %v4827_v15  ;;  %v5992_v50 = vpop.f32.mrb[149].mxu0 }
0x35aa   :  { %v4830_v54 = vpop.f32.mrb[150].mxu0 }
0x35ab   :  { %v4834_v12 = vadd.f32 %v4828_v48, %v7472_v49  ;;  %v4831_v13 = vadd.f32 %v5306_v55, %v4830_v54  ;;  %v5993_v16 = vpop.f32.mrb[151].mxu0 }
0x35ad   :  { %v4835_v8 = vadd.f32 %v4831_v13, %v7475_v4  ;;  %v4836_v23 = vsel %vm195_vm1, %v4834_v12, 0.0  ;;  %v6137_v4 = vld [vmem:[#allocation11 + $0x10] sm:$0xff]  }
0x35ae   :  { %4837 = vadd.xlane.f32.xlu0 %v4836_v23  ;;  %5995 = vmatpush3.bf16.msra.mxu1 %v6137_v4 }
0x35af   :  { %v4839_v22 = vsel %vm195_vm1, %v4835_v8, 0.0  ;;  %5996 = vmatprep.subr.bf16.mxu1 %v6521_v0 }
0x35b0   :  { %4840 = vadd.xlane.f32.xlu1 %v4839_v22 }
0x35b2   :  { %5997 = vmatpush3.bf16.msra.mxu1 %v6138_v40 }
0x35b3   :  { %6014 = vmatprep.subr.bf16.mxu1 %v6521_v0 }
0x363b   :  { %v4838_v31 = vpop.xlane.xlu0 %4837 }
0x363c   :  { %v4842_v34 = vmul.f32 0.03125, %v4838_v31 }
0x363d   :  { %v4841_v26 = vpop.xlane.xlu1 %4840 }
0x363e   :  { %v4844_v29 = vsub.f32 %v4834_v12, %v4842_v34  ;;  %v4843_v30 = vmul.f32 0.03125, %v4841_v26  ;;  %v6143_v34 = vld [vmem:[%s7777_s18] sm:$0xff]   ;;  %v6144_v26 = vld [vmem:[%s7777_s18 + $0x8] sm:$0xff]   ;;  %s6534_s18 = smov [#allocation15]  }
0x363f   :  { %s5154_s10 = sshll.u32 %s6534_s18, 4  ;;  %s5155_s10 = int_to_ptr.vmem [resolvable:$true] %s5154_s10 }
0x3640   :  { %v4845_v32 = vsub.f32 %v4835_v8, %v4843_v30  ;;  %v4846_v33 = vmul.f32 %v4844_v29, %v4844_v29  ;;  %s6452_s24 = scalar_lea.vmem %s5155_s10, 1024  ;;  %p6457_p1 = scmp.lt.s32.totalorder %s5155_s10, %s5155_s10 }
0x3641   :  { %p6453_p0 = scmp.ne.s32.totalorder %s5155_s10, %s6452_s24  ;;  %p6458_p2 = scmp.lt.s32.totalorder %s6452_s24, %s6452_s24 }
0x3642   :  { %v4848_v20 = vsel %vm195_vm1, %v4846_v33, 0.0  ;;  %v4847_v49 = vmul.f32 %v4845_v32, %v4845_v32 }
0x3643   :  { %4849 = vadd.xlane.f32.xlu0 %v4848_v20  ;;  %p6459_p3 = por %p6458_p2, %p6457_p1 }
0x3644   :  { %v4851_v52 = vsel %vm195_vm1, %v4847_v49, 0.0 }
0x3645   :  { %p6460_p4 = pnand %p6459_p3, %p6453_p0 }
0x3647   :  { %4852 = vadd.xlane.f32.xlu0 %v4851_v52 }
0x36d0   :  { %v4850_v42 = vpop.xlane.xlu0 %4849 }
0x36d1   :  { %v4854_v45 = vmul.f32 0.03125, %v4850_v42 }
0x36d3   :  { %v4856_v19 = vadd.f32 1e-05, %v4854_v45 }
0x36d4   :  { %v4853_v17 = vpop.xlane.xlu0 %4852 }
0x36d5   :  { %6289 = vrsqrt.f32 %v4856_v19  ;;  %v4855_v5 = vmul.f32 0.03125, %v4853_v17 }
0x36d7   :  { %v4857_v60 = vadd.f32 1e-05, %v4855_v5 }
0x36d9   :  { %6291 = vrsqrt.f32 %v4857_v60 }
0x36df   :  { %v6290_v3 = vpop.eup %6289 }
0x36e0   :  { %v4860_v46 = vmul.f32 %v6290_v3, %v4844_v29 }
0x36e2   :  { %v4862_v2 = vmul.f32 %v7462_v7, %v4860_v46 }
0x36e3   :  { %v6292_v47 = vpop.eup %6291 }
0x36e4   :  { %v4861_v27 = vmul.f32 %v6292_v47, %v4845_v32  ;;  %v4864_v61 = vadd.f32 %v7468_v11, %v4862_v2 }
0x36e6   :  { %v4863_v28 = vmul.f32 %v7462_v7, %v4861_v27 }
0x36e8   :  { %v4865_v53 = vadd.f32 %v7468_v11, %v4863_v28 }
0x36ea   :  { %v4873_v36 = vpack.c.bf16 %v4865_v53, %v4864_v61 }
0x36ec   :  { %5999 = vmatmul.mubr.msk.bf16.vlgmr.msra.gmra.mrb[152].mxu1 %vm195_vm1, %v4873_v36 }
0x36ed   :  { %6018 = vmatprep.mubr.msk.bf16.mxu1 %vm6522_vm0, %v6521_v0  ;;  %6015 = vmatpush3.bf16.msra.mxu1 %v6143_v34 }
0x36ee   :  { %6016 = vmatprep.subr.bf16.mxu1 %v6521_v0 }
0x36f1   :  { %6017 = vmatpush3.bf16.msra.mxu1 %v6144_v26 }
0x37bf   :  { %v4929_v24 = vpop.f32.mrb[152].mxu1 }
0x37c0   :  { %v4930_v56 = vadd.f32 %v5310_v21, %v4929_v24  ;;  %v6000_v35 = vpop.f32.mrb[153].mxu1 }
0x37c1   :  { %v4932_v38 = vpop.f32.mrb[154].mxu1 }
0x37c2   :  { %v4933_v57 = vadd.f32 %v5310_v21, %v4932_v38  ;;  %v6001_v37 = vpop.f32.mrb[155].mxu1  ;;  %v4936_v58 = vmax.f32 %v4930_v56, 0.0 }
0x37c4   :  { %v4937_v39 = vmax.f32 %v4933_v57, 0.0 }
0x37c6   :  { %v4949_v43 = vpack.c.bf16 %v4937_v39, %v4936_v58 }
0x37c8   :  { %6011 = vmatmul.mubr.msk.bf16.vlgmr.msra.gmra.mrb[152].mxu0 %vm2535_vm6, %v4949_v43 }
0x389b   :  { %v5017_v25 = vpop.f32.mrb[152].mxu0 }
0x389c   :  { %v5018_v59 = vadd.f32 %v5323_v44, %v5017_v25  ;;  %v6012_v62 = vpop.f32.mrb[153].mxu0 }
0x389d   :  { %v5020_v63 = vpop.f32.mrb[154].mxu0 }
0x389e   :  { %v5024_v1 = vadd.f32 %v5018_v59, %v4864_v61  ;;  %v5021_v6 = vadd.f32 %v5323_v44, %v5020_v63  ;;  %v6013_v10 = vpop.f32.mrb[155].mxu0 }
0x38a0   :  { %v5025_v9 = vadd.f32 %v5021_v6, %v4865_v53  ;;  %v5026_v55 = vsel %vm195_vm1, %v5024_v1, 0.0 }
0x38a1   :  { %5027 = vadd.xlane.f32.xlu1 %v5026_v55 }
0x38a2   :  { %v5029_v15 = vsel %vm195_vm1, %v5025_v9, 0.0 }
0x38a3   :  { %5030 = vadd.xlane.f32.xlu0 %v5029_v15 }
0x392e   :  { %v5028_v48 = vpop.xlane.xlu1 %5027 }
0x392f   :  { %v5032_v50 = vmul.f32 0.03125, %v5028_v48 }
0x3930   :  { %v5031_v54 = vpop.xlane.xlu0 %5030 }
0x3931   :  { %v5034_v12 = vsub.f32 %v5024_v1, %v5032_v50  ;;  %v5033_v13 = vmul.f32 0.03125, %v5031_v54 }
0x3933   :  { %v5035_v16 = vsub.f32 %v5025_v9, %v5033_v13  ;;  %v5036_v8 = vmul.f32 %v5034_v12, %v5034_v12 }
0x3935   :  { %v5038_v23 = vsel %vm195_vm1, %v5036_v8, 0.0  ;;  %v5037_v22 = vmul.f32 %v5035_v16, %v5035_v16 }
0x3936   :  { %5039 = vadd.xlane.f32.xlu1 %v5038_v23 }
0x3937   :  { %v5041_v31 = vsel %vm195_vm1, %v5037_v22, 0.0 }
0x3938   :  { %5042 = vadd.xlane.f32.xlu0 %v5041_v31 }
0x39c3   :  { %v5040_v29 = vpop.xlane.xlu1 %5039 }
0x39c4   :  { %v5044_v30 = vmul.f32 0.03125, %v5040_v29 }
0x39c5   :  { %v5043_v32 = vpop.xlane.xlu0 %5042 }
0x39c6   :  { %v5046_v33 = vadd.f32 1e-05, %v5044_v30  ;;  %v5045_v20 = vmul.f32 0.03125, %v5043_v32 }
0x39c8   :  { %6293 = vrsqrt.f32 %v5046_v33  ;;  %v5047_v49 = vadd.f32 1e-05, %v5045_v20 }
0x39ca   :  { %6295 = vrsqrt.f32 %v5047_v49 }
0x39d2   :  { %v6294_v52 = vpop.eup %6293 }
0x39d3   :  { %v5050_v4 = vmul.f32 %v6294_v52, %v5034_v12 }
0x39d4   :  { %v6296_v40 = vpop.eup %6295 }
0x39d5   :  { %v5052_v51 = vmul.f32 %v7462_v7, %v5050_v4  ;;  %v5051_v41 = vmul.f32 %v6296_v40, %v5035_v16 }
0x39d7   :  { %v5053_v42 = vmul.f32 %v7462_v7, %v5051_v41  ;;  %v5054_v45 = vadd.f32 %v7468_v11, %v5052_v51 }
0x39d9   :  { %v5055_v0 = vadd.f32 %v7468_v11, %v5053_v42 }
0x39db   :  { %v5061_v19 = vpack.c.bf16 %v5055_v0, %v5054_v45 }
0x39dd   :  { %6019 = vmatmul.mubr.msk.bf16.vlgmr.msra.gmra.mrb[156].mxu1 %vm195_vm1, %v5061_v19 }
0x39de   :  { %6463 = shalt.err (!%p6460_p4)
}
0x39df   :  { %s6464_s29 = scalar_lea.hbm %s7780_s21, 1024 }
0x39e0   :  { %p6465_p5 = scmp.ne.s32.totalorder %s7780_s21, %s6464_s29  ;;  %p6468_p6 = scmp.lt.u32.totalorder %s6464_s29, %s7780_s21 }
0x39e2   :  { %p6470_p7 = pnand %p6468_p6, %p6465_p5 }
0x39e4   :  { %6473 = shalt.err (!%p6470_p7)
}
0x39e5   :  { %s7807_s22 = smov 128   ;;  %s7808_s11 = sld [smem:[#allocation29_spill]] }
0x39e6   :  { %5160 = dma.vmem_to_hbm [thread:$0]  %s5155_s10, 1024, %s7780_s21, [#allocation16], %s7807_s22, %s7807_s22, %s7805_s23  }
0x39e7   :  { %s6535_s0 = smov [#allocation14]  }
0x39e8   :  { %s5142_s4 = sshll.u32 %s6535_s0, 4  ;;  %s5143_s4 = int_to_ptr.vmem [resolvable:$true] %s5142_s4 }
0x39e9   :  { %s6474_s14 = scalar_lea.vmem %s5143_s4, 256  ;;  %p6479_p9 = scmp.lt.s32.totalorder %s5143_s4, %s5143_s4 }
0x39ea   :  { %p6475_p8 = scmp.ne.s32.totalorder %s5143_s4, %s6474_s14  ;;  %p6480_p10 = scmp.lt.s32.totalorder %s6474_s14, %s6474_s14 }
0x39eb   :  { %v5329_v7 = vld [vmem:[%s7808_s11] ss:$0 sm:$0xff] }
0x39ec   :  { %p6481_p11 = por %p6480_p10, %p6479_p9 }
0x39ee   :  { %p6482_p12 = pnand %p6481_p11, %p6475_p8 }
0x3ab0   :  { %v5117_v11 = vpop.f32.mrb[156].mxu1 }
0x3ab1   :  { %v5118_v17 = vadd.f32 %v5329_v7, %v5117_v11  ;;  %v6020_v5 = vpop.f32.mrb[157].mxu1 }
0x3ab2   :  { %v5120_v60 = vpop.f32.mrb[158].mxu1 }
0x3ab3   :  { %5124 = vst [vmem:[#allocation14] sm:$0xff] %v5118_v17  ;;  %v5121_v3 = vadd.f32 %v5329_v7, %v5120_v60  ;;  %v6021_v46 = vpop.f32.mrb[159].mxu1 }
0x3ab5   :  { %5125 = vst [vmem:[#allocation14 + $0x8] sm:$0xff] %v5121_v3 }
0x3ab6   :  { %6485 = shalt.err (!%p6482_p12)
}
0x3ab7   :  { %s7809_s25 = sld [smem:[#allocation30_spill]] }
0x3abd   :  { %s6486_s20 = scalar_lea.hbm %s7809_s25, 256 }
0x3abe   :  { %p6487_p13 = scmp.ne.s32.totalorder %s7809_s25, %s6486_s20  ;;  %p6490_p0 = scmp.lt.u32.totalorder %s6486_s20, %s7809_s25 }
0x3ac0   :  { %p6492_p1 = pnand %p6490_p0, %p6487_p13 }
0x3ac2   :  { %6495 = shalt.err (!%p6492_p1)
}
0x3ac3   :  { %5148 = dma.vmem_to_hbm [thread:$0]  %s5143_s4, 256, %s7809_s25, [#allocation4], %s7807_s22, %s7807_s22, %s7805_s23  }
0x3ac4   :  { %6504 = dma.done.wait [#allocation4], 256  }
0x3ac5   :  { %6505 = vsyncadd [#allocation4], 4294967040 }
0x3ac6   :  { %6506 = dma.done.wait [#allocation16], 1024  }
0x3ac7   :  { %6507 = vsyncadd [#allocation16], 4294966272 }
0x3ac8   :  { %5167 = vsyncpa [#allocation3], 1 }
0x3ac9   :  { %5168 = vsyncpa [#allocation6], 1 }
0x3aca   :  { %5169 = vsyncpa [#allocation9], 1 }
0x3acb   :  { %5170 = vsyncpa [#allocation12], 1 }
0x3acc   :  { %5171 = vsyncpa [#allocation4], 1 }
0x3acd   :  { %5172 = vsyncpa [#allocation16], 1 }

</bundles_post_ra>
